<compile_context>
chip_gen: v6e
topology: v6e:2x2x1
jax: 0.10.0
libtpu: 0.0.40
codegen_flags: <defaults>
</compile_context>

<pallas_src>
import functools

import jax
import jax.numpy as jnp
from jax.experimental import pallas as pl
from jax.experimental.pallas import tpu as pltpu

_BN_EPS = 1e-5
_PAD_L = 16   # sublane-aligned (bf16 packs 16 rows/tile) start column of the
              # halo interior; columns _PAD_L-1 and _PAD_L+W are the zero pad.


# ---------------- fused Pallas kernel ----------------

def _bottleneck_kernel(x_ref, w1_ref, w2_ref, w3_ref,
                       b1_ref, b2_ref, b3_ref,
                       o_ref, halo_ref, patch_ref, *, H, W):
    """Nb images per grid step, fully fused in VMEM.

    x_ref    : (Nb, H*W, Cin)   bf16  input (also the residual identity)
    w1_ref   : (Cin, P)         bf16  conv1 weight with bn1 scale folded in
    w2_ref   : (9*P, P)         bf16  conv2 weight ((ky,kx,ci) -> row), bn2 folded
    w3_ref   : (P, Cout)        bf16  conv3 weight with bn3 scale folded in
    b*_ref   : (1, C)           f32   folded BN biases
    o_ref    : (Nb, H*W, Cout)  bf16
    halo_ref : (Nb, H+2, _PAD_L+W+1, P) bf16  zero-padded h1; interior lives at
               columns [_PAD_L, _PAD_L+W), only columns >= _PAD_L-1 are read.
    patch_ref: (Nb*H*W, 9*P)    bf16  im2col patch matrix for the 3x3 conv
    """
    Nb, HW, Cin = x_ref.shape
    P = w1_ref.shape[1]
    L = _PAD_L

    # ---- conv1 (1x1, bn1 scale pre-folded) + bias + relu ----
    x = x_ref[...].reshape(Nb * HW, Cin)                              # bf16
    h1 = jnp.dot(x, w1_ref[...], preferred_element_type=jnp.float32)
    h1 = jnp.maximum(h1 + b1_ref[...], 0.0).astype(jnp.bfloat16)      # (Nb*HW, P)

    # ---- stage h1 into the zero-padded halo and build the im2col patch ----
    zrow = jnp.zeros((1, W + 2, P), jnp.bfloat16)
    zcol = jnp.zeros((H, 1, P), jnp.bfloat16)
    for b in range(Nb):
        # Re-zero only the padding cells the taps actually read (cheap, and
        # correct no matter how the parallel grid is sharded across cores).
        halo_ref[b, 0:1, L - 1:L + W + 1, :] = zrow
        halo_ref[b, H + 1:H + 2, L - 1:L + W + 1, :] = zrow
        halo_ref[b, 1:H + 1, L - 1:L, :] = zcol
        halo_ref[b, 1:H + 1, L + W:L + W + 1, :] = zcol
        # Interior store (sublane-aligned at column L).
        halo_ref[b, 1:H + 1, L:L + W, :] = (
            h1[b * HW:(b + 1) * HW].reshape(H, W, P))
        # Nine shifted reads -> one (HW, 9P) patch slab per image.
        for ky in range(3):
            for kx in range(3):
                t = ky * 3 + kx
                tap = halo_ref[b, ky:ky + H, L - 1 + kx:L - 1 + kx + W, :]
                patch_ref[b * HW:(b + 1) * HW, t * P:(t + 1) * P] = (
                    tap.reshape(HW, P))

    # ---- conv2 (3x3) as ONE K=9*P matmul + bias + relu ----
    h2 = jnp.dot(patch_ref[...], w2_ref[...],
                 preferred_element_type=jnp.float32)
    h2 = jnp.maximum(h2 + b2_ref[...], 0.0).astype(jnp.bfloat16)      # (Nb*HW, P)

    # ---- conv3 (1x1) + bias + residual + relu ----
    h3 = jnp.dot(h2, w3_ref[...], preferred_element_type=jnp.float32)
    ident = x_ref[...].reshape(Nb * HW, -1)        # re-load at point of use
    out = jnp.maximum(h3 + b3_ref[...] + ident, 0.0)
    o_ref[...] = out.reshape(Nb, HW, -1).astype(o_ref.dtype)


# ---------------- wrapper ----------------

def _fold_bn(gamma, beta, mean, var, eps=_BN_EPS):
    scale = gamma / jnp.sqrt(var + eps)
    bias = beta - mean * scale
    return scale.astype(jnp.float32), bias[None, :].astype(jnp.float32)


def _pick_batch_block(n):
    # A few images per step amortize the ~0.35us/step overhead, but keep the
    # parallel grid length >= 2 so both v7x TensorCores get work.
    for nb in (4, 2):
        if n % nb == 0 and n // nb >= 2:
            return nb
    return 1


def bottleneck_forward(x_nchw, params, batch_block=None):
    """Bottleneck.forward for stride=1, downsample=None (eval-mode BN)."""
    N, Cin, H, W = x_nchw.shape
    P = params["w1"].shape[1]            # planes
    Cout = params["w3"].shape[1]         # planes * expansion
    assert Cout == Cin, "residual add requires inplanes == planes * expansion"
    HW = H * W
    Nb = batch_block if batch_block is not None else _pick_batch_block(N)
    assert N % Nb == 0

    # NCHW -> (N, H*W, C) channels-last; activations in bf16 for the MXU.
    # NOTE: the residual identity is the bf16-cast x (within the 5e-2 tol).
    x_flat = (jnp.transpose(x_nchw, (0, 2, 3, 1))
              .reshape(N, HW, Cin).astype(jnp.bfloat16))

    s1, b1 = _fold_bn(params["g1"], params["be1"], params["m1"], params["v1"])
    s2, b2 = _fold_bn(params["g2"], params["be2"], params["m2"], params["v2"])
    s3, b3 = _fold_bn(params["g3"], params["be3"], params["m3"], params["v3"])

    # Fold the BN scales into the conv weights (in f32), then cast once to bf16.
    w1 = (params["w1"] * s1[None, :]).astype(jnp.bfloat16)                 # (Cin, P)
    w2 = (params["w2"] * s2[None, None, None, :]
          ).reshape(9 * P, P).astype(jnp.bfloat16)                         # (9P, P)
    w3 = (params["w3"] * s3[None, :]).astype(jnp.bfloat16)                 # (P, Cout)

    def const_spec(shape):
        return pl.BlockSpec(shape, lambda n: (0,) * len(shape))

    kernel = functools.partial(_bottleneck_kernel, H=H, W=W)

    out_flat = pl.pallas_call(
        kernel,
        out_shape=jax.ShapeDtypeStruct((N, HW, Cout), jnp.bfloat16),
        grid=(N // Nb,),
        in_specs=[
            pl.BlockSpec((Nb, HW, Cin), lambda n: (n, 0, 0)),   # x / identity
            const_spec((Cin, P)),                               # w1 (bn1 folded)
            const_spec((9 * P, P)),                             # w2 (bn2 folded)
            const_spec((P, Cout)),                              # w3 (bn3 folded)
            const_spec((1, P)),                                 # b1
            const_spec((1, P)),                                 # b2
            const_spec((1, Cout)),                              # b3
        ],
        out_specs=pl.BlockSpec((Nb, HW, Cout), lambda n: (n, 0, 0)),
        scratch_shapes=[
            pltpu.VMEM((Nb, H + 2, _PAD_L + W + 1, P), jnp.bfloat16),  # halo
            pltpu.VMEM((Nb * HW, 9 * P), jnp.bfloat16),                # im2col
        ],
        compiler_params=pltpu.CompilerParams(
            dimension_semantics=("parallel",),        # batch shards across TCs
        ),
    )(x_flat, w1, w2, w3, b1, b2, b3)

    out = out_flat.reshape(N, H, W, Cout)
    return jnp.transpose(out, (0, 3, 1, 2))           # back to NCHW (bf16)


# ---------------- pure-JAX reference (fp32, for validation) ----------------

def bottleneck_reference(x_nchw, params):
    def bn(y, g, be, m, v):
        return ((y - m[None, :, None, None])
                / jnp.sqrt(v[None, :, None, None] + _BN_EPS)
                * g[None, :, None, None] + be[None, :, None, None])

    dn = ('NCHW', 'HWIO', 'NCHW')
    w1 = params["w1"][None, None]                 # (1,1,Cin,P)
    w2 = params["w2"]                             # (3,3,P,P) HWIO
    w3 = params["w3"][None, None]                 # (1,1,P,Cout)

    h = jax.lax.conv_general_dilated(x_nchw, w1, (1, 1), 'VALID',
                                     dimension_numbers=dn)
    h = jax.nn.relu(bn(h, params["g1"], params["be1"], params["m1"], params["v1"]))
    h = jax.lax.conv_general_dilated(h, w2, (1, 1), ((1, 1), (1, 1)),
                                     dimension_numbers=dn)
    h = jax.nn.relu(bn(h, params["g2"], params["be2"], params["m2"], params["v2"]))
    h = jax.lax.conv_general_dilated(h, w3, (1, 1), 'VALID',
                                     dimension_numbers=dn)
    h = bn(h, params["g3"], params["be3"], params["m3"], params["v3"])
    return jax.nn.relu(h + x_nchw)


# ---------------- deterministic parameter init ----------------

def init_params(key, inplanes, planes):
    expansion = 4
    cout = planes * expansion
    ks = jax.random.split(key, 15)

    def wgt(k, shape, fan_in):
        return jax.random.normal(k, shape, jnp.float32) / jnp.sqrt(float(fan_in))

    return {
        # conv weights (channels-last layouts used by the kernel)
        "w1": wgt(ks[0], (inplanes, planes), inplanes),
        "w2": wgt(ks[1], (3, 3, planes, planes), 9 * planes),
        "w3": wgt(ks[2], (planes, cout), planes),
        # bn1
        "g1": jax.random.uniform(ks[3], (planes,), jnp.float32, 0.8, 1.2),
        "be1": 0.1 * jax.random.normal(ks[4], (planes,), jnp.float32),
        "m1": 0.1 * jax.random.normal(ks[5], (planes,), jnp.float32),
        "v1": jax.random.uniform(ks[6], (planes,), jnp.float32, 0.8, 1.2),
        # bn2
        "g2": jax.random.uniform(ks[7], (planes,), jnp.float32, 0.8, 1.2),
        "be2": 0.1 * jax.random.normal(ks[8], (planes,), jnp.float32),
        "m2": 0.1 * jax.random.normal(ks[9], (planes,), jnp.float32),
        "v2": jax.random.uniform(ks[10], (planes,), jnp.float32, 0.8, 1.2),
        # bn3
        "g3": jax.random.uniform(ks[11], (cout,), jnp.float32, 0.8, 1.2),
        "be3": 0.1 * jax.random.normal(ks[12], (cout,), jnp.float32),
        "m3": 0.1 * jax.random.normal(ks[13], (cout,), jnp.float32),
        "v3": jax.random.uniform(ks[14], (cout,), jnp.float32, 0.8, 1.2),
    }


if __name__ == "__main__":
    N, H, W = 2, 16, 16
    planes = 32
    inplanes = planes * 4          # residual path requires inplanes == planes * 4

    key = jax.random.PRNGKey(0)
    k_x, k_p = jax.random.split(key)
    x = jax.random.normal(k_x, (N, inplanes, H, W), jnp.float32)
    params = init_params(k_p, inplanes, planes)

    fwd = jax.jit(bottleneck_forward)
    out = jax.block_until_ready(fwd(x, params))

    ref = bottleneck_reference(x, params)
    assert out.shape == x.shape
    max_err = float(jnp.max(jnp.abs(out.astype(jnp.float32) - ref)))
    ref_scale = float(jnp.max(jnp.abs(ref)))
    # bf16 matmul inputs/output (f32 accumulation) -> relative tol vs fp32 ref.
    if max_err <= 5e-2 * ref_scale:
        print("KERNEL_OK")
    else:
        raise SystemExit(f"mismatch vs reference: max_err={max_err}, "
                         f"ref_scale={ref_scale}")
</pallas_src>

<mosaic_0001>
module attributes {stable_mosaic.version = 11 : i64} {
  func.func @_bottleneck_kernel(%arg0: i32, %arg1: memref<1x256x128xbf16, #tpu.memory_space<vmem>>, %arg2: memref<128x32xbf16, #tpu.memory_space<vmem>>, %arg3: memref<288x32xbf16, #tpu.memory_space<vmem>>, %arg4: memref<32x128xbf16, #tpu.memory_space<vmem>>, %arg5: memref<1x32xf32, #tpu.memory_space<vmem>>, %arg6: memref<1x32xf32, #tpu.memory_space<vmem>>, %arg7: memref<1x128xf32, #tpu.memory_space<vmem>>, %arg8: memref<1x256x128xbf16, #tpu.memory_space<vmem>>, %arg9: memref<1x18x33x32xbf16, #tpu.memory_space<vmem>>, %arg10: memref<256x288xbf16, #tpu.memory_space<vmem>>) attributes {dimension_semantics = [#tpu.dimension_semantics<parallel>], iteration_bounds = array<i64: 2>, scalar_prefetch = 0 : i64, scratch_operands = 2 : i64, tpu.core_type = #tpu.core_type<tc>, window_params = [{transform_indices = @transform_0, window_bounds = array<i64: 1, 256, 128>}, {pipeline_mode = #tpu.pipeline_mode<synchronous>, transform_indices = @transform_1, window_bounds = array<i64: 128, 32>}, {pipeline_mode = #tpu.pipeline_mode<synchronous>, transform_indices = @transform_2, window_bounds = array<i64: 288, 32>}, {pipeline_mode = #tpu.pipeline_mode<synchronous>, transform_indices = @transform_3, window_bounds = array<i64: 32, 128>}, {pipeline_mode = #tpu.pipeline_mode<synchronous>, transform_indices = @transform_4, window_bounds = array<i64: 1, 32>}, {pipeline_mode = #tpu.pipeline_mode<synchronous>, transform_indices = @transform_5, window_bounds = array<i64: 1, 32>}, {pipeline_mode = #tpu.pipeline_mode<synchronous>, transform_indices = @transform_6, window_bounds = array<i64: 1, 128>}, {transform_indices = @transform_7, window_bounds = array<i64: 1, 256, 128>}]} {
    %c0 = arith.constant 0 : index
    %c0_0 = arith.constant 0 : index
    %c0_1 = arith.constant 0 : index
    %0 = vector.load %arg1[%c0, %c0_0, %c0_1] : memref<1x256x128xbf16, #tpu.memory_space<vmem>>, vector<1x256x128xbf16>
    %1 = vector.shape_cast %0 : vector<1x256x128xbf16> to vector<256x128xbf16>
    %c0_2 = arith.constant 0 : index
    %c0_3 = arith.constant 0 : index
    %2 = vector.load %arg2[%c0_2, %c0_3] : memref<128x32xbf16, #tpu.memory_space<vmem>>, vector<128x32xbf16>
    %cst = arith.constant dense<0.000000e+00> : vector<256x32xf32>
    %3 = tpu.matmul %1, %2, %cst {dimension_numbers = #tpu.dot_dimension_numbers<[1], [0], [0], [1], [0, 0, 1, 1], [], []>} : vector<256x128xbf16>, vector<128x32xbf16>, vector<256x32xf32> -> vector<256x32xf32>
    %c0_4 = arith.constant 0 : index
    %c0_5 = arith.constant 0 : index
    %4 = vector.load %arg5[%c0_4, %c0_5] : memref<1x32xf32, #tpu.memory_space<vmem>>, vector<1x32xf32>
    %5 = vector.broadcast %4 : vector<1x32xf32> to vector<256x32xf32>
    %6 = arith.addf %3, %5 : vector<256x32xf32>
    %cst_6 = arith.constant 0.000000e+00 : f32
    %7 = vector.broadcast %cst_6 : f32 to vector<256x32xf32>
    %8 = arith.maximumf %6, %7 : vector<256x32xf32>
    %9 = arith.truncf %8 : vector<256x32xf32> to vector<256x32xbf16>
    %cst_7 = arith.constant 0.000000e+00 : bf16
    %10 = vector.broadcast %cst_7 : bf16 to vector<1x18x32xbf16>
    %cst_8 = arith.constant 0.000000e+00 : bf16
    %11 = vector.broadcast %cst_8 : bf16 to vector<16x1x32xbf16>
    %c0_9 = arith.constant 0 : index
    %c0_10 = arith.constant 0 : index
    %c15 = arith.constant 15 : index
    %c0_11 = arith.constant 0 : index
    %12 = vector.load %arg9[%c0_9, %c0_10, %c15, %c0_11] : memref<1x18x33x32xbf16, #tpu.memory_space<vmem>>, vector<1x1x18x32xbf16>
    %13 = vector.shape_cast %12 : vector<1x1x18x32xbf16> to vector<1x18x32xbf16>
    %14 = vector.shape_cast %10 : vector<1x18x32xbf16> to vector<1x1x18x32xbf16>
    tpu.vector_store %arg9[%c0_9, %c0_10, %c15, %c0_11], %14 {strides = array<i32>} : memref<1x18x33x32xbf16, #tpu.memory_space<vmem>>, vector<1x1x18x32xbf16>,
    %c0_12 = arith.constant 0 : index
    %c17 = arith.constant 17 : index
    %c15_13 = arith.constant 15 : index
    %c0_14 = arith.constant 0 : index
    %15 = vector.load %arg9[%c0_12, %c17, %c15_13, %c0_14] : memref<1x18x33x32xbf16, #tpu.memory_space<vmem>>, vector<1x1x18x32xbf16>
    %16 = vector.shape_cast %15 : vector<1x1x18x32xbf16> to vector<1x18x32xbf16>
    %17 = vector.shape_cast %10 : vector<1x18x32xbf16> to vector<1x1x18x32xbf16>
    tpu.vector_store %arg9[%c0_12, %c17, %c15_13, %c0_14], %17 {strides = array<i32>} : memref<1x18x33x32xbf16, #tpu.memory_space<vmem>>, vector<1x1x18x32xbf16>,
    %c0_15 = arith.constant 0 : index
    %c1 = arith.constant 1 : index
    %c15_16 = arith.constant 15 : index
    %c0_17 = arith.constant 0 : index
    %18 = vector.load %arg9[%c0_15, %c1, %c15_16, %c0_17] : memref<1x18x33x32xbf16, #tpu.memory_space<vmem>>, vector<1x16x1x32xbf16>
    %19 = vector.shape_cast %18 : vector<1x16x1x32xbf16> to vector<16x1x32xbf16>
    %20 = vector.shape_cast %11 : vector<16x1x32xbf16> to vector<1x16x1x32xbf16>
    tpu.vector_store %arg9[%c0_15, %c1, %c15_16, %c0_17], %20 {strides = array<i32>} : memref<1x18x33x32xbf16, #tpu.memory_space<vmem>>, vector<1x16x1x32xbf16>,
    %c0_18 = arith.constant 0 : index
    %c1_19 = arith.constant 1 : index
    %c32 = arith.constant 32 : index
    %c0_20 = arith.constant 0 : index
    %21 = vector.load %arg9[%c0_18, %c1_19, %c32, %c0_20] : memref<1x18x33x32xbf16, #tpu.memory_space<vmem>>, vector<1x16x1x32xbf16>
    %22 = vector.shape_cast %21 : vector<1x16x1x32xbf16> to vector<16x1x32xbf16>
    %23 = vector.shape_cast %11 : vector<16x1x32xbf16> to vector<1x16x1x32xbf16>
    tpu.vector_store %arg9[%c0_18, %c1_19, %c32, %c0_20], %23 {strides = array<i32>} : memref<1x18x33x32xbf16, #tpu.memory_space<vmem>>, vector<1x16x1x32xbf16>,
    %24 = vector.shape_cast %9 : vector<256x32xbf16> to vector<16x16x32xbf16>
    %c0_21 = arith.constant 0 : index
    %c1_22 = arith.constant 1 : index
    %c16 = arith.constant 16 : index
    %c0_23 = arith.constant 0 : index
    %25 = vector.load %arg9[%c0_21, %c1_22, %c16, %c0_23] : memref<1x18x33x32xbf16, #tpu.memory_space<vmem>>, vector<1x16x16x32xbf16>
    %26 = vector.shape_cast %25 : vector<1x16x16x32xbf16> to vector<16x16x32xbf16>
    %27 = vector.shape_cast %24 : vector<16x16x32xbf16> to vector<1x16x16x32xbf16>
    tpu.vector_store %arg9[%c0_21, %c1_22, %c16, %c0_23], %27 {strides = array<i32>} : memref<1x18x33x32xbf16, #tpu.memory_space<vmem>>, vector<1x16x16x32xbf16>,
    %c0_24 = arith.constant 0 : index
    %c0_25 = arith.constant 0 : index
    %c15_26 = arith.constant 15 : index
    %c0_27 = arith.constant 0 : index
    %28 = vector.load %arg9[%c0_24, %c0_25, %c15_26, %c0_27] : memref<1x18x33x32xbf16, #tpu.memory_space<vmem>>, vector<1x16x16x32xbf16>
    %29 = vector.shape_cast %28 : vector<1x16x16x32xbf16> to vector<16x16x32xbf16>
    %30 = vector.shape_cast %29 : vector<16x16x32xbf16> to vector<256x32xbf16>
    %c0_28 = arith.constant 0 : index
    %c0_29 = arith.constant 0 : index
    %31 = vector.load %arg10[%c0_28, %c0_29] : memref<256x288xbf16, #tpu.memory_space<vmem>>, vector<256x32xbf16>
    tpu.vector_store %arg10[%c0_28, %c0_29], %30 {strides = array<i32>} : memref<256x288xbf16, #tpu.memory_space<vmem>>, vector<256x32xbf16>,
    %c0_30 = arith.constant 0 : index
    %c0_31 = arith.constant 0 : index
    %c16_32 = arith.constant 16 : index
    %c0_33 = arith.constant 0 : index
    %32 = vector.load %arg9[%c0_30, %c0_31, %c16_32, %c0_33] : memref<1x18x33x32xbf16, #tpu.memory_space<vmem>>, vector<1x16x16x32xbf16>
    %33 = vector.shape_cast %32 : vector<1x16x16x32xbf16> to vector<16x16x32xbf16>
    %34 = vector.shape_cast %33 : vector<16x16x32xbf16> to vector<256x32xbf16>
    %c0_34 = arith.constant 0 : index
    %c32_35 = arith.constant 32 : index
    %35 = vector.load %arg10[%c0_34, %c32_35] : memref<256x288xbf16, #tpu.memory_space<vmem>>, vector<256x32xbf16>
    tpu.vector_store %arg10[%c0_34, %c32_35], %34 {strides = array<i32>} : memref<256x288xbf16, #tpu.memory_space<vmem>>, vector<256x32xbf16>,
    %c0_36 = arith.constant 0 : index
    %c0_37 = arith.constant 0 : index
    %c17_38 = arith.constant 17 : index
    %c0_39 = arith.constant 0 : index
    %36 = vector.load %arg9[%c0_36, %c0_37, %c17_38, %c0_39] : memref<1x18x33x32xbf16, #tpu.memory_space<vmem>>, vector<1x16x16x32xbf16>
    %37 = vector.shape_cast %36 : vector<1x16x16x32xbf16> to vector<16x16x32xbf16>
    %38 = vector.shape_cast %37 : vector<16x16x32xbf16> to vector<256x32xbf16>
    %c0_40 = arith.constant 0 : index
    %c64 = arith.constant 64 : index
    %39 = vector.load %arg10[%c0_40, %c64] : memref<256x288xbf16, #tpu.memory_space<vmem>>, vector<256x32xbf16>
    tpu.vector_store %arg10[%c0_40, %c64], %38 {strides = array<i32>} : memref<256x288xbf16, #tpu.memory_space<vmem>>, vector<256x32xbf16>,
    %c0_41 = arith.constant 0 : index
    %c1_42 = arith.constant 1 : index
    %c15_43 = arith.constant 15 : index
    %c0_44 = arith.constant 0 : index
    %40 = vector.load %arg9[%c0_41, %c1_42, %c15_43, %c0_44] : memref<1x18x33x32xbf16, #tpu.memory_space<vmem>>, vector<1x16x16x32xbf16>
    %41 = vector.shape_cast %40 : vector<1x16x16x32xbf16> to vector<16x16x32xbf16>
    %42 = vector.shape_cast %41 : vector<16x16x32xbf16> to vector<256x32xbf16>
    %c0_45 = arith.constant 0 : index
    %c96 = arith.constant 96 : index
    %43 = vector.load %arg10[%c0_45, %c96] : memref<256x288xbf16, #tpu.memory_space<vmem>>, vector<256x32xbf16>
    tpu.vector_store %arg10[%c0_45, %c96], %42 {strides = array<i32>} : memref<256x288xbf16, #tpu.memory_space<vmem>>, vector<256x32xbf16>,
    %c0_46 = arith.constant 0 : index
    %c1_47 = arith.constant 1 : index
    %c16_48 = arith.constant 16 : index
    %c0_49 = arith.constant 0 : index
    %44 = vector.load %arg9[%c0_46, %c1_47, %c16_48, %c0_49] : memref<1x18x33x32xbf16, #tpu.memory_space<vmem>>, vector<1x16x16x32xbf16>
    %45 = vector.shape_cast %44 : vector<1x16x16x32xbf16> to vector<16x16x32xbf16>
    %46 = vector.shape_cast %45 : vector<16x16x32xbf16> to vector<256x32xbf16>
    %c0_50 = arith.constant 0 : index
    %c128 = arith.constant 128 : index
    %47 = vector.load %arg10[%c0_50, %c128] : memref<256x288xbf16, #tpu.memory_space<vmem>>, vector<256x32xbf16>
    tpu.vector_store %arg10[%c0_50, %c128], %46 {strides = array<i32>} : memref<256x288xbf16, #tpu.memory_space<vmem>>, vector<256x32xbf16>,
    %c0_51 = arith.constant 0 : index
    %c1_52 = arith.constant 1 : index
    %c17_53 = arith.constant 17 : index
    %c0_54 = arith.constant 0 : index
    %48 = vector.load %arg9[%c0_51, %c1_52, %c17_53, %c0_54] : memref<1x18x33x32xbf16, #tpu.memory_space<vmem>>, vector<1x16x16x32xbf16>
    %49 = vector.shape_cast %48 : vector<1x16x16x32xbf16> to vector<16x16x32xbf16>
    %50 = vector.shape_cast %49 : vector<16x16x32xbf16> to vector<256x32xbf16>
    %c0_55 = arith.constant 0 : index
    %c160 = arith.constant 160 : index
    %51 = vector.load %arg10[%c0_55, %c160] : memref<256x288xbf16, #tpu.memory_space<vmem>>, vector<256x32xbf16>
    tpu.vector_store %arg10[%c0_55, %c160], %50 {strides = array<i32>} : memref<256x288xbf16, #tpu.memory_space<vmem>>, vector<256x32xbf16>,
    %c0_56 = arith.constant 0 : index
    %c2 = arith.constant 2 : index
    %c15_57 = arith.constant 15 : index
    %c0_58 = arith.constant 0 : index
    %52 = vector.load %arg9[%c0_56, %c2, %c15_57, %c0_58] : memref<1x18x33x32xbf16, #tpu.memory_space<vmem>>, vector<1x16x16x32xbf16>
    %53 = vector.shape_cast %52 : vector<1x16x16x32xbf16> to vector<16x16x32xbf16>
    %54 = vector.shape_cast %53 : vector<16x16x32xbf16> to vector<256x32xbf16>
    %c0_59 = arith.constant 0 : index
    %c192 = arith.constant 192 : index
    %55 = vector.load %arg10[%c0_59, %c192] : memref<256x288xbf16, #tpu.memory_space<vmem>>, vector<256x32xbf16>
    tpu.vector_store %arg10[%c0_59, %c192], %54 {strides = array<i32>} : memref<256x288xbf16, #tpu.memory_space<vmem>>, vector<256x32xbf16>,
    %c0_60 = arith.constant 0 : index
    %c2_61 = arith.constant 2 : index
    %c16_62 = arith.constant 16 : index
    %c0_63 = arith.constant 0 : index
    %56 = vector.load %arg9[%c0_60, %c2_61, %c16_62, %c0_63] : memref<1x18x33x32xbf16, #tpu.memory_space<vmem>>, vector<1x16x16x32xbf16>
    %57 = vector.shape_cast %56 : vector<1x16x16x32xbf16> to vector<16x16x32xbf16>
    %58 = vector.shape_cast %57 : vector<16x16x32xbf16> to vector<256x32xbf16>
    %c0_64 = arith.constant 0 : index
    %c224 = arith.constant 224 : index
    %59 = vector.load %arg10[%c0_64, %c224] : memref<256x288xbf16, #tpu.memory_space<vmem>>, vector<256x32xbf16>
    tpu.vector_store %arg10[%c0_64, %c224], %58 {strides = array<i32>} : memref<256x288xbf16, #tpu.memory_space<vmem>>, vector<256x32xbf16>,
    %c0_65 = arith.constant 0 : index
    %c2_66 = arith.constant 2 : index
    %c17_67 = arith.constant 17 : index
    %c0_68 = arith.constant 0 : index
    %60 = vector.load %arg9[%c0_65, %c2_66, %c17_67, %c0_68] : memref<1x18x33x32xbf16, #tpu.memory_space<vmem>>, vector<1x16x16x32xbf16>
    %61 = vector.shape_cast %60 : vector<1x16x16x32xbf16> to vector<16x16x32xbf16>
    %62 = vector.shape_cast %61 : vector<16x16x32xbf16> to vector<256x32xbf16>
    %c0_69 = arith.constant 0 : index
    %c256 = arith.constant 256 : index
    %63 = vector.load %arg10[%c0_69, %c256] : memref<256x288xbf16, #tpu.memory_space<vmem>>, vector<256x32xbf16>
    tpu.vector_store %arg10[%c0_69, %c256], %62 {strides = array<i32>} : memref<256x288xbf16, #tpu.memory_space<vmem>>, vector<256x32xbf16>,
    %c0_70 = arith.constant 0 : index
    %c0_71 = arith.constant 0 : index
    %64 = vector.load %arg10[%c0_70, %c0_71] : memref<256x288xbf16, #tpu.memory_space<vmem>>, vector<256x288xbf16>
    %c0_72 = arith.constant 0 : index
    %c0_73 = arith.constant 0 : index
    %65 = vector.load %arg3[%c0_72, %c0_73] : memref<288x32xbf16, #tpu.memory_space<vmem>>, vector<288x32xbf16>
    %cst_74 = arith.constant dense<0.000000e+00> : vector<256x32xf32>
    %66 = tpu.matmul %64, %65, %cst_74 {dimension_numbers = #tpu.dot_dimension_numbers<[1], [0], [0], [1], [0, 0, 1, 1], [], []>} : vector<256x288xbf16>, vector<288x32xbf16>, vector<256x32xf32> -> vector<256x32xf32>
    %c0_75 = arith.constant 0 : index
    %c0_76 = arith.constant 0 : index
    %67 = vector.load %arg6[%c0_75, %c0_76] : memref<1x32xf32, #tpu.memory_space<vmem>>, vector<1x32xf32>
    %68 = vector.broadcast %67 : vector<1x32xf32> to vector<256x32xf32>
    %69 = arith.addf %66, %68 : vector<256x32xf32>
    %cst_77 = arith.constant 0.000000e+00 : f32
    %70 = vector.broadcast %cst_77 : f32 to vector<256x32xf32>
    %71 = arith.maximumf %69, %70 : vector<256x32xf32>
    %72 = arith.truncf %71 : vector<256x32xf32> to vector<256x32xbf16>
    %c0_78 = arith.constant 0 : index
    %c0_79 = arith.constant 0 : index
    %73 = vector.load %arg4[%c0_78, %c0_79] : memref<32x128xbf16, #tpu.memory_space<vmem>>, vector<32x128xbf16>
    %cst_80 = arith.constant dense<0.000000e+00> : vector<256x128xf32>
    %74 = tpu.matmul %72, %73, %cst_80 {dimension_numbers = #tpu.dot_dimension_numbers<[1], [0], [0], [1], [0, 0, 1, 1], [], []>} : vector<256x32xbf16>, vector<32x128xbf16>, vector<256x128xf32> -> vector<256x128xf32>
    %c0_81 = arith.constant 0 : index
    %c0_82 = arith.constant 0 : index
    %c0_83 = arith.constant 0 : index
    %75 = vector.load %arg1[%c0_81, %c0_82, %c0_83] : memref<1x256x128xbf16, #tpu.memory_space<vmem>>, vector<1x256x128xbf16>
    %76 = vector.shape_cast %75 : vector<1x256x128xbf16> to vector<256x128xbf16>
    %c0_84 = arith.constant 0 : index
    %c0_85 = arith.constant 0 : index
    %77 = vector.load %arg7[%c0_84, %c0_85] : memref<1x128xf32, #tpu.memory_space<vmem>>, vector<1x128xf32>
    %78 = vector.broadcast %77 : vector<1x128xf32> to vector<256x128xf32>
    %79 = arith.addf %74, %78 : vector<256x128xf32>
    %80 = arith.extf %76 : vector<256x128xbf16> to vector<256x128xf32>
    %81 = arith.addf %79, %80 : vector<256x128xf32>
    %cst_86 = arith.constant 0.000000e+00 : f32
    %82 = vector.broadcast %cst_86 : f32 to vector<256x128xf32>
    %83 = arith.maximumf %81, %82 : vector<256x128xf32>
    %84 = vector.shape_cast %83 : vector<256x128xf32> to vector<1x256x128xf32>
    %85 = arith.truncf %84 : vector<1x256x128xf32> to vector<1x256x128xbf16>
    %c0_87 = arith.constant 0 : index
    %c0_88 = arith.constant 0 : index
    %c0_89 = arith.constant 0 : index
    %86 = vector.load %arg8[%c0_87, %c0_88, %c0_89] : memref<1x256x128xbf16, #tpu.memory_space<vmem>>, vector<1x256x128xbf16>
    tpu.vector_store %arg8[%c0_87, %c0_88, %c0_89], %85 {strides = array<i32>} : memref<1x256x128xbf16, #tpu.memory_space<vmem>>, vector<1x256x128xbf16>,
    return
  }
  func.func @transform_0(%arg0: i32) -> (i32, i32, i32) {
    %c0_i32 = arith.constant 0 : i32
    %c0_i32_0 = arith.constant 0 : i32
    %c0_i32_1 = arith.constant 0 : i32
    return %arg0, %c0_i32, %c0_i32_0 : i32, i32, i32
  }
  func.func @transform_1(%arg0: i32) -> (i32, i32) {
    %c0_i32 = arith.constant 0 : i32
    %c0_i32_0 = arith.constant 0 : i32
    %c0_i32_1 = arith.constant 0 : i32
    return %c0_i32, %c0_i32_0 : i32, i32
  }
  func.func @transform_2(%arg0: i32) -> (i32, i32) {
    %c0_i32 = arith.constant 0 : i32
    %c0_i32_0 = arith.constant 0 : i32
    %c0_i32_1 = arith.constant 0 : i32
    return %c0_i32, %c0_i32_0 : i32, i32
  }
  func.func @transform_3(%arg0: i32) -> (i32, i32) {
    %c0_i32 = arith.constant 0 : i32
    %c0_i32_0 = arith.constant 0 : i32
    %c0_i32_1 = arith.constant 0 : i32
    return %c0_i32, %c0_i32_0 : i32, i32
  }
  func.func @transform_4(%arg0: i32) -> (i32, i32) {
    %c0_i32 = arith.constant 0 : i32
    %c0_i32_0 = arith.constant 0 : i32
    %c0_i32_1 = arith.constant 0 : i32
    return %c0_i32, %c0_i32_0 : i32, i32
  }
  func.func @transform_5(%arg0: i32) -> (i32, i32) {
    %c0_i32 = arith.constant 0 : i32
    %c0_i32_0 = arith.constant 0 : i32
    %c0_i32_1 = arith.constant 0 : i32
    return %c0_i32, %c0_i32_0 : i32, i32
  }
  func.func @transform_6(%arg0: i32) -> (i32, i32) {
    %c0_i32 = arith.constant 0 : i32
    %c0_i32_0 = arith.constant 0 : i32
    %c0_i32_1 = arith.constant 0 : i32
    return %c0_i32, %c0_i32_0 : i32, i32
  }
  func.func @transform_7(%arg0: i32) -> (i32, i32, i32) {
    %c0_i32 = arith.constant 0 : i32
    %c0_i32_0 = arith.constant 0 : i32
    %c0_i32_1 = arith.constant 0 : i32
    return %arg0, %c0_i32, %c0_i32_0 : i32, i32, i32
  }
}

</mosaic_0001>

<bundles_post_ra>
// kernel: bottleneck_forward.1
= control target key start
LH: loop header
LB: loop body
LE: loop exit
PB: predicated region body
PF: predicated region fallthrough
CT: control target
= control target key end

     0   :  { %12 = vsyncpa [#allocation5], 0  ;;  %s9664_s0 = inlined_call_operand.vmem [shape: bf16[2,256,128], index: 0, kind: input, shape index: {}]   ;;  %s9665_s1 = inlined_call_operand.vmem [shape: bf16[128,32], index: 1, kind: input, shape index: {}]   ;;  %s9666_s2 = inlined_call_operand.vmem [shape: bf16[288,32], index: 2, kind: input, shape index: {}]   ;;  %s9667_s3 = inlined_call_operand.vmem [shape: bf16[32,128], index: 3, kind: input, shape index: {}]   ;;  %s9668_s4 = inlined_call_operand.vmem [shape: f32[1,32], index: 4, kind: input, shape index: {}]   ;;  %s9669_s5 = inlined_call_operand.vmem [shape: f32[1,32], index: 5, kind: input, shape index: {}]   ;;  %s9670_s6 = inlined_call_operand.vmem [shape: f32[1,128], index: 6, kind: input, shape index: {}]   ;;  %s9671_s7 = inlined_call_operand.hbm [shape: bf16[2,256,128], index: 7, kind: output, shape index: {}]  }
   0x1   :  { %14 = vsyncpa [#allocation5 + $0x1], 0  ;;  %s7067_s24 = smov 0   ;;  %s7069_s25 = smov 0  }
   0x2   :  { %s7071_s26 = smov 0   ;;  %s7073_s27 = smov 0  }
   0x3 LB: > { %s7088_s28 = sadd.s32 4294967295, %s7019_s27   ;;  %s6014_s29 = sadd.s32 4294967294, %s7019_s27   ;;  %s7019_s27 = sphi %s7073_s27, %s9693_s27   ;;  %s7015_s26 = sphi %s7071_s26, %s9692_s26   ;;  %s7011_s25 = sphi %s7069_s25, %s9691_s25   ;;  %s7007_s24 = sphi %s7067_s24, %s9690_s24  }
   0x4   : > { %s7092_s30 = sadd.s32 1, %s7019_s27   ;;  %s179_s8 = sadd.s32 1, %s7015_s26 }
   0x5   : > { %s176_s9 = ssub.s32 %s7019_s27, %s7092_s30  ;;  %p189_p0 = scmp.ne.s32.totalorder %s7015_s26, %s7011_s25 }
   0x6   : > { %p177_p1 = scmp.eq.s32.totalorder %s176_s9, 0  ;;  %p190_p2 = scmp.eq.s32.totalorder %s7088_s28, 1 }
   0x7   : > { %p195_p3 = scmp.ne.s32.totalorder %s7011_s25, %s7007_s24  ;;  %p196_p4 = scmp.eq.s32.totalorder %s6014_s29, 1 }
   0x8   : > { %s7103_s10 = scalar_select %p177_p1, %s7015_s26, %s179_s8  }
   0x9   : > { %p7105_p5 = por %p190_p2, %p189_p0  ;;  %p7109_p6 = por %p196_p4, %p195_p3 }
   0xa   : > { %p6017_p7 = scmp.ge.s32.totalorder %s7019_s27, 1  ;;  %p240_p8 = scmp.lt.s32.totalorder %s7019_s27, 3 }
   0xc   : > { %p241_p9 = pnand %p6017_p7, %p240_p8 }
   0xe   : > { %244 = sbr.rel (%p241_p9) target bundleno = 1239 (0x4d7), region = 48 }
  0x13   : > { %v6857_v0 = vld [vmem:[%s9665_s1 + $0x38] sm:$0xff]   ;;  %p272_p10 = scmp.lt.s32.totalorder %s7088_s28, 1  ;;  %v6858_v1 = vld [vmem:[%s9665_s1 + $0x30] sm:$0xff]   ;;  %v6859_v2 = vld [vmem:[%s9665_s1 + $0x28] sm:$0xff]   ;;  %vm692_vm0 = vcmask 257024   ;;  %v7021_v20 = vmov 0  }
  0x14   : > { %6677 = vmatprep.subr.bf16.mxu0 %v6857_v0  ;;  %6797 = vmatprep.subr.bf16.mxu1 %v6857_v0  ;;  %v6860_v3 = vld [vmem:[%s9665_s1 + $0x20] sm:$0xff]   ;;  %v6861_v6 = vld [vmem:[%s9665_s1 + $0x18] sm:$0xff]   ;;  %v6862_v7 = vld [vmem:[%s9665_s1 + $0x10] sm:$0xff]   ;;  %693 = vst.msk [vmem:[#allocation2 + $0x8] sm:$0xf] %vm692_vm0, %v7021_v20  ;;  %vm695_vm1 = vcmask 253952  }
  0x15   : > { %s273_s17 = scalar_select %p272_p10, %s7088_s28, 1  ;;  %6678 = vmatpush3.bf16.msra.mxu0 %v6857_v0  ;;  %6805 = vmatpush3.bf16.msra.mxu1 %v6857_v0  ;;  %v6863_v8 = vld [vmem:[%s9665_s1 + $0x8] sm:$0xff]   ;;  %v6864_v9 = vld [vmem:[%s9665_s1] sm:$0xff]   ;;  %705 = vst.msk [vmem:[#allocation2 + $0x15c] sm:$0xf] %vm692_vm0, %v7021_v20  ;;  %vm686_vm7 = vcmask 257027  }
  0x16   : > { %6679 = vmatprep.subr.bf16.mxu0 %v6858_v1  ;;  %6798 = vmatprep.subr.bf16.mxu1 %v6858_v1  ;;  %706 = vst.msk [vmem:[#allocation2 + $0x160] sm:$0xf] %vm692_vm0, %v7021_v20  ;;  %694 = vst.msk [vmem:[#allocation2 + $0xc] sm:$0xf] %vm692_vm0, %v7021_v20  ;;  %vm696_vm2 = vsmask.f32 256 }
  0x17   : > { %s6265_s20 = sshll.u32 %s273_s17, 7  ;;  %vm7164_vm3 = vmand %vm695_vm1, %vm696_vm2  ;;  %v698_v29 = vld [vmem:[#allocation2 + $0x10] sm:$0x1]  ;;  %vm1658_vm4 = vsmask.f32 3328  ;;  %s7023_s21 = smov 64  }
  0x18   : > { %s7129_s23 = scalar_lea.vmem %s9664_s0, %s6265_s20  ;;  %s7022_s20 = smov 32   ;;  %v699_v32 = vsel %vm7164_vm3, 0, %v698_v29  ;;  %vm1659_vm5 = vsmask.f32 7440  ;;  %v762_v48 = vld [vmem:[#allocation2 + $0x38] sm:$0x1] }
  0x19   : > { %6680 = vmatpush3.bf16.msra.mxu0 %v6858_v1  ;;  %6806 = vmatpush3.bf16.msra.mxu1 %v6858_v1  ;;  %v6865_v4 = vld [vmem:[%s7129_s23] sm:$0xff]   ;;  %v6867_v10 = vld [vmem:[%s7129_s23 + $0x8] sm:$0xff]   ;;  %v6869_v12 = vld [vmem:[%s7129_s23 + $0x10] sm:$0xff]   ;;  %700 = vst [vmem:[#allocation2 + $0x10] sm:$0x1] %v699_v32  ;;  %v763_v49 = vsel %vm7164_vm3, 0, %v762_v48 }
  0x1a   : > { %6681 = vmatprep.subr.bf16.mxu0 %v6859_v2  ;;  %6799 = vmatprep.subr.bf16.mxu1 %v6859_v2  ;;  %v6866_v5 = vld [vmem:[%s7129_s23 + $0x40] sm:$0xff]   ;;  %v6868_v11 = vld [vmem:[%s7129_s23 + $0x48] sm:$0xff]   ;;  %v6875_v13 = vld [vmem:[%s7129_s23 + $0x50] sm:$0xff]   ;;  %vm687_vm8 = vsmask.f32 7950  ;;  %s7024_s15 = smov 96  }
  0x1b   : > { %6693 = vmatprep.mubr.bf16.mxu0 %v6865_v4  ;;  %6709 = vmatprep.mubr.bf16.mxu1 %v6866_v5  ;;  %v6870_v14 = vld [vmem:[%s7129_s23 + $0x18] sm:$0xff]   ;;  %v6871_v16 = vld [vmem:[%s7129_s23 + $0x20] sm:$0xff]   ;;  %v6872_v17 = vld [vmem:[%s7129_s23 + $0x28] sm:$0xff]   ;;  %764 = vst [vmem:[#allocation2 + $0x38] sm:$0x1] %v763_v49  ;;  %vm4999_vm11 = vcmask 261120  }
  0x1c   : > { %v6876_v15 = vld [vmem:[%s7129_s23 + $0x58] sm:$0xff]   ;;  %v6873_v18 = vld [vmem:[%s7129_s23 + $0x30] sm:$0xff]   ;;  %v1417_v21 = vld [vmem:[#allocation2 + $0x8] sm:$0xf]  ;;  %vm999_vm10 = vsmask.f32 4368 }
  0x1d   : > { %6682 = vmatpush3.bf16.msra.mxu0 %v6859_v2  ;;  %6807 = vmatpush3.bf16.msra.mxu1 %v6859_v2  ;;  %v6874_v19 = vld [vmem:[%s7129_s23 + $0x38] sm:$0xff]   ;;  %v1610_v22 = vld [vmem:[#allocation2 + $0x8] sm:$0xf]  ;;  %v6877_v26 = vld [vmem:[%s7129_s23 + $0x60] sm:$0xff]   ;;  %vm1577_vm13 = vcmask 519424   ;;  %vm2141_vm14 = vcmask 781824  }
  0x1e   : > { %6683 = vmatprep.subr.bf16.mxu0 %v6860_v3  ;;  %6800 = vmatprep.subr.bf16.mxu1 %v6860_v3  ;;  %v1662_v23 = vshrl.u32 %v1610_v22, 16  ;;  %v1665_v24 = vshll.u32 %v1610_v22, 16  ;;  %v6878_v30 = vld [vmem:[%s7129_s23 + $0x68] sm:$0xff]   ;;  %vm7173_vm6 = vmor %vm1658_vm4, %vm1659_vm5  ;;  %v711_v58 = vld [vmem:[#allocation2 + $0x18] sm:$0x8]  ;;  %vm2670_vm15 = vcmask 1044224  }
  0x1f   : > { %1481 = vrot.lane.b32.xlu0 %v1417_v21, %s7022_s20  ;;  %v1611_v31 = vld [vmem:[#allocation2 + $0xc] sm:$0xf]  ;;  %vm7185_vm9 = vmand %vm686_vm7, %vm687_vm8  ;;  %v6881_v60 = vld [vmem:[%s9666_s2 + $0x80] sm:$0xff]   ;;  %s269_s18 = sand.u32 1, %s7011_s25  }
  0x20   : > { %v1664_v27 = vrot.slane %v1662_v23, 4  ;;  %v1667_v28 = vrot.slane %v1665_v24, 5  ;;  %v1418_v33 = vld [vmem:[#allocation2 + $0xc] sm:$0xf]  ;;  %v1671_v35 = vshll.u32 %v1611_v31, 16  ;;  %v1675_v40 = vshrl.u32 %v1611_v31, 16  ;;  %vm7411_vm12 = vmor %vm696_vm2, %vm999_vm10 }
  0x21   : > { %6684 = vmatpush3.bf16.msra.mxu0 %v6860_v3  ;;  %6808 = vmatpush3.bf16.msra.mxu1 %v6860_v3  ;;  %v1612_v42 = vld [vmem:[#allocation2 + $0x10] sm:$0x1]  ;;  %v714_v51 = vld [vmem:[#allocation2 + $0x2c] sm:$0x8]  ;;  %v765_v53 = vld [vmem:[#allocation2 + $0x4c] sm:$0x1] }
  0x22   : > { %6685 = vmatprep.subr.bf16.mxu0 %v6861_v6  ;;  %6801 = vmatprep.subr.bf16.mxu1 %v6861_v6  ;;  %v1668_v34 = vor.u32 %v1667_v28, %v1664_v27  ;;  %v1673_v37 = vrot.slane %v1671_v35, 5  ;;  %v1677_v41 = vrot.slane %v1675_v40, 4  ;;  %v1681_v44 = vshll.u32 %v1612_v42, 16  ;;  %v6880_v55 = vld [vmem:[%s9666_s2 + $0x88] sm:$0xff]   ;;  %v786_v61 = vld [vmem:[#allocation2 + $0xd8] sm:$0x1] }
  0x23   : > { %1483 = vrot.lane.b32.xlu0 %v1418_v33, %s7022_s20  ;;  %v715_v52 = vsel %vm7185_vm9, 0, %v714_v51  ;;  %v766_v54 = vsel %vm7164_vm3, 0, %v765_v53  ;;  %v738_v56 = vld [vmem:[#allocation2 + $0xcc] sm:$0x8]  ;;  %v712_v59 = vsel %vm7185_vm9, 0, %v711_v58  ;;  %v787_v63 = vsel %vm7164_vm3, 0, %v786_v61 }
  0x24   : > { %v1669_v36 = vrot.slane %v1668_v34, 4  ;;  %v1678_v43 = vor.u32 %v1677_v41, %v1673_v37  ;;  %v1683_v46 = vrot.slane %v1681_v44, 5  ;;  %716 = vst [vmem:[#allocation2 + $0x2c] sm:$0x8] %v715_v52  ;;  %767 = vst [vmem:[#allocation2 + $0x4c] sm:$0x1] %v766_v54 }
  0x25   : > { %6686 = vmatpush3.bf16.msra.mxu0 %v6861_v6  ;;  %6809 = vmatpush3.bf16.msra.mxu1 %v6861_v6  ;;  %v739_v57 = vsel %vm7185_vm9, 0, %v738_v56  ;;  %713 = vst [vmem:[#allocation2 + $0x18] sm:$0x8] %v712_v59  ;;  %v768_v62 = vld [vmem:[#allocation2 + $0x60] sm:$0x1]  ;;  %v6893_v20 = vld [vmem:[%s7129_s23 + $0x78] sm:$0xff]  }
  0x26   : > { %6687 = vmatprep.subr.bf16.mxu0 %v6862_v7  ;;  %6802 = vmatprep.subr.bf16.mxu1 %v6862_v7  ;;  %v1674_v39 = vsel %vm7173_vm6, %v1669_v36, %v1673_v37  ;;  %v1679_v45 = vrot.slane %v1678_v43, 4  ;;  %740 = vst [vmem:[#allocation2 + $0xcc] sm:$0x8] %v739_v57  ;;  %v769_v0 = vsel %vm7164_vm3, 0, %v768_v62  ;;  %v783_v1 = vld [vmem:[#allocation2 + $0xc4] sm:$0x1] }
  0x27   : > { %2045 = vrot.lane.b32.xlu0 %v1674_v39, %s7023_s21  ;;  %788 = vst [vmem:[#allocation2 + $0xd8] sm:$0x1] %v787_v63  ;;  %770 = vst [vmem:[#allocation2 + $0x60] sm:$0x1] %v769_v0  ;;  %v771_v2 = vld [vmem:[#allocation2 + $0x74] sm:$0x1] }
  0x28   : > { %v1684_v47 = vsel %vm7173_vm6, %v1679_v45, %v1683_v46  ;;  %v784_v3 = vsel %vm7164_vm3, 0, %v783_v1  ;;  %v772_v4 = vsel %vm7164_vm3, 0, %v771_v2  ;;  %v774_v5 = vld [vmem:[#allocation2 + $0x88] sm:$0x1]  ;;  %v4050_v21 = vld [vmem:[#allocation2 + $0x38] sm:$0x1] }
  0x29   : > { %6688 = vmatpush3.bf16.msra.mxu0 %v6862_v7  ;;  %6810 = vmatpush3.bf16.msra.mxu1 %v6862_v7  ;;  %785 = vst [vmem:[#allocation2 + $0xc4] sm:$0x1] %v784_v3  ;;  %773 = vst [vmem:[#allocation2 + $0x74] sm:$0x1] %v772_v4  ;;  %v775_v6 = vsel %vm7164_vm3, 0, %v774_v5  ;;  %s6018_s19 = sshll.u32 %s269_s18, 7 }
  0x2a   : > { %6689 = vmatprep.subr.bf16.mxu0 %v6863_v8  ;;  %6803 = vmatprep.subr.bf16.mxu1 %v6863_v8  ;;  %776 = vst [vmem:[#allocation2 + $0x88] sm:$0x1] %v775_v6  ;;  %v777_v7 = vld [vmem:[#allocation2 + $0x9c] sm:$0x1]  ;;  %v7230_v36 = vld [vmem:[%s9668_s4] ss:$0 sm:$0xff] }
  0x2b   : > { %2047 = vrot.lane.b32.xlu1 %v1684_v47, %s7023_s21  ;;  %v3328_v22 = vld [vmem:[#allocation2 + $0x2c] sm:$0x8]  ;;  %v4053_v23 = vld [vmem:[#allocation2 + $0x4c] sm:$0x1]  ;;  %s9546_s22 = scalar_lea.vmem [#allocation4], %s6018_s19  ;;  %s9622_s14 = scalar_lea.sflag [#allocation5], %s269_s18 }
  0x2c   : > { %v2177_v24 = vld [vmem:[#allocation2 + $0x2c] sm:$0x8]  ;;  %v3377_v31 = vshrl.u32 %v3328_v22, 16  ;;  %v4140_v32 = vshll.u32 %v4053_v23, 16  ;;  %s5952_s29 = sshll.u32 %s9546_s22, 4  ;;  %s9617_s29 = int_to_ptr.vmem [resolvable:$true] %s5952_s29 }
  0x2d   : > { %6690 = vmatpush3.bf16.msra.mxu0 %v6863_v8  ;;  %6811 = vmatpush3.bf16.msra.mxu1 %v6863_v8  ;;  %v778_v8 = vsel %vm7164_vm3, 0, %v777_v7  ;;  %v2201_v28 = vld [vmem:[#allocation2 + $0xcc] sm:$0x8]  ;;  %v2245_v33 = vshrl.u32 %v2177_v24, 16 }
  0x2e   : > { %6691 = vmatprep.subr.bf16.mxu0 %v6864_v9  ;;  %6804 = vmatprep.subr.bf16.mxu1 %v6864_v9  ;;  %779 = vst [vmem:[#allocation2 + $0x9c] sm:$0x1] %v778_v8  ;;  %v4056_v27 = vld [vmem:[#allocation2 + $0x60] sm:$0x1]  ;;  %v4074_v29 = vld [vmem:[#allocation2 + $0xd8] sm:$0x1] }
  0x2f   : > { %v4164_v39 = vshll.u32 %v4056_v27, 16  ;;  %v2421_v40 = vshrl.u32 %v2201_v28, 16  ;;  %v4308_v41 = vshll.u32 %v4074_v29, 16  ;;  %v7234_v45 = vrot.slane %v3377_v31, 11 }
  0x30   : > { %v4059_v34 = vld [vmem:[#allocation2 + $0x74] sm:$0x1]  ;;  %v4071_v35 = vld [vmem:[#allocation2 + $0xc4] sm:$0x1]  ;;  %v7238_v51 = vrot.slane %v4140_v32, 5  ;;  %v7240_v52 = vrot.slane %v2245_v33, 11 }
  0x31   : > { %6692 = vmatpush3.bf16.msra.mxu0 %v6864_v9  ;;  %6812 = vmatpush3.bf16.msra.mxu1 %v6864_v9  ;;  %v735_v9 = vld [vmem:[#allocation2 + $0xb8] sm:$0x8]  ;;  %v4188_v46 = vshll.u32 %v4059_v34, 16  ;;  %v4284_v47 = vshll.u32 %v4071_v35, 16  ;;  %v4062_v53 = vld [vmem:[#allocation2 + $0x88] sm:$0x1] }
  0x32   : > { %6725 = vmatprep.subr.bf16.mxu0 %v6880_v55  ;;  %v7244_v58 = vrot.slane %v4164_v39, 5  ;;  %v7246_v59 = vrot.slane %v2421_v40, 11  ;;  %v4212_v5 = vshll.u32 %v4062_v53, 16 }
  0x33   : > { %v7252_v4 = vrot.slane %v4188_v46, 5  ;;  %v7254_v7 = vrot.slane %v4284_v47, 5 }
  0x34   : > { %6694 = vmatmul.mubr.bf16.vlgmr.msra.gmra.mxu0 %v6867_v10  ;;  %6710 = vmatmul.mubr.bf16.vlgmr.msra.gmra.mxu1 %v6868_v11  ;;  %v736_v10 = vsel %vm7185_vm9, 0, %v735_v9  ;;  %v780_v11 = vld [vmem:[#allocation2 + $0xb0] sm:$0x1] }
  0x35   : > { %6697 = vmatprep.mubr.bf16.mxu0 %v6869_v12  ;;  %6713 = vmatprep.mubr.bf16.mxu1 %v6875_v13  ;;  %737 = vst [vmem:[#allocation2 + $0xb8] sm:$0x8] %v736_v10  ;;  %v781_v12 = vsel %vm7164_vm3, 0, %v780_v11  ;;  %v789_v13 = vld [vmem:[#allocation2 + $0xec] sm:$0x1] }
  0x36   : > { %6726 = vmatpush3.bf16.msra.mxu0 %v6880_v55  ;;  %782 = vst [vmem:[#allocation2 + $0xb0] sm:$0x1] %v781_v12  ;;  %v4065_v54 = vld [vmem:[#allocation2 + $0x9c] sm:$0x1] }
  0x37   : > { %6727 = vmatprep.subr.bf16.mxu0 %v6881_v60  ;;  %v4236_v6 = vshll.u32 %v4065_v54, 16 }
  0x3a   : > { %6728 = vmatpush3.bf16.msra.mxu0 %v6881_v60  ;;  %v7248_v60 = vrot.slane %v4308_v41, 5  ;;  %v7268_v41 = vrot.slane %v4212_v5, 5 }
  0x3c   : > { %6698 = vmatmul.mubr.bf16.gmra.mxu0 %v6870_v14  ;;  %6714 = vmatmul.mubr.bf16.gmra.mxu1 %v6876_v15  ;;  %v790_v14 = vsel %vm7164_vm3, 0, %v789_v13  ;;  %v759_v15 = vld [vmem:[#allocation2 + $0x24] sm:$0x1] }
  0x3d   : > { %6701 = vmatprep.mubr.bf16.mxu0 %v6871_v16  ;;  %6717 = vmatprep.mubr.bf16.mxu1 %v6877_v26  ;;  %791 = vst [vmem:[#allocation2 + $0xec] sm:$0x1] %v790_v14  ;;  %v760_v16 = vsel %vm7164_vm3, 0, %v759_v15  ;;  %v3352_v26 = vld [vmem:[#allocation2 + $0xcc] sm:$0x8] }
  0x3e   : > { %761 = vst [vmem:[#allocation2 + $0x24] sm:$0x1] %v760_v16  ;;  %v3553_v37 = vshrl.u32 %v3352_v26, 16  ;;  %v4068_v1 = vld [vmem:[#allocation2 + $0xb0] sm:$0x1] }
  0x3f   : > { %v689_v14 = vld [vmem:[#allocation2 + $0x4] sm:$0x8] }
  0x40   : > { %v7242_v57 = vrot.slane %v3553_v37, 11 }
  0x44   : > { %6702 = vmatmul.mubr.bf16.gmra.mxu0 %v6872_v17  ;;  %6718 = vmatmul.mubr.bf16.gmra.mxu1 %v6878_v30  ;;  %v792_v17 = vld [vmem:[#allocation2 + $0x100] sm:$0x1]  ;;  %v4116_v30 = vshll.u32 %v4050_v21, 16  ;;  %v4077_v8 = vld [vmem:[#allocation2 + $0xec] sm:$0x1] }
  0x45   : > { %6705 = vmatprep.mubr.bf16.mxu0 %v6873_v18  ;;  %v793_v18 = vsel %vm7164_vm3, 0, %v792_v17 }
  0x46   : > { %794 = vst [vmem:[#allocation2 + $0x100] sm:$0x1] %v793_v18  ;;  %v7232_v44 = vrot.slane %v4116_v30, 5  ;;  %v4332_v30 = vshll.u32 %v4077_v8, 16 }
  0x4c   : > { %6706 = vmatmul.mubr.bf16.gmra.mxu0 %v6874_v19  ;;  %v6892_v19 = vld [vmem:[%s7129_s23 + $0x70] sm:$0xff]  }
  0x4d   : > { %6721 = vmatprep.mubr.bf16.mxu1 %v6892_v19  ;;  %v4080_v13 = vld [vmem:[#allocation2 + $0x100] sm:$0x1]  ;;  %v4260_v19 = vshll.u32 %v4068_v1, 16 }
  0x4e   : > { %6722 = vmatmul.mubr.bf16.gmra.mxu1 %v6893_v20  ;;  %v690_v20 = vsel %vm7185_vm9, 0, %v689_v14  ;;  %v4356_v31 = vshll.u32 %v4080_v13, 16 }
  0x4f   : > { %691 = vst [vmem:[#allocation2 + $0x4] sm:$0x8] %v690_v20 }
  0x50   : > { %v7285_v1 = vrot.slane %v4356_v31, 5 }
  0xf4   : > { %v6695_v42 = vpop.f32.mrf.mxu0  ;;  %v6711_v43 = vpop.f32.mrf.mxu1 }
  0xf5   : > { %v520_v48 = vadd.f32 %v6695_v42, %v7230_v36  ;;  %v584_v49 = vadd.f32 %v6711_v43, %v7230_v36  ;;  %v7270_v42 = vrot.slane %v4236_v6, 5 }
  0xf6   : > { %v511_v55 = vpop.f32.mrf.mxu0  ;;  %v575_v56 = vpop.f32.mrf.mxu1 }
  0xf7   : > { %v640_v61 = vmax.f32 %v520_v48, 0.0  ;;  %v656_v62 = vmax.f32 %v584_v49, 0.0  ;;  %v512_v63 = vadd.f32 %v7230_v36, %v511_v55  ;;  %v576_v0 = vadd.f32 %v7230_v36, %v575_v56 }
  0xf8   : > { %v6696_v2 = vpop.f32.mrf.mxu0  ;;  %v6712_v3 = vpop.f32.mrf.mxu1  ;;  %v7278_v56 = vrot.slane %v4260_v19, 5 }
  0xf9   : > { %v6268_v9 = vpack.c.bf16 %v640_v61, %v640_v61  ;;  %v6284_v10 = vpack.c.bf16 %v656_v62, %v656_v62  ;;  %v638_v11 = vmax.f32 %v512_v63, 0.0  ;;  %v654_v12 = vmax.f32 %v576_v0, 0.0 }
  0xfa   : > { %v523_v15 = vadd.f32 %v6696_v2, %v7230_v36  ;;  %v587_v16 = vadd.f32 %v6712_v3, %v7230_v36  ;;  %v514_v17 = vpop.f32.mrf.mxu0  ;;  %v578_v18 = vpop.f32.mrf.mxu1  ;;  %v7280_v61 = vrot.slane %v4332_v30, 5 }
  0xfb   : > { %921 = vst.msk [vmem:[#allocation2 + $0x30] sm:$0xf] %vm692_vm0, %v6268_v9  ;;  %937 = vst.msk [vmem:[#allocation2 + $0xd0] sm:$0xf] %vm692_vm0, %v6284_v10  ;;  %v6266_v21 = vpack.c.bf16 %v638_v11, %v638_v11  ;;  %v6282_v22 = vpack.c.bf16 %v654_v12, %v654_v12  ;;  %v515_v23 = vadd.f32 %v7230_v36, %v514_v17 }
  0xfc   : > { %v579_v24 = vadd.f32 %v7230_v36, %v578_v18  ;;  %v641_v26 = vmax.f32 %v523_v15, 0.0  ;;  %v657_v27 = vmax.f32 %v587_v16, 0.0  ;;  %v6699_v28 = vpop.f32.mrf.mxu0  ;;  %v6715_v29 = vpop.f32.mrf.mxu1 }
  0xfd   : > { %919 = vst.msk [vmem:[#allocation2 + $0x1c] sm:$0xf] %vm692_vm0, %v6266_v21  ;;  %935 = vst.msk [vmem:[#allocation2 + $0xbc] sm:$0xf] %vm692_vm0, %v6282_v22  ;;  %v639_v32 = vmax.f32 %v515_v23, 0.0  ;;  %v536_v34 = vadd.f32 %v6699_v28, %v7230_v36  ;;  %v600_v35 = vadd.f32 %v6715_v29, %v7230_v36 }
  0xfe   : > { %v655_v33 = vmax.f32 %v579_v24, 0.0  ;;  %v6269_v37 = vpack.c.bf16 %v641_v26, %v641_v26  ;;  %v6285_v39 = vpack.c.bf16 %v657_v27, %v657_v27  ;;  %v527_v40 = vpop.f32.mrf.mxu0  ;;  %v591_v49 = vpop.f32.mrf.mxu1 }
  0xff   : > { %v6267_v43 = vpack.c.bf16 %v639_v32, %v639_v32  ;;  %v644_v47 = vmax.f32 %v536_v34, 0.0  ;;  %v528_v48 = vadd.f32 %v7230_v36, %v527_v40  ;;  %v660_v54 = vmax.f32 %v600_v35, 0.0 }
 0x100   : > { %v6283_v46 = vpack.c.bf16 %v655_v33, %v655_v33  ;;  %922 = vst.msk [vmem:[#allocation2 + $0x34] sm:$0xf] %vm692_vm0, %v6269_v37  ;;  %938 = vst.msk [vmem:[#allocation2 + $0xd4] sm:$0xf] %vm692_vm0, %v6285_v39  ;;  %v6700_v53 = vpop.f32.mrf.mxu0  ;;  %v7276_v55 = vadd.f32 %v7230_v36, %v591_v49  ;;  %v6716_v31 = vpop.f32.mrf.mxu1 }
 0x101   : > { %920 = vst.msk [vmem:[#allocation2 + $0x20] sm:$0xf] %vm692_vm0, %v6267_v43  ;;  %v6272_v62 = vpack.c.bf16 %v644_v47, %v644_v47  ;;  %v642_v63 = vmax.f32 %v528_v48, 0.0  ;;  %v539_v0 = vadd.f32 %v6700_v53, %v7230_v36  ;;  %v6288_v8 = vpack.c.bf16 %v660_v54, %v660_v54 }
 0x102   : > { %936 = vst.msk [vmem:[#allocation2 + $0xc0] sm:$0xf] %vm692_vm0, %v6283_v46  ;;  %v4048_v2 = vld [vmem:[#allocation2 + $0x30] sm:$0xf]  ;;  %v530_v5 = vpop.f32.mrf.mxu0  ;;  %v658_v18 = vmax.f32 %v7276_v55, 0.0  ;;  %v7295_v39 = vadd.f32 %v6716_v31, %v7230_v36 }
 0x103   : > { %v4072_v3 = vld [vmem:[#allocation2 + $0xd0] sm:$0xf]  ;;  %v4097_v9 = vshrl.u32 %v4048_v2, 16  ;;  %v4100_v10 = vshll.u32 %v4048_v2, 16  ;;  %925 = vst.msk [vmem:[#allocation2 + $0x58] sm:$0xf] %vm692_vm0, %v6272_v62  ;;  %v6270_v14 = vpack.c.bf16 %v642_v63, %v642_v63  ;;  %v531_v16 = vadd.f32 %v7230_v36, %v530_v5 }
 0x104   : > { %v3856_v6 = vld [vmem:[#allocation2 + $0x30] sm:$0xf]  ;;  %v4289_v11 = vshrl.u32 %v4072_v3, 16  ;;  %v4292_v12 = vshll.u32 %v4072_v3, 16  ;;  %v4069_v13 = vld [vmem:[#allocation2 + $0xbc] sm:$0xf]  ;;  %v6703_v17 = vpop.f32.mrf.mxu0 }
 0x105   : > { %3920 = vrot.lane.b32.xlu0 %v3856_v6, %s7024_s15  ;;  %v645_v15 = vmax.f32 %v539_v0, 0.0  ;;  %941 = vst.msk [vmem:[#allocation2 + $0xf8] sm:$0xf] %vm692_vm0, %v6288_v8  ;;  %v4099_v19 = vrot.slane %v4097_v9, 4  ;;  %v4102_v20 = vrot.slane %v4100_v10, 5  ;;  %v4265_v24 = vshrl.u32 %v4069_v13, 16 }
 0x106   : > { %v4291_v21 = vrot.slane %v4289_v11, 4  ;;  %v4294_v22 = vrot.slane %v4292_v12, 5  ;;  %v1421_v23 = vld [vmem:[#allocation2 + $0x30] sm:$0xf]  ;;  %v4268_v26 = vshll.u32 %v4069_v13, 16  ;;  %v643_v28 = vmax.f32 %v531_v16, 0.0  ;;  %v543_v29 = vpop.f32.mrf.mxu0 }
 0x107   : > { %923 = vst.msk [vmem:[#allocation2 + $0x44] sm:$0xf] %vm692_vm0, %v6270_v14  ;;  %v6273_v27 = vpack.c.bf16 %v645_v15, %v645_v15  ;;  %v3872_v30 = vld [vmem:[#allocation2 + $0xd0] sm:$0xf]  ;;  %v4103_v32 = vor.u32 %v4102_v20, %v4099_v19  ;;  %v4049_v34 = vld [vmem:[#allocation2 + $0x34] sm:$0xf]  ;;  %v552_v62 = vadd.f32 %v6703_v17, %v7230_v36  ;;  %v544_v63 = vadd.f32 %v7230_v36, %v543_v29 }
 0x108   : > { %v4295_v33 = vor.u32 %v4294_v22, %v4291_v21  ;;  %v4073_v35 = vld [vmem:[#allocation2 + $0xd4] sm:$0xf]  ;;  %v4267_v40 = vrot.slane %v4265_v24, 4  ;;  %v4270_v43 = vrot.slane %v4268_v26, 5  ;;  %v4106_v46 = vshll.u32 %v4049_v34, 16  ;;  %v6704_v49 = vpop.f32.mrf.mxu0 }
 0x109   : > { %1489 = vrot.lane.b32.xlu0 %v1421_v23, %s7022_s20  ;;  %v3857_v37 = vld [vmem:[#allocation2 + $0x34] sm:$0xf]  ;;  %v4110_v47 = vshrl.u32 %v4049_v34, 16  ;;  %v4070_v48 = vld [vmem:[#allocation2 + $0xc0] sm:$0xf]  ;;  %v4298_v53 = vshll.u32 %v4073_v35, 16  ;;  %v6271_v24 = vpack.c.bf16 %v643_v28, %v643_v28 }
 0x10a   : > { %926 = vst.msk [vmem:[#allocation2 + $0x5c] sm:$0xf] %vm692_vm0, %v6273_v27  ;;  %3922 = vrot.lane.b32.xlu1 %v3857_v37, %s7024_s15  ;;  %v4302_v54 = vshrl.u32 %v4073_v35, 16  ;;  %v4271_v0 = vor.u32 %v4270_v43, %v4267_v40  ;;  %v7301_v2 = vrot.slane %v4106_v46, 5  ;;  %v4274_v5 = vshll.u32 %v4070_v48, 16  ;;  %v546_v8 = vpop.f32.mrf.mxu0 }
 0x10b   : > { %v4112_v3 = vrot.slane %v4110_v47, 4  ;;  %v4054_v6 = vld [vmem:[#allocation2 + $0x58] sm:$0xf]  ;;  %v7303_v9 = vrot.slane %v4298_v53, 5  ;;  %v4278_v11 = vshrl.u32 %v4070_v48, 16  ;;  %v7306_v14 = vrot.slane %v4103_v32, 4 }
 0x10c   : > { %v4304_v10 = vrot.slane %v4302_v54, 4  ;;  %v4145_v12 = vshrl.u32 %v4054_v6, 16  ;;  %v1422_v13 = vld [vmem:[#allocation2 + $0x34] sm:$0xf]  ;;  %v7309_v16 = vrot.slane %v4274_v5, 5  ;;  %v4148_v17 = vshll.u32 %v4054_v6, 16  ;;  %v6707_v19 = vpop.f32.mrf.mxu0 }
 0x10d   : > { %3952 = vrot.lane.b32.xlu0 %v3872_v30, %s7024_s15  ;;  %v4113_v15 = vor.u32 %v4112_v3, %v7301_v2  ;;  %v7312_v20 = vrot.slane %v4295_v33, 4  ;;  %v4280_v22 = vrot.slane %v4278_v11, 4  ;;  %v1437_v26 = vld [vmem:[#allocation2 + $0xd0] sm:$0xf]  ;;  %v3873_v34 = vld [vmem:[#allocation2 + $0xd4] sm:$0xf] }
 0x10e   : > { %1491 = vrot.lane.b32.xlu1 %v1422_v13, %s7022_s20  ;;  %v4305_v21 = vor.u32 %v4304_v10, %v7303_v9  ;;  %v4051_v23 = vld [vmem:[#allocation2 + $0x44] sm:$0xf]  ;;  %v7315_v27 = vrot.slane %v4145_v12, 4  ;;  %v7317_v29 = vrot.slane %v4148_v17, 5  ;;  %v559_v32 = vpop.f32.mrf.mxu0  ;;  %v7319_v35 = vrot.slane %v4271_v0, 4 }
 0x10f   : > { %v4121_v30 = vshrl.u32 %v4051_v23, 16  ;;  %v4124_v31 = vshll.u32 %v4051_v23, 16  ;;  %v7321_v37 = vrot.slane %v4113_v15, 4  ;;  %924 = vst.msk [vmem:[#allocation2 + $0x48] sm:$0xf] %vm692_vm0, %v6271_v24  ;;  %v648_v40 = vmax.f32 %v552_v62, 0.0 }
 0x110   : > { %v646_v43 = vmax.f32 %v544_v63, 0.0  ;;  %v4281_v28 = vor.u32 %v4280_v22, %v7309_v16  ;;  %v6708_v53 = vpop.f32.mrf.mxu0  ;;  %v7327_v54 = vrot.slane %v4305_v21, 4  ;;  %v4151_v6 = vor.u32 %v7317_v29, %v7315_v27  ;;  %v1419_v12 = vld [vmem:[#allocation2 + $0x1c] sm:$0xf]  ;;  %v1438_v22 = vld [vmem:[#allocation2 + $0xd4] sm:$0xf] }
 0x111   : > { %v4055_v33 = vld [vmem:[#allocation2 + $0x5c] sm:$0xf]  ;;  %1521 = vrot.lane.b32.xlu0 %v1437_v26, %s7022_s20  ;;  %v4123_v46 = vrot.slane %v4121_v30, 4  ;;  %v4126_v47 = vrot.slane %v4124_v31, 5  ;;  %v6276_v3 = vpack.c.bf16 %v648_v40, %v648_v40  ;;  %v555_v10 = vadd.f32 %v6704_v49, %v7230_v36 }
 0x112   : > { %v4154_v48 = vshll.u32 %v4055_v33, 16  ;;  %3954 = vrot.lane.b32.xlu1 %v3873_v34, %s7024_s15  ;;  %v4158_v0 = vshrl.u32 %v4055_v33, 16  ;;  %v6274_v5 = vpack.c.bf16 %v646_v43, %v646_v43  ;;  %v562_v11 = vpop.f32.mrf.mxu0  ;;  %v547_v15 = vadd.f32 %v7230_v36, %v546_v8  ;;  %v3870_v33 = vld [vmem:[#allocation2 + $0xbc] sm:$0xf] }
 0x113   : > { %v4127_v62 = vor.u32 %v4126_v47, %v4123_v46  ;;  %929 = vst.msk [vmem:[#allocation2 + $0x80] sm:$0xf] %vm692_vm0, %v6276_v3  ;;  %v568_v17 = vadd.f32 %v6707_v19, %v7230_v36  ;;  %v560_v21 = vadd.f32 %v7230_v36, %v559_v32  ;;  %v7342_v23 = vrot.slane %v4281_v28, 4  ;;  %v4078_v46 = vld [vmem:[#allocation2 + $0xf8] sm:$0xf] }
 0x114   : > { %v7331_v63 = vrot.slane %v4154_v48, 5  ;;  %v7334_v13 = vrot.slane %v4158_v0, 4  ;;  %927 = vst.msk [vmem:[#allocation2 + $0x6c] sm:$0xf] %vm692_vm0, %v6274_v5  ;;  %v649_v49 = vmax.f32 %v555_v10, 0.0  ;;  %v571_v24 = vadd.f32 %v6708_v53, %v7230_v36 }
 0x115   : > { %1485 = vrot.lane.b32.xlu0 %v1419_v12, %s7022_s20  ;;  %v563_v26 = vadd.f32 %v7230_v36, %v562_v11  ;;  %v4128_v30 = vrot.slane %v4127_v62, 4  ;;  %v647_v31 = vmax.f32 %v547_v15, 0.0  ;;  %v652_v34 = vmax.f32 %v568_v17, 0.0  ;;  %v1420_v3 = vld [vmem:[#allocation2 + $0x20] sm:$0xf]  ;;  %v594_v62 = vpop.f32.mrf.mxu1 }
 0x116   : > { %1523 = vrot.lane.b32.xlu1 %v1438_v22, %s7022_s20  ;;  %v650_v8 = vmax.f32 %v560_v21, 0.0  ;;  %v4052_v19 = vld [vmem:[#allocation2 + $0x48] sm:$0xf]  ;;  %v6277_v40 = vpack.c.bf16 %v649_v49, %v649_v49  ;;  %v653_v32 = vmax.f32 %v571_v24, 0.0  ;;  %v4109_v28 = vsel %vm7173_vm6, %v7306_v14, %v7301_v2  ;;  %v7355_v5 = vld [vmem:[#allocation2 + $0x30] sm:$0xf] }
 0x117   : > { %v651_v43 = vmax.f32 %v563_v26, 0.0  ;;  %v4161_v47 = vor.u32 %v7334_v13, %v7331_v63  ;;  %v4130_v48 = vshll.u32 %v4052_v19, 16  ;;  %v4134_v53 = vshrl.u32 %v4052_v19, 16  ;;  %4512 = vst.msk [vmem:[#allocation3 + $0x8] sm:$0xf] %vm692_vm0, %v4109_v28 }
 0x118   : > { %v6275_v0 = vpack.c.bf16 %v647_v31, %v647_v31  ;;  %930 = vst.msk [vmem:[#allocation2 + $0x84] sm:$0xf] %vm692_vm0, %v6277_v40  ;;  %v6280_v10 = vpack.c.bf16 %v652_v34, %v652_v34  ;;  %v6278_v11 = vpack.c.bf16 %v650_v8, %v650_v8  ;;  %v6281_v2 = vpack.c.bf16 %v653_v32, %v653_v32  ;;  %v1435_v17 = vld [vmem:[#allocation2 + $0xbc] sm:$0xf]  ;;  %v3871_v19 = vld [vmem:[#allocation2 + $0xc0] sm:$0xf] }
 0x119   : > { %3948 = vrot.lane.b32.xlu0 %v3870_v33, %s7024_s15  ;;  %v6279_v14 = vpack.c.bf16 %v651_v43, %v651_v43  ;;  %v4132_v12 = vrot.slane %v4130_v48, 5  ;;  %v4136_v13 = vrot.slane %v4134_v53, 4  ;;  %v4119_v15 = vsel %vm7173_vm6, %v7321_v37, %v7232_v44 }
 0x11a   : > { %1487 = vrot.lane.b32.xlu1 %v1420_v3, %s7022_s20  ;;  %928 = vst.msk [vmem:[#allocation2 + $0x70] sm:$0xf] %vm692_vm0, %v6275_v0  ;;  %v4337_v21 = vshrl.u32 %v4078_v46, 16  ;;  %v4060_v22 = vld [vmem:[#allocation2 + $0x80] sm:$0xf]  ;;  %v4340_v24 = vshll.u32 %v4078_v46, 16  ;;  %v6286_v26 = vpack.c.bf16 %v658_v18, %v658_v18  ;;  %v7374_v37 = vadd.f32 %v7230_v36, %v594_v62 }
 0x11b   : > { %v4057_v49 = vld [vmem:[#allocation2 + $0x6c] sm:$0xf]  ;;  %933 = vst.msk [vmem:[#allocation2 + $0xa8] sm:$0xf] %vm692_vm0, %v6280_v10  ;;  %931 = vst.msk [vmem:[#allocation2 + $0x94] sm:$0xf] %vm692_vm0, %v6278_v11  ;;  %v4133_v31 = vsel %vm7173_vm6, %v4128_v30, %v4132_v12  ;;  %v4137_v34 = vor.u32 %v4136_v13, %v4132_v12 }
 0x11c   : > { %934 = vst.msk [vmem:[#allocation2 + $0xac] sm:$0xf] %vm692_vm0, %v6281_v2  ;;  %932 = vst.msk [vmem:[#allocation2 + $0x98] sm:$0xf] %vm692_vm0, %v6279_v14  ;;  %v3382_v44 = vshrl.u32 %v7355_v5, 16  ;;  %v4193_v8 = vshrl.u32 %v4060_v22, 16 }
 0x11d   : > { %4513 = vst.msk [vmem:[#allocation3 + $0x14] sm:$0xf] %vm692_vm0, %v4119_v15  ;;  %v4196_v33 = vshll.u32 %v4060_v22, 16  ;;  %1517 = vrot.lane.b32.xlu0 %v1435_v17, %s7022_s20  ;;  %4514 = vst.msk [vmem:[#allocation3 + $0x20] sm:$0xf] %vm692_vm0, %v4133_v31  ;;  %v4169_v55 = vshrl.u32 %v4057_v49, 16 }
 0x11e   : > { %v4172_v40 = vshll.u32 %v4057_v49, 16  ;;  %3950 = vrot.lane.b32.xlu1 %v3871_v19, %s7024_s15  ;;  %v4339_v18 = vrot.slane %v4337_v21, 4  ;;  %v4342_v32 = vrot.slane %v4340_v24, 5  ;;  %939 = vst.msk [vmem:[#allocation2 + $0xe4] sm:$0xf] %vm692_vm0, %v6286_v26  ;;  %v7385_v36 = vrot.slane %v4151_v6, 4 }
 0x11f   : > { %v4138_v30 = vrot.slane %v4137_v34, 4  ;;  %v4195_v43 = vrot.slane %v4193_v8, 4  ;;  %v4198_v28 = vrot.slane %v4196_v33, 5  ;;  %v7387_v46 = vrot.slane %v4161_v47, 4  ;;  %v4061_v10 = vld [vmem:[#allocation2 + $0x84] sm:$0xf] }
 0x120   : > { %v4171_v48 = vrot.slane %v4169_v55, 4  ;;  %v4174_v53 = vrot.slane %v4172_v40, 5  ;;  %v4343_v0 = vor.u32 %v4342_v32, %v4339_v18  ;;  %v1436_v11 = vld [vmem:[#allocation2 + $0xc0] sm:$0xf]  ;;  %v7392_v2 = vrot.slane %v3382_v44, 7 }
 0x121   : > { %v4143_v3 = vsel %vm7173_vm6, %v4138_v30, %v7238_v51  ;;  %v4199_v62 = vor.u32 %v4198_v28, %v4195_v43  ;;  %v3385_v27 = vshll.u32 %v7355_v5, 16  ;;  %v4202_v29 = vshll.u32 %v4061_v10, 16  ;;  %v4058_v47 = vld [vmem:[#allocation2 + $0x70] sm:$0xf] }
 0x122   : > { %4515 = vst.msk [vmem:[#allocation3 + $0x2c] sm:$0xf] %vm692_vm0, %v4143_v3  ;;  %v4206_v6 = vshrl.u32 %v4061_v10, 16  ;;  %1519 = vrot.lane.b32.xlu1 %v1436_v11, %s7022_s20  ;;  %v661_v14 = vmax.f32 %v7295_v39, 0.0  ;;  %v659_v12 = vmax.f32 %v7374_v37, 0.0  ;;  %v4175_v13 = vor.u32 %v4174_v53, %v4171_v48 }
 0x123   : > { %v4178_v51 = vshll.u32 %v4058_v47, 16  ;;  %v4182_v15 = vshrl.u32 %v4058_v47, 16  ;;  %v4066_v17 = vld [vmem:[#allocation2 + $0xa8] sm:$0xf]  ;;  %v7399_v21 = vrot.slane %v4343_v0, 4  ;;  %v7401_v22 = vrot.slane %v4199_v62, 4 }
 0x124   : > { %v7403_v5 = vrot.slane %v4202_v29, 5  ;;  %v4208_v49 = vrot.slane %v4206_v6, 4  ;;  %v4241_v24 = vshrl.u32 %v4066_v17, 16  ;;  %v4063_v26 = vld [vmem:[#allocation2 + $0x94] sm:$0xf]  ;;  %v4244_v34 = vshll.u32 %v4066_v17, 16 }
 0x125   : > { %v7405_v44 = vrot.slane %v4178_v51, 5  ;;  %v4184_v31 = vrot.slane %v4182_v15, 4  ;;  %v4217_v39 = vshrl.u32 %v4063_v26, 16  ;;  %v4067_v8 = vld [vmem:[#allocation2 + $0xac] sm:$0xf]  ;;  %v4220_v33 = vshll.u32 %v4063_v26, 16 }
 0x126   : > { %v4243_v37 = vrot.slane %v4241_v24, 4  ;;  %v4250_v19 = vshll.u32 %v4067_v8, 16  ;;  %v4064_v55 = vld [vmem:[#allocation2 + $0x98] sm:$0xf]  ;;  %v3387_v40 = vor.u32 %v3385_v27, %v7392_v2  ;;  %v4209_v18 = vor.u32 %v4208_v49, %v7403_v5  ;;  %v6879_v62 = vld [vmem:[#allocation3 + $0x8] ss:$12 sps:$4 sm:$0xff]  }
 0x127   : > { %v4246_v32 = vrot.slane %v4244_v34, 5  ;;  %v4219_v30 = vrot.slane %v4217_v39, 4  ;;  %v4254_v43 = vshrl.u32 %v4067_v8, 16  ;;  %v4185_v48 = vor.u32 %v4184_v31, %v7405_v44  ;;  %v2767_v10 = vld [vmem:[#allocation2 + $0x1c] sm:$0xf]  ;;  %6729 = vmatprep.mubr.msk.bf16.mxu0 %vm4999_vm11, %v6879_v62 }
 0x128   : > { %v4222_v53 = vrot.slane %v4220_v33, 5  ;;  %v7416_v0 = vrot.slane %v4250_v19, 5  ;;  %v4226_v3 = vshll.u32 %v4064_v55, 16  ;;  %v7418_v11 = vrot.slane %v4175_v13, 4  ;;  %v4075_v47 = vld [vmem:[#allocation2 + $0xe4] sm:$0xf] }
 0x129   : > { %v4247_v27 = vor.u32 %v4246_v32, %v4243_v37  ;;  %v4256_v29 = vrot.slane %v4254_v43, 4  ;;  %v4230_v6 = vshrl.u32 %v4064_v55, 16  ;;  %v7420_v51 = vld [vmem:[#allocation2 + $0x20] sm:$0xf]  ;;  %v4313_v49 = vshrl.u32 %v4075_v47, 16 }
 0x12a   : > { %v4223_v15 = vor.u32 %v4222_v53, %v4219_v30  ;;  %v7422_v17 = vrot.slane %v4226_v3, 5  ;;  %v4316_v24 = vshll.u32 %v4075_v47, 16  ;;  %v7425_v26 = vrot.slane %v4209_v18, 4  ;;  %v6882_v39 = vld [vmem:[#allocation3 + $0x20] ss:$12 sps:$4 sm:$0xff]  }
 0x12b   : > { %v4257_v31 = vor.u32 %v4256_v29, %v7416_v0  ;;  %v4232_v34 = vrot.slane %v4230_v6, 4  ;;  %v3388_v13 = vsel %vm7411_vm12, %v7234_v45, %v3387_v40  ;;  %v7431_v8 = vrot.slane %v4185_v48, 4  ;;  %v2178_v55 = vld [vmem:[#allocation2 + $0x30] sm:$0xf]  ;;  %6730 = vmatmul.mubr.msk.bf16.vlgmr.msra.gmra.mxu0 %vm4999_vm11, %v6882_v39  ;;  %v3330_v53 = vld [vmem:[#allocation2 + $0x34] sm:$0xf] }
 0x12c   : > { %v4315_v37 = vrot.slane %v4313_v49, 4  ;;  %v4318_v33 = vrot.slane %v4316_v24, 5  ;;  %3728 = vrot.lane.b32.xlu0 %v3388_v13, %s7023_s21  ;;  %v6289_v19 = vpack.c.bf16 %v661_v14, %v661_v14  ;;  %v7434_v32 = vrot.slane %v4247_v27, 4  ;;  %v3353_v62 = vld [vmem:[#allocation2 + $0xd0] sm:$0xf] }
 0x12d   : > { %v4233_v18 = vor.u32 %v4232_v34, %v7422_v17  ;;  %v6287_v30 = vpack.c.bf16 %v659_v12, %v659_v12  ;;  %v2816_v43 = vshrl.u32 %v2767_v10, 16  ;;  %v7438_v3 = vrot.slane %v4223_v15, 4  ;;  %v2179_v24 = vld [vmem:[#allocation2 + $0x34] sm:$0xf] }
 0x12e   : > { %v4319_v45 = vor.u32 %v4318_v33, %v4315_v37  ;;  %942 = vst.msk [vmem:[#allocation2 + $0xfc] sm:$0xf] %vm692_vm0, %v6289_v19  ;;  %v2819_v40 = vshll.u32 %v2767_v10, 16  ;;  %v2825_v48 = vshll.u32 %v7420_v51, 16  ;;  %v7442_v14 = vrot.slane %v4257_v31, 4 }
 0x12f   : > { %v7444_v27 = vrot.slane %v4233_v18, 4  ;;  %940 = vst.msk [vmem:[#allocation2 + $0xe8] sm:$0xf] %vm692_vm0, %v6287_v30  ;;  %v2818_v12 = vrot.slane %v2816_v43, 4  ;;  %v2250_v29 = vshrl.u32 %v2178_v55, 16  ;;  %v2253_v49 = vshll.u32 %v2178_v55, 16 }
 0x130   : > { %v7447_v6 = vrot.slane %v4319_v45, 4  ;;  %v2821_v47 = vrot.slane %v2819_v40, 5  ;;  %v7449_v15 = vrot.slane %v2825_v48, 5  ;;  %v3389_v10 = vrot.slane %v7392_v2, 4  ;;  %v2202_v31 = vld [vmem:[#allocation2 + $0xd0] sm:$0xf] }
 0x131   : > { %v2252_v34 = vrot.slane %v2250_v29, 7  ;;  %v3391_v13 = vshrl.u32 %v3330_v53, 16  ;;  %v3558_v39 = vshrl.u32 %v3353_v62, 16  ;;  %v3561_v33 = vshll.u32 %v3353_v62, 16 }
 0x132   : > { %v2822_v37 = vor.u32 %v2821_v47, %v2818_v12  ;;  %v4157_v19 = vsel %vm7173_vm6, %v7385_v36, %v7331_v63  ;;  %v4167_v18 = vsel %vm7173_vm6, %v7387_v46, %v7244_v58  ;;  %v3394_v43 = vshll.u32 %v3330_v53, 16 }
 0x133   : > { %v2255_v55 = vor.u32 %v2253_v49, %v2252_v34  ;;  %v3393_v30 = vrot.slane %v3391_v13, 7  ;;  %v7460_v45 = vrot.slane %v3558_v39, 7  ;;  %4516 = vst.msk [vmem:[#allocation3 + $0x38] sm:$0xf] %vm692_vm0, %v4157_v19  ;;  %4517 = vst.msk [vmem:[#allocation3 + $0x44] sm:$0xf] %vm692_vm0, %v4167_v18 }
 0x134   : > { %v2823_v2 = vrot.slane %v2822_v37, 4  ;;  %v2259_v40 = vshrl.u32 %v2179_v24, 16  ;;  %v2262_v48 = vshll.u32 %v2179_v24, 16  ;;  %v2426_v62 = vshrl.u32 %v2202_v31, 16 }
 0x135   : > { %v4079_v12 = vld [vmem:[#allocation2 + $0xfc] sm:$0xf]  ;;  %v2256_v63 = vsel %vm7411_vm12, %v7240_v52, %v2255_v55  ;;  %v3396_v36 = vor.u32 %v3394_v43, %v3393_v30  ;;  %v3563_v58 = vor.u32 %v3561_v33, %v7460_v45  ;;  %v2429_v46 = vshll.u32 %v2202_v31, 16  ;;  %v3354_v55 = vld [vmem:[#allocation2 + $0xd4] sm:$0xf] }
 0x136   : > { %v4346_v53 = vshll.u32 %v4079_v12, 16  ;;  %v4350_v29 = vshrl.u32 %v4079_v12, 16  ;;  %v4076_v47 = vld [vmem:[#allocation2 + $0xe8] sm:$0xf]  ;;  %v2828_v49 = vsel %vm7173_vm6, %v2823_v2, %v7449_v15  ;;  %2578 = vrot.lane.b32.xlu0 %v2256_v63, %s7024_s15  ;;  %v2261_v24 = vrot.slane %v2259_v40, 7 }
 0x137   : > { %v4322_v13 = vshll.u32 %v4076_v47, 16  ;;  %v4326_v39 = vshrl.u32 %v4076_v47, 16  ;;  %3199 = vrot.lane.b32.xlu1 %v2828_v49, %s7022_s20  ;;  %v3564_v52 = vsel %vm7411_vm12, %v7242_v57, %v3563_v58  ;;  %v2257_v37 = vrot.slane %v2252_v34, 4  ;;  %v2203_v34 = vld [vmem:[#allocation2 + $0xd4] sm:$0xf] }
 0x138   : > { %v7476_v31 = vrot.slane %v4346_v53, 5  ;;  %v4352_v33 = vrot.slane %v4350_v29, 4  ;;  %v2264_v19 = vor.u32 %v2262_v48, %v2261_v24  ;;  %v7478_v18 = vrot.slane %v2426_v62, 7  ;;  %v7517_v58 = vld [vmem:[#allocation2 + $0x1c] sm:$0xf] }
 0x139   : > { %v7480_v30 = vrot.slane %v4322_v13, 5  ;;  %v4328_v43 = vrot.slane %v4326_v39, 4  ;;  %v4181_v2 = vsel %vm7173_vm6, %v7418_v11, %v7405_v44  ;;  %v4191_v57 = vsel %vm7173_vm6, %v7431_v8, %v7252_v4  ;;  %v3860_v49 = vld [vmem:[#allocation2 + $0x58] sm:$0xf] }
 0x13a   : > { %v4353_v40 = vor.u32 %v4352_v33, %v7476_v31  ;;  %v3397_v48 = vsel %vm7411_vm12, %v3389_v10, %v3396_v36  ;;  %3760 = vrot.lane.b32.xlu0 %v3564_v52, %s7023_s21  ;;  %v6883_v62 = vld [vmem:[#allocation3 + $0x38] ss:$12 sps:$4 sm:$0xff]   ;;  %v2431_v12 = vor.u32 %v2429_v46, %v7478_v18  ;;  %4518 = vst.msk [vmem:[#allocation3 + $0x50] sm:$0xf] %vm692_vm0, %v4181_v2  ;;  %4519 = vst.msk [vmem:[#allocation3 + $0x5c] sm:$0xf] %vm692_vm0, %v4191_v57 }
 0x13b   : > { %v4205_v4 = vsel %vm7173_vm6, %v7401_v22, %v7403_v5  ;;  %v4329_v44 = vor.u32 %v4328_v43, %v7480_v30  ;;  %3730 = vrot.lane.b32.xlu1 %v3397_v48, %s7023_s21  ;;  %v2265_v11 = vsel %vm7411_vm12, %v2257_v37, %v2264_v19  ;;  %v3567_v8 = vshrl.u32 %v3354_v55, 16  ;;  %6733 = vmatprep.mubr.msk.bf16.mxu0 %vm4999_vm11, %v6883_v62  ;;  %v2771_v37 = vld [vmem:[#allocation2 + $0x34] sm:$0xf]  ;;  %v3876_v19 = vld [vmem:[#allocation2 + $0xf8] sm:$0xf] }
 0x13c   : > { %v3570_v10 = vshll.u32 %v3354_v55, 16  ;;  %4520 = vst.msk [vmem:[#allocation3 + $0x68] sm:$0xf] %vm692_vm0, %v4205_v4  ;;  %v7506_v63 = vrot.slane %v4353_v40, 4  ;;  %v2432_v36 = vsel %vm7411_vm12, %v7246_v59, %v2431_v12  ;;  %v3565_v22 = vrot.slane %v7460_v45, 4 }
 0x13d   : > { %v4215_v5 = vsel %vm7173_vm6, %v7425_v26, %v7268_v41  ;;  %v4330_v46 = vrot.slane %v4329_v44, 4  ;;  %v3569_v53 = vrot.slane %v3567_v8, 7  ;;  %v2435_v29 = vshrl.u32 %v2203_v34, 16  ;;  %v7584_v43 = vld [vmem:[#allocation2 + $0x20] sm:$0xf] }
 0x13e   : > { %4521 = vst.msk [vmem:[#allocation3 + $0x74] sm:$0xf] %vm692_vm0, %v4215_v5  ;;  %v2438_v47 = vshll.u32 %v2203_v34, 16  ;;  %2610 = vrot.lane.b32.xlu0 %v2432_v36, %s7024_s15  ;;  %v4229_v59 = vsel %vm7173_vm6, %v7438_v3, %v7422_v17  ;;  %v4239_v41 = vsel %vm7173_vm6, %v7444_v27, %v7270_v42  ;;  %v4253_v26 = vsel %vm7173_vm6, %v7434_v32, %v7416_v0  ;;  %v2770_v0 = vld [vmem:[#allocation2 + $0x30] sm:$0xf] }
 0x13f   : > { %v4263_v45 = vsel %vm7173_vm6, %v7442_v14, %v7278_v56  ;;  %2580 = vrot.lane.b32.xlu1 %v2265_v11, %s7024_s15  ;;  %v3572_v24 = vor.u32 %v3570_v10, %v3569_v53  ;;  %v2433_v17 = vrot.slane %v7478_v18, 4  ;;  %v2437_v3 = vrot.slane %v2435_v29, 7  ;;  %4522 = vst.msk [vmem:[#allocation3 + $0x80] sm:$0xf] %vm692_vm0, %v4229_v59  ;;  %4523 = vst.msk [vmem:[#allocation3 + $0x8c] sm:$0xf] %vm692_vm0, %v4239_v41 }
 0x140   : > { %4524 = vst.msk [vmem:[#allocation3 + $0x98] sm:$0xf] %vm692_vm0, %v4253_v26  ;;  %4525 = vst.msk [vmem:[#allocation3 + $0xa4] sm:$0xf] %vm692_vm0, %v4263_v45  ;;  %v2228_v42 = vshrl.u32 %v7517_v58, 16  ;;  %v4277_v56 = vsel %vm7173_vm6, %v7319_v35, %v7309_v16  ;;  %v4287_v14 = vsel %vm7173_vm6, %v7342_v23, %v7254_v7  ;;  %v4301_v27 = vsel %vm7173_vm6, %v7312_v20, %v7303_v9 }
 0x141   : > { %v2174_v32 = vld [vmem:[#allocation2 + $0x18] sm:$0x8]  ;;  %v4311_v13 = vsel %vm7173_vm6, %v7327_v54, %v7248_v60  ;;  %4526 = vst.msk [vmem:[#allocation3 + $0xb0] sm:$0xf] %vm692_vm0, %v4277_v56  ;;  %4527 = vst.msk [vmem:[#allocation3 + $0xbc] sm:$0xf] %vm692_vm0, %v4287_v14  ;;  %v4325_v7 = vsel %vm7173_vm6, %v7447_v6, %v7480_v30  ;;  %v4335_v9 = vsel %vm7173_vm6, %v4330_v46, %v7280_v61 }
 0x142   : > { %v6884_v39 = vld [vmem:[#allocation3 + $0x50] ss:$12 sps:$4 sm:$0xff]   ;;  %4528 = vst.msk [vmem:[#allocation3 + $0xc8] sm:$0xf] %vm692_vm0, %v4301_v27  ;;  %4529 = vst.msk [vmem:[#allocation3 + $0xd4] sm:$0xf] %vm692_vm0, %v4311_v13  ;;  %v3573_v60 = vsel %vm7411_vm12, %v3565_v22, %v3572_v24  ;;  %3928 = vrot.lane.b32.xlu0 %v3860_v49, %s7024_s15  ;;  %v2440_v16 = vor.u32 %v2438_v47, %v2437_v3  ;;  %v4349_v33 = vsel %vm7173_vm6, %v7399_v21, %v7476_v31 }
 0x143   : > { %v2840_v20 = vshrl.u32 %v2770_v0, 16  ;;  %v2843_v35 = vshll.u32 %v2770_v0, 16  ;;  %4530 = vst.msk [vmem:[#allocation3 + $0xe0] sm:$0xf] %vm692_vm0, %v4325_v7  ;;  %4531 = vst.msk [vmem:[#allocation3 + $0xec] sm:$0xf] %vm692_vm0, %v4335_v9  ;;  %6734 = vmatmul.mubr.msk.bf16.gmra.mxu0 %vm4999_vm11, %v6884_v39  ;;  %3762 = vrot.lane.b32.xlu1 %v3573_v60, %s7023_s21  ;;  %v4359_v48 = vsel %vm7173_vm6, %v7506_v63, %v7285_v1 }
 0x144   : > { %v2772_v54 = vld [vmem:[#allocation2 + $0x38] sm:$0x1]  ;;  %v2223_v6 = vshrl.u32 %v2174_v32, 16  ;;  %v1616_v61 = vld [vmem:[#allocation2 + $0x30] sm:$0xf]  ;;  %v7582_v18 = vrot.slane %v2228_v42, 7  ;;  %v2441_v57 = vsel %vm7411_vm12, %v2433_v17, %v2440_v16 }
 0x145   : > { %v1425_v23 = vld [vmem:[#allocation2 + $0x58] sm:$0xf]  ;;  %v6885_v52 = vld [vmem:[#allocation3 + $0x68] ss:$12 sps:$4 sm:$0xff]   ;;  %v2842_v55 = vrot.slane %v2840_v20, 4  ;;  %v2845_v30 = vrot.slane %v2843_v35, 5 }
 0x146   : > { %v2859_v2 = vshll.u32 %v2772_v54, 16  ;;  %4532 = vst.msk [vmem:[#allocation3 + $0xf8] sm:$0xf] %vm692_vm0, %v4349_v33  ;;  %6737 = vmatprep.mubr.msk.bf16.mxu0 %vm4999_vm11, %v6885_v52  ;;  %1497 = vrot.lane.b32.xlu0 %v1425_v23, %s7022_s20  ;;  %v2231_v34 = vshll.u32 %v7517_v58, 16  ;;  %v1617_v21 = vld [vmem:[#allocation2 + $0x34] sm:$0xf] }
 0x147   : > { %v1710_v31 = vshrl.u32 %v1616_v61, 16  ;;  %v3349_v40 = vld [vmem:[#allocation2 + $0xb8] sm:$0x8]  ;;  %v1618_v62 = vld [vmem:[#allocation2 + $0x38] sm:$0x1]  ;;  %2612 = vrot.lane.b32.xlu1 %v2441_v57, %s7024_s15  ;;  %v6094_v10 = vrot.slane %v2223_v6, 11  ;;  %v2846_v22 = vor.u32 %v2845_v30, %v2842_v55 }
 0x148   : > { %v6886_v12 = vld [vmem:[#allocation3 + $0x80] ss:$12 sps:$4 sm:$0xff]   ;;  %v7597_v4 = vld [vmem:[#allocation2 + $0xbc] sm:$0xf]  ;;  %4533 = vst.msk [vmem:[#allocation3 + $0x104] sm:$0xf] %vm692_vm0, %v4359_v48  ;;  %v2233_v36 = vor.u32 %v2231_v34, %v7582_v18 }
 0x149   : > { %v2198_v44 = vld [vmem:[#allocation2 + $0xb8] sm:$0x8]  ;;  %v3861_v11 = vld [vmem:[#allocation2 + $0x5c] sm:$0xf]  ;;  %v6887_v8 = vld [vmem:[#allocation3 + $0x98] ss:$12 sps:$4 sm:$0xff]  }
 0x14a   : > { %v2849_v5 = vshll.u32 %v2771_v37, 16  ;;  %3960 = vrot.lane.b32.xlu0 %v3876_v19, %s7024_s15  ;;  %v2853_v58 = vshrl.u32 %v2771_v37, 16  ;;  %v2237_v1 = vshrl.u32 %v7584_v43, 16  ;;  %v1712_v63 = vrot.slane %v1710_v31, 4  ;;  %v2199_v42 = vld [vmem:[#allocation2 + $0xbc] sm:$0xf] }
 0x14b   : > { %v1713_v46 = vshll.u32 %v1616_v61, 16  ;;  %6738 = vmatmul.mubr.msk.bf16.gmra.mxu0 %vm4999_vm11, %v6886_v12  ;;  %3930 = vrot.lane.b32.xlu1 %v3861_v11, %s7024_s15  ;;  %v1719_v53 = vshll.u32 %v1617_v21, 16  ;;  %v1723_v29 = vshrl.u32 %v1617_v21, 16  ;;  %v3531_v47 = vshrl.u32 %v3349_v40, 16  ;;  %v7611_v0 = vld [vmem:[#allocation2 + $0x8] sm:$0xf] }
 0x14c   : > { %v1729_v49 = vshll.u32 %v1618_v62, 16  ;;  %6741 = vmatprep.mubr.msk.bf16.mxu0 %vm4999_vm11, %v6887_v8  ;;  %v7606_v41 = vrot.slane %v2859_v2, 5  ;;  %v3536_v26 = vshrl.u32 %v7597_v4, 16  ;;  %v2399_v45 = vshrl.u32 %v2198_v44, 16  ;;  %v1426_v32 = vld [vmem:[#allocation2 + $0x5c] sm:$0xf] }
 0x14d   : > { %v1715_v59 = vrot.slane %v1713_v46, 5  ;;  %v2234_v24 = vsel %vm7411_vm12, %v6094_v10, %v2233_v36  ;;  %v2847_v17 = vrot.slane %v2846_v22, 4  ;;  %v2851_v3 = vrot.slane %v2849_v5, 5  ;;  %v2794_v60 = vld [vmem:[#allocation2 + $0xd0] sm:$0xf] }
 0x14e   : > { %2574 = vrot.lane.b32.xlu0 %v2234_v24, %s7024_s15  ;;  %v2239_v56 = vrot.slane %v2237_v1, 7  ;;  %v2855_v27 = vrot.slane %v2853_v58, 4  ;;  %v1721_v13 = vrot.slane %v1719_v53, 5  ;;  %v6117_v39 = vrot.slane %v3531_v47, 11  ;;  %v6888_v23 = vld [vmem:[#allocation3 + $0xb0] ss:$12 sps:$4 sm:$0xff]  }
 0x14f   : > { %v1716_v14 = vor.u32 %v1715_v59, %v1712_v63  ;;  %1499 = vrot.lane.b32.xlu1 %v1426_v32, %s7022_s20  ;;  %v1725_v7 = vrot.slane %v1723_v29, 4  ;;  %v7615_v9 = vrot.slane %v1729_v49, 5  ;;  %v2240_v16 = vshll.u32 %v7584_v43, 16  ;;  %v7623_v52 = vld [vmem:[#allocation2 + $0xc0] sm:$0xf] }
 0x150   : > { %v7618_v20 = vrot.slane %v3536_v26, 7  ;;  %v3539_v35 = vshll.u32 %v7597_v4, 16  ;;  %v2404_v54 = vshrl.u32 %v2199_v42, 16  ;;  %v2852_v6 = vsel %vm7173_vm6, %v2847_v17, %v2851_v3  ;;  %v6889_v33 = vld [vmem:[#allocation3 + $0xc8] ss:$12 sps:$4 sm:$0xff]   ;;  %v1482_v17 = vpop.permute.xlu0 %1481 }
 0x151   : > { %v1717_v61 = vrot.slane %v1716_v14, 4  ;;  %v1007_v37 = vshrl.u32 %v7611_v0, 16  ;;  %v3877_v19 = vld [vmem:[#allocation2 + $0xfc] sm:$0xf]  ;;  %v2242_v55 = vor.u32 %v2240_v16, %v2239_v56  ;;  %v2856_v30 = vor.u32 %v2855_v27, %v2851_v3  ;;  %v1640_v31 = vld [vmem:[#allocation2 + $0xd0] sm:$0xf] }
 0x152   : > { %3203 = vrot.lane.b32.xlu0 %v2852_v6, %s7022_s20  ;;  %v3032_v43 = vshrl.u32 %v2794_v60, 16  ;;  %v3035_v2 = vshll.u32 %v2794_v60, 16  ;;  %v2235_v57 = vrot.slane %v7582_v18, 4  ;;  %v1726_v34 = vor.u32 %v1725_v7, %v1721_v13  ;;  %v7636_v44 = vld [vmem:[#allocation2 + $0xc] sm:$0xf] }
 0x153   : > { %6742 = vmatmul.mubr.msk.bf16.gmra.mxu0 %vm4999_vm11, %v6888_v23  ;;  %3962 = vrot.lane.b32.xlu1 %v3877_v19, %s7024_s15  ;;  %v6102_v21 = vrot.slane %v2399_v45, 11  ;;  %v1010_v40 = vshll.u32 %v7611_v0, 16  ;;  %v3541_v48 = vor.u32 %v3539_v35, %v7618_v20  ;;  %v7633_v62 = vrot.slane %v2404_v54, 7  ;;  %v2795_v5 = vld [vmem:[#allocation2 + $0xd4] sm:$0xf] }
 0x154   : > { %6745 = vmatprep.mubr.msk.bf16.mxu0 %vm4999_vm11, %v6889_v33  ;;  %v2407_v12 = vshll.u32 %v2199_v42, 16  ;;  %v3545_v4 = vshrl.u32 %v7623_v52, 16  ;;  %v1722_v11 = vsel %vm7173_vm6, %v1717_v61, %v1721_v13  ;;  %v3034_v18 = vrot.slane %v3032_v43, 4  ;;  %v6890_v63 = vld [vmem:[#allocation3 + $0xe0] ss:$12 sps:$4 sm:$0xff]   ;;  %v1484_v43 = vpop.permute.xlu0 %1483 }
 0x155   : > { %v3037_v8 = vrot.slane %v3035_v2, 5  ;;  %v7640_v10 = vrot.slane %v1007_v37, 7  ;;  %v2243_v36 = vsel %vm7411_vm12, %v2235_v57, %v2242_v55  ;;  %v2857_v22 = vrot.slane %v2856_v30, 4  ;;  %v2200_v53 = vld [vmem:[#allocation2 + $0xc0] sm:$0xf] }
 0x156   : > { %2053 = vrot.lane.b32.xlu0 %v1722_v11, %s7023_s21  ;;  %v1902_v58 = vshrl.u32 %v1640_v31, 16  ;;  %v1905_v1 = vshll.u32 %v1640_v31, 16  ;;  %v1727_v46 = vrot.slane %v1726_v34, 4  ;;  %v1016_v29 = vshrl.u32 %v7636_v44, 16  ;;  %v6891_v49 = vld [vmem:[#allocation3 + $0xf8] ss:$12 sps:$4 sm:$0xff]  }
 0x157   : > { %2576 = vrot.lane.b32.xlu1 %v2243_v36, %s7024_s15  ;;  %v3542_v47 = vsel %vm7411_vm12, %v6117_v39, %v3541_v48  ;;  %v2409_v59 = vor.u32 %v2407_v12, %v7633_v62  ;;  %v3547_v26 = vrot.slane %v3545_v4, 7  ;;  %v3548_v45 = vshll.u32 %v7623_v52, 16  ;;  %v1641_v24 = vld [vmem:[#allocation2 + $0xd4] sm:$0xf]  ;;  %v951_v56 = vld [vmem:[#allocation2 + $0x4] sm:$0x8] }
 0x158   : > { %v3038_v3 = vor.u32 %v3037_v8, %v3034_v18  ;;  %v3041_v42 = vshll.u32 %v2795_v5, 16  ;;  %v1904_v0 = vrot.slane %v1902_v58, 4  ;;  %v1907_v32 = vrot.slane %v1905_v1, 5  ;;  %v2796_v6 = vld [vmem:[#allocation2 + $0xd8] sm:$0x1] }
 0x159   : > { %v2862_v14 = vsel %vm7173_vm6, %v2857_v22, %v7606_v41  ;;  %v3045_v27 = vshrl.u32 %v2795_v5, 16  ;;  %v2413_v13 = vshrl.u32 %v2200_v53, 16  ;;  %v1012_v39 = vor.u32 %v1010_v40, %v7640_v10  ;;  %v7679_v12 = vld [vmem:[#allocation2 + $0x24] sm:$0x1]  ;;  %v957_v4 = vld [vmem:[#allocation2 + $0x2c] sm:$0x8] }
 0x15a   : > { %3756 = vrot.lane.b32.xlu0 %v3542_v47, %s7023_s21  ;;  %v2829_v7 = vshrl.u32 %v7420_v51, 16  ;;  %v1732_v60 = vsel %vm7173_vm6, %v1727_v46, %v7615_v9  ;;  %v3543_v16 = vrot.slane %v7618_v20, 4  ;;  %v1018_v35 = vrot.slane %v1016_v29, 7  ;;  %v7666_v51 = vld [vmem:[#allocation2 + $0xd8] sm:$0x1] }
 0x15b   : > { %6746 = vmatmul.mubr.msk.bf16.gmra.mxu0 %vm4999_vm11, %v6890_v63  ;;  %3205 = vrot.lane.b32.xlu1 %v2862_v14, %s7022_s20  ;;  %v2410_v41 = vsel %vm7411_vm12, %v6102_v21, %v2409_v59  ;;  %v3550_v54 = vor.u32 %v3548_v45, %v3547_v26  ;;  %v1911_v23 = vshll.u32 %v1641_v24, 16  ;;  %v1002_v61 = vshrl.u32 %v951_v56, 16  ;;  %v2703_v36 = vld [vmem:[#allocation2 + $0x1c] sm:$0xf]  ;;  %v720_v63 = vld [vmem:[#allocation2 + $0x54] sm:$0x8]  ;;  %v2046_v26 = vpop.permute.xlu0 %2045 }
 0x15c   : > { %6749 = vmatprep.mubr.msk.bf16.mxu0 %vm4999_vm11, %v6891_v49  ;;  %v3039_v52 = vrot.slane %v3038_v3, 4  ;;  %v3043_v37 = vrot.slane %v3041_v42, 5  ;;  %v2416_v33 = vshll.u32 %v2200_v53, 16  ;;  %v1908_v19 = vor.u32 %v1907_v32, %v1904_v0  ;;  %2735 = vst.msk [vmem:[#allocation3 + $0x4] sm:$0xf] %vm692_vm0, %v2703_v36  ;;  %v6894_v47 = vld [vmem:[%s9666_s2 + $0x78] sm:$0xff]  }
 0x15d   : > { %v2415_v9 = vrot.slane %v2413_v13, 7  ;;  %v1915_v20 = vshrl.u32 %v1641_v24, 16  ;;  %v3047_v55 = vrot.slane %v3045_v27, 4  ;;  %v6078_v30 = vrot.slane %v1002_v61, 11  ;;  %v2791_v49 = vld [vmem:[#allocation2 + $0xbc] sm:$0xf]  ;;  %v2048_v24 = vpop.permute.xlu1 %2047  ;;  %6529 = vmatprep.subr.bf16.mxu1 %v6894_v47 }
 0x15e   : > { %2606 = vrot.lane.b32.xlu0 %v2410_v41, %s7024_s15  ;;  %v2411_v2 = vrot.slane %v7633_v62, 4  ;;  %v3051_v57 = vshll.u32 %v2796_v6, 16  ;;  %v1921_v34 = vshll.u32 %v7666_v51, 16  ;;  %v3551_v21 = vsel %vm7411_vm12, %v3543_v16, %v3550_v54  ;;  %v1615_v45 = vld [vmem:[#allocation2 + $0x24] sm:$0x1]  ;;  %v6896_v14 = vld [vmem:[%s9666_s2 + $0x70] sm:$0xff]  }
 0x15f   : > { %2055 = vrot.lane.b32.xlu1 %v1732_v60, %s7023_s21  ;;  %v7674_v31 = vrot.slane %v1911_v23, 5  ;;  %v1013_v40 = vsel %vm7411_vm12, %v6078_v30, %v1012_v39  ;;  %v1019_v48 = vshll.u32 %v7636_v44, 16  ;;  %v3044_v62 = vsel %vm7173_vm6, %v3039_v52, %v3043_v37  ;;  %v1613_v44 = vld [vmem:[#allocation2 + $0x1c] sm:$0xf]  ;;  %v958_v56 = vld [vmem:[#allocation2 + $0x30] sm:$0xf] }
 0x160   : > { %v1909_v11 = vrot.slane %v1908_v19, 4  ;;  %1385 = vst.msk [vmem:[#allocation3] sm:$0xf] %vm692_vm0, %v1013_v40  ;;  %v1014_v18 = vrot.slane %v7640_v10, 4  ;;  %v7685_v8 = vrot.slane %v2829_v7, 4  ;;  %v2418_v22 = vor.u32 %v2416_v33, %v2415_v9  ;;  %v6897_v52 = vld [vmem:[%s9666_s2 + $0x30] sm:$0xff]  }
 0x161   : > { %v3048_v5 = vor.u32 %v3047_v55, %v3043_v37  ;;  %v1917_v58 = vrot.slane %v1915_v20, 4  ;;  %1578 = vst.msk [vmem:[#allocation3] sm:$0xf] %vm1577_vm13, %v1482_v17  ;;  %v1021_v1 = vor.u32 %v1019_v48, %v1018_v35  ;;  %v3053_v46 = vrot.slane %v3051_v57, 5  ;;  %v6895_v17 = vld [vmem:[%s9666_s2 + $0x38] sm:$0xff]   ;;  %v6898_v48 = vld [vmem:[%s9666_s2 + $0x68] sm:$0xff]  }
 0x162   : > { %3235 = vrot.lane.b32.xlu0 %v3044_v62, %s7022_s20  ;;  %v2832_v10 = vor.u32 %v7685_v8, %v7449_v15  ;;  %v2835_v53 = vshll.u32 %v7679_v12, 16  ;;  %v1046_v29 = vshrl.u32 %v957_v4, 16  ;;  %v1914_v3 = vsel %vm7173_vm6, %v1909_v11, %v7674_v31  ;;  %2142 = vst.msk [vmem:[#allocation3] sm:$0xf] %vm2141_vm14, %v2046_v26  ;;  %v2793_v60 = vld [vmem:[#allocation2 + $0xc4] sm:$0x1]  ;;  %6530 = vmatpush3.bf16.msra.mxu1 %v6895_v17 }
 0x163   : > { %3758 = vrot.lane.b32.xlu1 %v3551_v21, %s7023_s21  ;;  %v1022_v59 = vsel %vm7411_vm12, %v1014_v18, %v1021_v1  ;;  %v1686_v42 = vshrl.u32 %v1613_v44, 16  ;;  %v1689_v0 = vshll.u32 %v1613_v44, 16  ;;  %v721_v32 = vsel %vm7185_vm9, 0, %v720_v63  ;;  %v981_v41 = vld [vmem:[#allocation2 + $0xcc] sm:$0x8]  ;;  %6531 = vmatprep.subr.bf16.mxu1 %v6896_v14 }
 0x164   : > { %1386 = vst.msk [vmem:[#allocation3 + $0xc] sm:$0xf] %vm692_vm0, %v1022_v59  ;;  %v2419_v27 = vsel %vm7411_vm12, %v2411_v2, %v2418_v22  ;;  %v3049_v13 = vrot.slane %v3048_v5, 4  ;;  %v1918_v39 = vor.u32 %v1917_v58, %v7674_v31  ;;  %v1923_v7 = vrot.slane %v1921_v34, 5  ;;  %722 = vst [vmem:[#allocation2 + $0x54] sm:$0x8] %v721_v32 }
 0x165   : > { %1579 = vst.msk [vmem:[#allocation3 + $0xc] sm:$0xf] %vm1577_vm13, %v1484_v43  ;;  %v1705_v16 = vshll.u32 %v1615_v45, 16  ;;  %v6080_v35 = vrot.slane %v1046_v29, 11  ;;  %v954_v54 = vld [vmem:[#allocation2 + $0x18] sm:$0x8] }
 0x166   : > { %2085 = vrot.lane.b32.xlu0 %v1914_v3, %s7023_s21  ;;  %2143 = vst.msk [vmem:[#allocation3 + $0xc] sm:$0xf] %vm2141_vm14, %v2048_v24  ;;  %v3008_v23 = vshrl.u32 %v2791_v49, 16  ;;  %v3011_v6 = vshll.u32 %v2791_v49, 16  ;;  %v1051_v51 = vshrl.u32 %v958_v56, 16  ;;  %v1688_v33 = vrot.slane %v1686_v42, 4  ;;  %6532 = vmatpush3.bf16.msra.mxu1 %v6897_v52 }
 0x167   : > { %2608 = vrot.lane.b32.xlu1 %v2419_v27, %s7024_s15  ;;  %v744_v61 = vld [vmem:[#allocation2 + $0xf4] sm:$0x8]  ;;  %v3858_v37 = vld [vmem:[#allocation2 + $0x44] sm:$0xf]  ;;  %v1691_v19 = vrot.slane %v1689_v0, 5  ;;  %v7722_v9 = vrot.slane %v2835_v53, 5  ;;  %v3054_v55 = vsel %vm7173_vm6, %v3049_v13, %v3053_v46  ;;  %6533 = vmatprep.subr.bf16.mxu1 %v6898_v48 }
 0x168   : > { %v3027_v20 = vshll.u32 %v2793_v60, 16  ;;  %v1919_v30 = vrot.slane %v1918_v39, 4  ;;  %v7727_v43 = vld [vmem:[#allocation2 + $0x20] sm:$0xf]  ;;  %v7729_v2 = vrot.slane %v1051_v51, 7  ;;  %v1054_v57 = vshll.u32 %v958_v56, 16 }
 0x169   : > { %v1637_v34 = vld [vmem:[#allocation2 + $0xbc] sm:$0xf]  ;;  %v745_v21 = vsel %vm7185_vm9, 0, %v744_v61  ;;  %v1222_v31 = vshrl.u32 %v981_v41, 16  ;;  %v1024_v40 = vshrl.u32 %v954_v54, 16  ;;  %v3010_v12 = vrot.slane %v3008_v23, 4 }
 0x16a   : > { %3924 = vrot.lane.b32.xlu0 %v3858_v37, %s7024_s15  ;;  %v3013_v4 = vrot.slane %v3011_v6, 5  ;;  %v7737_v62 = vrot.slane %v1705_v16, 5  ;;  %v1056_v11 = vor.u32 %v1054_v57, %v7729_v2  ;;  %746 = vst [vmem:[#allocation2 + $0xf4] sm:$0x8] %v745_v21  ;;  %v959_v18 = vld [vmem:[#allocation2 + $0x34] sm:$0xf]  ;;  %v1924_v44 = vsel %vm7173_vm6, %v1919_v30, %v1923_v7 }
 0x16b   : > { %3237 = vrot.lane.b32.xlu1 %v3054_v55, %s7022_s20  ;;  %v1423_v36 = vld [vmem:[#allocation2 + $0x44] sm:$0xf]  ;;  %v1695_v22 = vshll.u32 %v7727_v43, 16  ;;  %v7741_v5 = vld [vmem:[#allocation2 + $0xc0] sm:$0xf]  ;;  %v7743_v58 = vrot.slane %v3027_v20, 5  ;;  %v1692_v1 = vor.u32 %v1691_v19, %v1688_v33 }
 0x16c   : > { %v1878_v63 = vshrl.u32 %v1637_v34, 16  ;;  %v1057_v46 = vsel %vm7411_vm12, %v6080_v35, %v1056_v11  ;;  %v982_v53 = vld [vmem:[#allocation2 + $0xd0] sm:$0xf]  ;;  %v6899_v29 = vld [vmem:[%s9666_s2 + $0x28] sm:$0xff]   ;;  %v1881_v47 = vshll.u32 %v1637_v34, 16  ;;  %v1060_v49 = vshrl.u32 %v959_v18, 16 }
 0x16d   : > { %1389 = vst.msk [vmem:[#allocation3 + $0x30] sm:$0xf] %vm692_vm0, %v1057_v46  ;;  %v6088_v59 = vrot.slane %v1222_v31, 11  ;;  %v7755_v26 = vrot.slane %v1024_v40, 11  ;;  %v6900_v45 = vld [vmem:[%s9666_s2 + $0x60] sm:$0xff]   ;;  %v3014_v3 = vor.u32 %v3013_v4, %v3010_v12  ;;  %v3017_v42 = vshll.u32 %v7741_v5, 16  ;;  %6534 = vmatpush3.bf16.msra.mxu1 %v6899_v29 }
 0x16e   : > { %1493 = vrot.lane.b32.xlu0 %v1423_v36, %s7022_s20  ;;  %v3859_v24 = vld [vmem:[#allocation2 + $0x48] sm:$0xf]  ;;  %v3874_v17 = vld [vmem:[#allocation2 + $0xe4] sm:$0xf]  ;;  %v7761_v0 = vld [vmem:[#allocation2 + $0xc0] sm:$0xf]  ;;  %6535 = vmatprep.subr.bf16.mxu1 %v6900_v45 }
 0x16f   : > { %2087 = vrot.lane.b32.xlu1 %v1924_v44, %s7023_s21  ;;  %v6901_v32 = vld [vmem:[%s9666_s2 + $0x20] sm:$0xff]   ;;  %v1062_v56 = vrot.slane %v1060_v49, 7  ;;  %v1063_v14 = vshll.u32 %v959_v18, 16  ;;  %v1227_v27 = vshrl.u32 %v982_v53, 16  ;;  %v1230_v13 = vshll.u32 %v982_v53, 16  ;;  %v6902_v52 = vld [vmem:[%s9666_s2 + $0x58] sm:$0xff]  }
 0x170   : > { %v983_v39 = vld [vmem:[#allocation2 + $0xd4] sm:$0xf]  ;;  %v1693_v7 = vrot.slane %v1692_v1, 4  ;;  %v7767_v60 = vrot.slane %v1695_v22, 5  ;;  %v1699_v16 = vshrl.u32 %v7727_v43, 16  ;;  %v7770_v35 = vrot.slane %v1878_v63, 4 }
 0x171   : > { %v2705_v41 = vld [vmem:[#allocation2 + $0x30] sm:$0xf]  ;;  %v7773_v54 = vrot.slane %v1881_v47, 5  ;;  %v1058_v23 = vrot.slane %v7729_v2, 4  ;;  %v1065_v6 = vor.u32 %v1063_v14, %v1062_v56  ;;  %v1229_v51 = vrot.slane %v1227_v27, 7  ;;  %6536 = vmatpush3.bf16.msra.mxu1 %v6901_v32  ;;  %v6903_v55 = vld [vmem:[%s9666_s2 + $0x18] sm:$0xff]  }
 0x172   : > { %3956 = vrot.lane.b32.xlu0 %v3874_v17, %s7024_s15  ;;  %v955_v61 = vld [vmem:[#allocation2 + $0x1c] sm:$0xf]  ;;  %2737 = vst.msk [vmem:[#allocation3 + $0x1c] sm:$0xf] %vm692_vm0, %v2705_v41  ;;  %v1424_v37 = vld [vmem:[#allocation2 + $0x48] sm:$0xf]  ;;  %6537 = vmatprep.subr.bf16.mxu1 %v6902_v52  ;;  %v1698_v11 = vsel %vm7173_vm6, %v1693_v7, %v7767_v60 }
 0x173   : > { %3926 = vrot.lane.b32.xlu1 %v3859_v24, %s7024_s15  ;;  %v7780_v33 = vrot.slane %v3017_v42, 5  ;;  %v1236_v19 = vshrl.u32 %v983_v39, 16  ;;  %v1239_v20 = vshll.u32 %v983_v39, 16  ;;  %v1439_v30 = vld [vmem:[#allocation2 + $0xe4] sm:$0xf]  ;;  %v7785_v43 = vrot.slane %v3014_v3, 4 }
 0x174   : > { %v1887_v2 = vshll.u32 %v7761_v0, 16  ;;  %v7788_v57 = vld [vmem:[#allocation2 + $0x58] sm:$0xf]  ;;  %v1066_v34 = vsel %vm7411_vm12, %v1058_v23, %v1065_v6  ;;  %v1232_v21 = vor.u32 %v1230_v13, %v1229_v51  ;;  %v3021_v31 = vshrl.u32 %v7741_v5, 16  ;;  %v717_v4 = vld [vmem:[#allocation2 + $0x40] sm:$0x8] }
 0x175   : > { %1390 = vst.msk [vmem:[#allocation3 + $0x3c] sm:$0xf] %vm692_vm0, %v1066_v34  ;;  %v1234_v40 = vrot.slane %v1229_v51, 4  ;;  %v1238_v48 = vrot.slane %v1236_v19, 7  ;;  %v1029_v12 = vshrl.u32 %v955_v61, 16  ;;  %v1884_v18 = vor.u32 %v7773_v54, %v7770_v35  ;;  %6538 = vmatpush3.bf16.msra.mxu1 %v6903_v55  ;;  %v6904_v42 = vld [vmem:[%s9666_s2 + $0x50] sm:$0xff]  }
 0x176   : > { %1525 = vrot.lane.b32.xlu0 %v1439_v30, %s7022_s20  ;;  %v7801_v36 = vrot.slane %v1699_v16, 4  ;;  %v7805_v5 = vld [vmem:[#allocation2 + $0x58] sm:$0xf]  ;;  %v1233_v44 = vsel %vm7411_vm12, %v6088_v59, %v1232_v21  ;;  %v956_v1 = vld [vmem:[#allocation2 + $0x20] sm:$0xf]  ;;  %v3426_v63 = vshrl.u32 %v7788_v57, 16  ;;  %v3020_v45 = vsel %vm7173_vm6, %v7785_v43, %v7780_v33  ;;  %6539 = vmatprep.subr.bf16.mxu1 %v6904_v42 }
 0x177   : > { %1495 = vrot.lane.b32.xlu1 %v1424_v37, %s7022_s20  ;;  %v7803_v22 = vpop.permute.xlu0 %3920  ;;  %1405 = vst.msk [vmem:[#allocation3 + $0xf0] sm:$0xf] %vm692_vm0, %v1233_v44  ;;  %v1241_v46 = vor.u32 %v1239_v20, %v1238_v48  ;;  %v7811_v53 = vrot.slane %v1029_v12, 7  ;;  %v1032_v29 = vshll.u32 %v955_v61, 16  ;;  %v978_v47 = vld [vmem:[#allocation2 + $0xb8] sm:$0x8] }
 0x178   : > { %v2706_v49 = vld [vmem:[#allocation2 + $0x34] sm:$0xf]  ;;  %v7817_v24 = vrot.slane %v1887_v2, 5  ;;  %v1891_v59 = vshrl.u32 %v7761_v0, 16  ;;  %v718_v3 = vsel %vm7185_vm9, 0, %v717_v4  ;;  %v7827_v56 = vrot.slane %v3021_v31, 4 }
 0x179   : > { %v3334_v17 = vld [vmem:[#allocation2 + $0x54] sm:$0x8]  ;;  %2738 = vst.msk [vmem:[#allocation3 + $0x28] sm:$0xf] %vm692_vm0, %v2706_v49  ;;  %v3875_v32 = vld [vmem:[#allocation2 + $0xe8] sm:$0xf]  ;;  %v1242_v0 = vsel %vm7411_vm12, %v1234_v40, %v1241_v46  ;;  %v1034_v27 = vor.u32 %v1032_v29, %v7811_v53  ;;  %v1702_v7 = vor.u32 %v7801_v36, %v7767_v60 }
 0x17a   : > { %2049 = vrot.lane.b32.xlu0 %v1698_v11, %s7023_s21  ;;  %v2294_v14 = vshrl.u32 %v7805_v5, 16  ;;  %719 = vst [vmem:[#allocation2 + $0x40] sm:$0x8] %v718_v3  ;;  %v979_v13 = vld [vmem:[#allocation2 + $0xbc] sm:$0xf]  ;;  %v2833_v39 = vrot.slane %v2832_v10, 4 }
 0x17b   : > { %3958 = vrot.lane.b32.xlu1 %v3875_v32, %s7024_s15  ;;  %v3429_v16 = vshll.u32 %v7788_v57, 16  ;;  %v1490_v35 = vpop.permute.xlu0 %1489  ;;  %v7840_v41 = vld [vmem:[#allocation2 + $0xf8] sm:$0xf]  ;;  %1406 = vst.msk [vmem:[#allocation3 + $0xfc] sm:$0xf] %vm692_vm0, %v1242_v0  ;;  %v1038_v54 = vshrl.u32 %v956_v1, 16  ;;  %v1035_v8 = vsel %vm7411_vm12, %v7755_v26, %v1034_v27  ;;  %v3024_v26 = vor.u32 %v7827_v56, %v7780_v33 }
 0x17c   : > { %v1440_v23 = vld [vmem:[#allocation2 + $0xe8] sm:$0xf]  ;;  %v1885_v6 = vrot.slane %v1884_v18, 4  ;;  %v3421_v51 = vshrl.u32 %v3334_v17, 16  ;;  %v7843_v61 = vrot.slane %v3426_v63, 7  ;;  %v7846_v15 = vpop.permute.xlu1 %3922  ;;  %v1041_v37 = vshll.u32 %v956_v1, 16 }
 0x17d   : > { %1582 = vst.msk [vmem:[#allocation3 + $0x30] sm:$0xf] %vm1577_vm13, %v1490_v35  ;;  %v2721_v10 = vld [vmem:[#allocation2 + $0xd0] sm:$0xf]  ;;  %v7851_v60 = vld [vmem:[#allocation2 + $0xc4] sm:$0x1]  ;;  %v2838_v49 = vsel %vm7173_vm6, %v2833_v39, %v7722_v9 }
 0x17e   : > { %1387 = vst.msk [vmem:[#allocation3 + $0x18] sm:$0xf] %vm692_vm0, %v1035_v8  ;;  %v1040_v52 = vrot.slane %v1038_v54, 7  ;;  %v1200_v19 = vshrl.u32 %v978_v47, 16  ;;  %v1205_v20 = vshrl.u32 %v979_v13, 16  ;;  %v6906_v55 = vld [vmem:[%s9666_s2 + $0x10] sm:$0xff]   ;;  %3231 = vrot.lane.b32.xlu0 %v3020_v45, %s7022_s20  ;;  %v1890_v11 = vsel %vm7173_vm6, %v1885_v6, %v7817_v24 }
 0x17f   : > { %2753 = vst.msk [vmem:[#allocation3 + $0xdc] sm:$0xf] %vm692_vm0, %v2721_v10  ;;  %v2183_v30 = vld [vmem:[#allocation2 + $0x54] sm:$0x8]  ;;  %v7861_v43 = vrot.slane %v2294_v14, 7  ;;  %v2297_v2 = vshll.u32 %v7805_v5, 16  ;;  %1527 = vrot.lane.b32.xlu1 %v1440_v23, %s7022_s20  ;;  %v7868_v21 = vpop.permute.xlu0 %3952  ;;  %6540 = vmatpush3.bf16.msra.mxu1 %v6906_v55  ;;  %v3431_v18 = vor.u32 %v3429_v16, %v7843_v61 }
 0x180   : > { %v1208_v57 = vshll.u32 %v979_v13, 16  ;;  %v6907_v34 = vld [vmem:[%s9666_s2 + $0x48] sm:$0xff]   ;;  %v1036_v31 = vrot.slane %v7811_v53, 4  ;;  %v1043_v40 = vor.u32 %v1041_v37, %v1040_v52  ;;  %v6087_v48 = vrot.slane %v1200_v19, 11  ;;  %v980_v33 = vld [vmem:[#allocation2 + $0xc0] sm:$0xf]  ;;  %v1492_v44 = vpop.permute.xlu1 %1491 }
 0x181   : > { %v7871_v12 = vrot.slane %v1205_v20, 7  ;;  %v6908_v4 = vld [vmem:[%s9666_s2 + $0x8] sm:$0xff]   ;;  %v1893_v36 = vrot.slane %v1891_v59, 4  ;;  %v3602_v5 = vshrl.u32 %v7840_v41, 16  ;;  %v2722_v1 = vld [vmem:[#allocation2 + $0xd4] sm:$0xf]  ;;  %6541 = vmatprep.subr.bf16.mxu1 %v6907_v34  ;;  %v2299_v32 = vor.u32 %v2297_v2, %v7861_v43 }
 0x182   : > { %v6910_v63 = vld [vmem:[%s9666_s2 + $0x40] sm:$0xff]   ;;  %v6112_v46 = vrot.slane %v3421_v51, 11  ;;  %v2289_v53 = vshrl.u32 %v2183_v30, 16  ;;  %1583 = vst.msk [vmem:[#allocation3 + $0x3c] sm:$0xf] %vm1577_vm13, %v1492_v44  ;;  %v1044_v29 = vsel %vm7411_vm12, %v1036_v31, %v1043_v40  ;;  %2081 = vrot.lane.b32.xlu0 %v1890_v11, %s7023_s21  ;;  %v1703_v45 = vrot.slane %v1702_v7, 4 }
 0x183   : > { %v1210_v47 = vor.u32 %v1208_v57, %v7871_v12  ;;  %2754 = vst.msk [vmem:[#allocation3 + $0xe8] sm:$0xf] %vm692_vm0, %v2722_v1  ;;  %v1897_v59 = vshll.u32 %v7851_v60, 16  ;;  %v3358_v17 = vld [vmem:[#allocation2 + $0xf4] sm:$0x8]  ;;  %v1214_v3 = vshrl.u32 %v980_v33, 16  ;;  %3201 = vrot.lane.b32.xlu1 %v2838_v49, %s7022_s20  ;;  %v1522_v14 = vpop.permute.xlu0 %1521  ;;  %6542 = vmatpush3.bf16.msra.mxu1 %v6908_v4  ;;  %v1894_v27 = vor.u32 %v1893_v36, %v7817_v24 }
 0x184   : > { %1388 = vst.msk [vmem:[#allocation3 + $0x24] sm:$0xf] %vm692_vm0, %v1044_v29  ;;  %v3025_v42 = vrot.slane %v3024_v26, 4  ;;  %v7897_v56 = vld [vmem:[#allocation2 + $0x5c] sm:$0xf]  ;;  %v1217_v0 = vshll.u32 %v980_v33, 16  ;;  %v7904_v39 = vpop.permute.xlu1 %3954  ;;  %6543 = vmatprep.subr.bf16.mxu1 %v6910_v63  ;;  %v3432_v54 = vsel %vm7411_vm12, %v6112_v46, %v3431_v18 }
 0x185   : > { %v1211_v9 = vsel %vm7411_vm12, %v6087_v48, %v1210_v47  ;;  %v3605_v13 = vshll.u32 %v7840_v41, 16  ;;  %1598 = vst.msk [vmem:[#allocation3 + $0xf0] sm:$0xf] %vm1577_vm13, %v1522_v14  ;;  %v7906_v7 = vld [vmem:[#allocation2 + $0x5c] sm:$0xf]  ;;  %v1212_v16 = vrot.slane %v7871_v12, 4  ;;  %v1708_v41 = vsel %vm7173_vm6, %v1703_v45, %v7737_v62 }
 0x186   : > { %1403 = vst.msk [vmem:[#allocation3 + $0xd8] sm:$0xf] %vm692_vm0, %v1211_v9  ;;  %v1216_v35 = vrot.slane %v1214_v3, 7  ;;  %v6097_v23 = vrot.slane %v2289_v53, 11  ;;  %v3597_v6 = vshrl.u32 %v3358_v17, 16  ;;  %v7912_v24 = vrot.slane %v3602_v5, 7  ;;  %3736 = vrot.lane.b32.xlu0 %v3432_v54, %s7023_s21 }
 0x187   : > { %v3435_v51 = vshrl.u32 %v7897_v56, 16  ;;  %v6911_v10 = vld [vmem:[%s9666_s2] sm:$0xff]   ;;  %2051 = vrot.lane.b32.xlu1 %v1708_v41, %s7023_s21  ;;  %v2303_v60 = vshrl.u32 %v7906_v7, 16  ;;  %v1486_v52 = vpop.permute.xlu0 %1485  ;;  %v2776_v37 = vld [vmem:[#allocation2 + $0x58] sm:$0xf]  ;;  %v3030_v62 = vsel %vm7173_vm6, %v3025_v42, %v7743_v58  ;;  %v1895_v20 = vrot.slane %v1894_v27, 4 }
 0x188   : > { %v1219_v8 = vor.u32 %v1217_v0, %v1216_v35  ;;  %v741_v19 = vld [vmem:[#allocation2 + $0xe0] sm:$0x8]  ;;  %v1899_v55 = vrot.slane %v1897_v59, 5  ;;  %v1524_v26 = vpop.permute.xlu1 %1523  ;;  %1580 = vst.msk [vmem:[#allocation3 + $0x18] sm:$0xf] %vm1577_vm13, %v1486_v52  ;;  %6544 = vmatpush3.bf16.msra.mxu1 %v6911_v10  ;;  %v2300_v57 = vsel %vm7411_vm12, %v6097_v23, %v2299_v32  ;;  %v6120_v34 = vrot.slane %v3597_v6, 11 }
 0x189   : > { %v7928_v30 = vld [vmem:[#allocation2 + $0xfc] sm:$0xf]  ;;  %v3607_v31 = vor.u32 %v3605_v13, %v7912_v24  ;;  %v3438_v40 = vshll.u32 %v7897_v56, 16  ;;  %1599 = vst.msk [vmem:[#allocation3 + $0xfc] sm:$0xf] %vm1577_vm13, %v1524_v26  ;;  %v3437_v12 = vrot.slane %v3435_v51, 7 }
 0x18a   : > { %v1220_v2 = vsel %vm7411_vm12, %v1212_v16, %v1219_v8  ;;  %v3332_v58 = vld [vmem:[#allocation2 + $0x44] sm:$0xf]  ;;  %2586 = vrot.lane.b32.xlu0 %v2300_v57, %s7024_s15  ;;  %v2888_v33 = vshrl.u32 %v2776_v37, 16  ;;  %v2891_v4 = vshll.u32 %v2776_v37, 16  ;;  %v742_v11 = vsel %vm7185_vm9, 0, %v741_v19 }
 0x18b   : > { %v2181_v48 = vld [vmem:[#allocation2 + $0x44] sm:$0xf]  ;;  %1404 = vst.msk [vmem:[#allocation3 + $0xe4] sm:$0xf] %vm692_vm0, %v1220_v2  ;;  %3233 = vrot.lane.b32.xlu1 %v3030_v62, %s7022_s20  ;;  %v2305_v18 = vrot.slane %v2303_v60, 7  ;;  %v2306_v36 = vshll.u32 %v7906_v7, 16  ;;  %v7944_v44 = vpop.permute.xlu0 %3948  ;;  %v1900_v53 = vsel %vm7173_vm6, %v1895_v20, %v1899_v55  ;;  %v3608_v29 = vsel %vm7411_vm12, %v6120_v34, %v3607_v31 }
 0x18c   : > { %v3611_v5 = vshrl.u32 %v7928_v30, 16  ;;  %743 = vst [vmem:[#allocation2 + $0xe0] sm:$0x8] %v742_v11  ;;  %v3404_v1 = vshrl.u32 %v3332_v58, 16  ;;  %v1488_v63 = vpop.permute.xlu1 %1487  ;;  %v2272_v46 = vshrl.u32 %v2181_v48, 16  ;;  %v3433_v47 = vrot.slane %v7843_v61, 4 }
 0x18d   : > { %v3864_v49 = vld [vmem:[#allocation2 + $0x80] sm:$0xf]  ;;  %1581 = vst.msk [vmem:[#allocation3 + $0x24] sm:$0xf] %vm1577_vm13, %v1488_v63  ;;  %v7952_v45 = vld [vmem:[#allocation2 + $0x5c] sm:$0xf]  ;;  %v3440_v59 = vor.u32 %v3438_v40, %v3437_v12  ;;  %v2308_v56 = vor.u32 %v2306_v36, %v2305_v18 }
 0x18e   : > { %3768 = vrot.lane.b32.xlu0 %v3608_v29, %s7023_s21  ;;  %v2301_v17 = vrot.slane %v7861_v43, 4  ;;  %v3331_v3 = vld [vmem:[#allocation2 + $0x40] sm:$0x8]  ;;  %v2890_v42 = vrot.slane %v2888_v33, 4  ;;  %v2893_v32 = vrot.slane %v2891_v4, 5  ;;  %v3613_v14 = vrot.slane %v3611_v5, 7 }
 0x18f   : > { %2083 = vrot.lane.b32.xlu1 %v1900_v53, %s7023_s21  ;;  %v3614_v9 = vshll.u32 %v7928_v30, 16  ;;  %v2180_v61 = vld [vmem:[#allocation2 + $0x40] sm:$0x8]  ;;  %v1518_v0 = vpop.permute.xlu0 %1517  ;;  %v2719_v27 = vld [vmem:[#allocation2 + $0xbc] sm:$0xf]  ;;  %v7958_v13 = vrot.slane %v3404_v1, 7  ;;  %v3441_v41 = vsel %vm7411_vm12, %v3433_v47, %v3440_v59 }
 0x190   : > { %v3407_v7 = vshll.u32 %v3332_v58, 16  ;;  %v7960_v16 = vrot.slane %v2272_v46, 7  ;;  %v2275_v35 = vshll.u32 %v2181_v48, 16  ;;  %v7962_v54 = vpop.permute.xlu1 %3950  ;;  %1596 = vst.msk [vmem:[#allocation3 + $0xd8] sm:$0xf] %vm1577_vm13, %v1518_v0  ;;  %v3399_v23 = vshrl.u32 %v3331_v3, 16 }
 0x191   : > { %9682 = vst [vmem:[#allocation7_spill] sm:$0xff] %v7962_v54  ;;  %v1622_v43 = vld [vmem:[#allocation2 + $0x58] sm:$0xf]  ;;  %2751 = vst.msk [vmem:[#allocation3 + $0xc4] sm:$0xf] %vm692_vm0, %v2719_v27  ;;  %v2267_v51 = vshrl.u32 %v2180_v61, 16  ;;  %v2894_v8 = vor.u32 %v2893_v32, %v2890_v42  ;;  %v2309_v37 = vsel %vm7411_vm12, %v2301_v17, %v2308_v56  ;;  %v3616_v26 = vor.u32 %v3614_v9, %v3613_v14 }
 0x192   : > { %v963_v6 = vld [vmem:[#allocation2 + $0x54] sm:$0x8]  ;;  %3936 = vrot.lane.b32.xlu0 %v3864_v49, %s7024_s15  ;;  %v2897_v10 = vshll.u32 %v7952_v45, 16  ;;  %v7970_v60 = vld [vmem:[#allocation2 + $0x48] sm:$0xf]  ;;  %v3609_v62 = vrot.slane %v7912_v24, 4  ;;  %v3409_v30 = vor.u32 %v3407_v7, %v7958_v13  ;;  %v2277_v2 = vor.u32 %v2275_v35, %v7960_v16  ;;  %v6719_v24 = vpop.f32.mrf.mxu1 }
 0x193   : > { %v964_v52 = vld [vmem:[#allocation2 + $0x58] sm:$0xf]  ;;  %3738 = vrot.lane.b32.xlu1 %v3441_v41, %s7023_s21  ;;  %v1429_v19 = vld [vmem:[#allocation2 + $0x80] sm:$0xf]  ;;  %v1758_v20 = vshrl.u32 %v1622_v43, 16  ;;  %v1761_v55 = vshll.u32 %v1622_v43, 16 }
 0x194   : > { %v1520_v57 = vpop.permute.xlu1 %1519  ;;  %v1090_v34 = vshrl.u32 %v963_v6, 16  ;;  %v2704_v31 = vld [vmem:[#allocation2 + $0x20] sm:$0xf]  ;;  %v6111_v40 = vrot.slane %v3399_v23, 11  ;;  %v3413_v58 = vshrl.u32 %v7970_v60, 16  ;;  %v1095_v12 = vshrl.u32 %v964_v52, 16  ;;  %v607_v56 = vpop.f32.mrf.mxu1 }
 0x195   : > { %1597 = vst.msk [vmem:[#allocation3 + $0xe4] sm:$0xf] %vm1577_vm13, %v1520_v57  ;;  %v7980_v48 = vld [vmem:[#allocation2 + $0x48] sm:$0xf]  ;;  %v1098_v33 = vshll.u32 %v964_v52, 16  ;;  %v6096_v4 = vrot.slane %v2267_v51, 11  ;;  %v3617_v9 = vsel %vm7411_vm12, %v3609_v62, %v3616_v26 }
 0x196   : > { %2736 = vst.msk [vmem:[#allocation3 + $0x10] sm:$0xf] %vm692_vm0, %v2704_v31  ;;  %1505 = vrot.lane.b32.xlu0 %v1429_v19, %s7022_s20  ;;  %v7984_v11 = vrot.slane %v2894_v8, 4  ;;  %v7986_v18 = vrot.slane %v2897_v10, 5  ;;  %v2901_v36 = vshrl.u32 %v7952_v45, 16  ;;  %v1760_v1 = vrot.slane %v1758_v20, 4 }
 0x197   : > { %v1623_v5 = vld [vmem:[#allocation2 + $0x5c] sm:$0xf]  ;;  %2588 = vrot.lane.b32.xlu1 %v2309_v37, %s7024_s15  ;;  %v1763_v63 = vrot.slane %v1761_v55, 5  ;;  %v6082_v46 = vrot.slane %v1090_v34, 11  ;;  %v7990_v53 = vrot.slane %v1095_v12, 7  ;;  %v3416_v29 = vshll.u32 %v7970_v60, 16 }
 0x198   : > { %v2281_v47 = vshrl.u32 %v7980_v48, 16  ;;  %v7997_v49 = vld [vmem:[%s9668_s4] ss:$0 sm:$0xff]  ;;  %v3410_v45 = vsel %vm7411_vm12, %v6111_v40, %v3409_v30  ;;  %v3415_v17 = vrot.slane %v3413_v58, 7  ;;  %v1767_v3 = vshll.u32 %v1623_v5, 16 }
 0x199   : > { %v8000_v59 = vadd.f32 %v7997_v49, %v6719_v24  ;;  %v8004_v42 = vld [vmem:[#allocation2 + $0xe4] sm:$0xf]  ;;  %v1100_v32 = vor.u32 %v1098_v33, %v7990_v53  ;;  %v2720_v14 = vld [vmem:[#allocation2 + $0xc0] sm:$0xf]  ;;  %v3411_v61 = vrot.slane %v7958_v13, 4  ;;  %v2903_v0 = vrot.slane %v2901_v36, 4 }
 0x19a   : > { %3732 = vrot.lane.b32.xlu0 %v3410_v45, %s7023_s21  ;;  %v965_v27 = vld [vmem:[#allocation2 + $0x5c] sm:$0xf]  ;;  %v8012_v7 = vadd.f32 %v7997_v49, %v607_v56  ;;  %2752 = vst.msk [vmem:[#allocation3 + $0xd0] sm:$0xf] %vm692_vm0, %v2720_v14  ;;  %v2278_v35 = vsel %vm7411_vm12, %v6096_v4, %v2277_v2  ;;  %v2900_v43 = vsel %vm7173_vm6, %v7984_v11, %v7986_v18  ;;  %v2778_v6 = vld [vmem:[#allocation2 + $0x60] sm:$0x1] }
 0x19b   : > { %3770 = vrot.lane.b32.xlu1 %v3617_v9, %s7023_s21  ;;  %v1764_v23 = vor.u32 %v1763_v63, %v1760_v1  ;;  %v8022_v13 = vld [vmem:[#allocation2 + $0xe4] sm:$0xf]  ;;  %v1101_v41 = vsel %vm7411_vm12, %v6082_v46, %v1100_v32  ;;  %v1771_v8 = vshrl.u32 %v1623_v5, 16  ;;  %v2283_v10 = vrot.slane %v2281_v47, 7  ;;  %v2800_v62 = vld [vmem:[#allocation2 + $0xf8] sm:$0xf]  ;;  %v6720_v9 = vpop.f32.mrf.mxu1 }
 0x19c   : > { %v3865_v51 = vld [vmem:[#allocation2 + $0x84] sm:$0xf]  ;;  %v2284_v60 = vshll.u32 %v7980_v48, 16  ;;  %v3580_v52 = vshrl.u32 %v8004_v42, 16  ;;  %1393 = vst.msk [vmem:[#allocation3 + $0x60] sm:$0xf] %vm692_vm0, %v1101_v41  ;;  %v3418_v37 = vor.u32 %v3416_v29, %v3415_v17  ;;  %v2904_v2 = vor.u32 %v2903_v0, %v7986_v18 }
 0x19d   : > { %v8029_v19 = vrot.slane %v1767_v3, 5  ;;  %v1104_v20 = vshrl.u32 %v965_v27, 16  ;;  %v1107_v55 = vshll.u32 %v965_v27, 16  ;;  %v2279_v26 = vrot.slane %v7960_v16, 4  ;;  %v3355_v30 = vld [vmem:[#allocation2 + $0xe0] sm:$0x8] }
 0x19e   : > { %2582 = vrot.lane.b32.xlu0 %v2278_v35, %s7024_s15  ;;  %v2907_v57 = vshll.u32 %v2778_v6, 16  ;;  %v2448_v34 = vshrl.u32 %v8022_v13, 16  ;;  %v1765_v31 = vrot.slane %v1764_v23, 4  ;;  %v3583_v40 = vshll.u32 %v8004_v42, 16  ;;  %v1624_v58 = vld [vmem:[#allocation2 + $0x60] sm:$0x1]  ;;  %v3729_v46 = vpop.permute.xlu0 %3728 }
 0x19f   : > { %3938 = vrot.lane.b32.xlu1 %v3865_v51, %s7024_s15  ;;  %v1102_v48 = vrot.slane %v7990_v53, 4  ;;  %v1106_v12 = vrot.slane %v1104_v20, 7  ;;  %v2286_v33 = vor.u32 %v2284_v60, %v2283_v10  ;;  %v8038_v24 = vrot.slane %v3580_v52, 7  ;;  %v2801_v11 = vld [vmem:[#allocation2 + $0xfc] sm:$0xf] }
 0x1a0   : > { %v2451_v16 = vshll.u32 %v8022_v13, 16  ;;  %v8041_v4 = vrot.slane %v1771_v8, 4  ;;  %v1430_v18 = vld [vmem:[#allocation2 + $0x84] sm:$0xf]  ;;  %v3575_v36 = vshrl.u32 %v3355_v30, 16  ;;  %v3080_v5 = vshrl.u32 %v2800_v62, 16  ;;  %v610_v30 = vpop.f32.mrf.mxu1 }
 0x1a1   : > { %v3083_v1 = vshll.u32 %v2800_v62, 16  ;;  %v1109_v63 = vor.u32 %v1107_v55, %v1106_v12  ;;  %v8044_v29 = vrot.slane %v2904_v2, 4  ;;  %v8046_v53 = vrot.slane %v2907_v57, 5  ;;  %v2204_v47 = vld [vmem:[#allocation2 + $0xe0] sm:$0x8] }
 0x1a2   : > { %3211 = vrot.lane.b32.xlu0 %v2900_v43, %s7022_s20  ;;  %v8048_v45 = vrot.slane %v2448_v34, 7  ;;  %v1777_v17 = vshll.u32 %v1624_v58, 16  ;;  %v3419_v3 = vsel %vm7411_vm12, %v3411_v61, %v3418_v37  ;;  %v1770_v42 = vsel %vm7173_vm6, %v1765_v31, %v8029_v19  ;;  %v8056_v56 = vld [vmem:[#allocation2 + $0xe8] sm:$0xf]  ;;  %v2773_v23 = vld [vmem:[#allocation2 + $0x44] sm:$0xf] }
 0x1a3   : > { %1507 = vrot.lane.b32.xlu1 %v1430_v18, %s7022_s20  ;;  %v3089_v32 = vshll.u32 %v2801_v11, 16  ;;  %v1110_v14 = vsel %vm7411_vm12, %v1102_v48, %v1109_v63  ;;  %v2287_v0 = vsel %vm7411_vm12, %v2279_v26, %v2286_v33  ;;  %v3585_v27 = vor.u32 %v3583_v40, %v8038_v24  ;;  %v8065_v43 = vld [vmem:[#allocation2 + $0xe8] sm:$0xf]  ;;  %v726_v8 = vld [vmem:[#allocation2 + $0x7c] sm:$0x8] }
 0x1a4   : > { %v1774_v35 = vor.u32 %v8041_v4, %v8029_v19  ;;  %v3093_v61 = vshrl.u32 %v2801_v11, 16  ;;  %1394 = vst.msk [vmem:[#allocation3 + $0x6c] sm:$0xf] %vm692_vm0, %v1110_v14  ;;  %v6119_v6 = vrot.slane %v3575_v36, 11  ;;  %v2443_v13 = vshrl.u32 %v2204_v47, 16 }
 0x1a5   : > { %v3082_v41 = vrot.slane %v3080_v5, 4  ;;  %v3085_v51 = vrot.slane %v3083_v1, 5  ;;  %v2910_v10 = vsel %vm7173_vm6, %v8044_v29, %v8046_v53  ;;  %v2453_v60 = vor.u32 %v2451_v16, %v8048_v45  ;;  %v2802_v20 = vld [vmem:[#allocation2 + $0x100] sm:$0x1]  ;;  %v2709_v58 = vld [vmem:[#allocation2 + $0x58] sm:$0xf] }
 0x1a6   : > { %2061 = vrot.lane.b32.xlu0 %v1770_v42, %s7023_s21  ;;  %v8074_v52 = vrot.slane %v1777_v17, 5  ;;  %v3589_v37 = vshrl.u32 %v8056_v56, 16  ;;  %v8078_v19 = vrot.slane %v3089_v32, 5  ;;  %v2457_v62 = vshrl.u32 %v8065_v43, 16  ;;  %2741 = vst.msk [vmem:[#allocation3 + $0x4c] sm:$0xf] %vm692_vm0, %v2709_v58 }
 0x1a7   : > { %3734 = vrot.lane.b32.xlu1 %v3419_v3, %s7023_s21  ;;  %v664_v55 = vmax.f32 %v8000_v59, 0.0  ;;  %v619_v26 = vadd.f32 %v7997_v49, %v6720_v9  ;;  %v3095_v57 = vrot.slane %v3093_v61, 4  ;;  %v2864_v34 = vshrl.u32 %v2773_v23, 16  ;;  %v8098_v29 = vld [vmem:[#allocation2 + $0x48] sm:$0xf] }
 0x1a8   : > { %v8083_v2 = vpop.permute.xlu0 %2578  ;;  %v2867_v31 = vshll.u32 %v2773_v23, 16  ;;  %v727_v40 = vsel %vm7185_vm9, 0, %v726_v8  ;;  %v3586_v12 = vsel %vm7411_vm12, %v6119_v6, %v3585_v27  ;;  %v6104_v33 = vrot.slane %v2443_v13, 11  ;;  %v1619_v14 = vld [vmem:[#allocation2 + $0x44] sm:$0xf] }
 0x1a9   : > { %v3200_v48 = vpop.permute.xlu1 %3199  ;;  %v3086_v16 = vor.u32 %v3085_v51, %v3082_v41  ;;  %v6292_v4 = vpack.c.bf16 %v664_v55, %v664_v55  ;;  %728 = vst [vmem:[#allocation2 + $0x7c] sm:$0x8] %v727_v40  ;;  %v3591_v59 = vrot.slane %v3589_v37, 7  ;;  %v3592_v11 = vshll.u32 %v8056_v56, 16  ;;  %v2797_v13 = vld [vmem:[#allocation2 + $0xe4] sm:$0xf] }
 0x1aa   : > { %3295 = vst.msk [vmem:[#allocation3 + $0x4] sm:$0xf] %vm1577_vm13, %v3200_v48  ;;  %3764 = vrot.lane.b32.xlu0 %v3586_v12, %s7023_s21  ;;  %v662_v18 = vmax.f32 %v8012_v7, 0.0  ;;  %v611_v36 = vadd.f32 %v7997_v49, %v610_v30  ;;  %v2459_v5 = vrot.slane %v2457_v62, 7  ;;  %v2460_v1 = vshll.u32 %v8065_v43, 16 }
 0x1ab   : > { %3824 = vst.msk [vmem:[#allocation3 + $0x4] sm:$0xf] %vm2141_vm14, %v3729_v46  ;;  %2584 = vrot.lane.b32.xlu1 %v2287_v0, %s7024_s15  ;;  %v3099_v63 = vshll.u32 %v2802_v20, 16  ;;  %v665_v53 = vmax.f32 %v619_v26, 0.0  ;;  %v3096_v49 = vor.u32 %v3095_v57, %v8078_v19  ;;  %v2866_v7 = vrot.slane %v2864_v34, 4 }
 0x1ac   : > { %945 = vst.msk [vmem:[#allocation2 + $0x120] sm:$0xf] %vm692_vm0, %v6292_v4  ;;  %v8103_v47 = vpop.permute.xlu0 %3760  ;;  %v2869_v46 = vrot.slane %v2867_v31, 5  ;;  %v6290_v17 = vpack.c.bf16 %v662_v18, %v662_v18  ;;  %v2454_v42 = vsel %vm7411_vm12, %v6104_v33, %v2453_v60  ;;  %v1775_v32 = vrot.slane %v1774_v35, 4  ;;  %v2710_v43 = vld [vmem:[#allocation2 + $0x5c] sm:$0xf] }
 0x1ad   : > { %4016 = vst.msk [vmem:[#allocation3 + $0x4] sm:$0xf] %vm2670_vm15, %v7803_v22  ;;  %v8106_v3 = vpop.permute.xlu1 %3730  ;;  %v3087_v56 = vrot.slane %v3086_v16, 4  ;;  %v6293_v9 = vpack.c.bf16 %v665_v53, %v665_v53  ;;  %v3587_v22 = vrot.slane %v8038_v24, 4  ;;  %v3594_v0 = vor.u32 %v3592_v11, %v3591_v59  ;;  %v8124_v8 = vld [vmem:[#allocation2 + $0x48] sm:$0xf] }
 0x1ae   : > { %2614 = vrot.lane.b32.xlu0 %v2454_v42, %s7024_s15  ;;  %v2873_v27 = vshll.u32 %v8098_v29, 16  ;;  %943 = vst.msk [vmem:[#allocation2 + $0x10c] sm:$0xf] %vm692_vm0, %v6290_v17  ;;  %v663_v61 = vmax.f32 %v611_v36, 0.0  ;;  %v2455_v23 = vrot.slane %v8048_v45, 4  ;;  %v2462_v6 = vor.u32 %v2460_v1, %v2459_v5 }
 0x1af   : > { %3213 = vrot.lane.b32.xlu1 %v2910_v10, %s7022_s20  ;;  %v8116_v35 = vrot.slane %v3099_v63, 5  ;;  %946 = vst.msk [vmem:[#allocation2 + $0x124] sm:$0xf] %vm692_vm0, %v6293_v9  ;;  %2742 = vst.msk [vmem:[#allocation3 + $0x58] sm:$0xf] %vm692_vm0, %v2710_v43  ;;  %v8122_v41 = vrot.slane %v3096_v49, 4  ;;  %v2870_v51 = vor.u32 %v2869_v46, %v2866_v7  ;;  %v1780_v45 = vsel %vm7173_vm6, %v1775_v32, %v8074_v52 }
 0x1b0   : > { %v8120_v24 = vpop.permute.xlu0 %2610  ;;  %v1734_v60 = vshrl.u32 %v1619_v14, 16  ;;  %v6291_v37 = vpack.c.bf16 %v663_v61, %v663_v61  ;;  %v3092_v62 = vsel %vm7173_vm6, %v3087_v56, %v8078_v19  ;;  %v1737_v20 = vshll.u32 %v1619_v14, 16  ;;  %v8134_v55 = vld [vmem:[#allocation2 + $0xe8] sm:$0xf]  ;;  %v3862_v52 = vld [vmem:[#allocation2 + $0x6c] sm:$0xf] }
 0x1b1   : > { %v8126_v10 = vpop.permute.xlu1 %2580  ;;  %v3595_v26 = vsel %vm7411_vm12, %v3587_v22, %v3594_v0  ;;  %v8139_v30 = vrot.slane %v2873_v27, 5  ;;  %v3056_v57 = vshrl.u32 %v2797_v13, 16  ;;  %v3059_v34 = vshll.u32 %v2797_v13, 16  ;;  %v2725_v12 = vld [vmem:[#allocation2 + $0xf8] sm:$0xf] }
 0x1b2   : > { %3243 = vrot.lane.b32.xlu0 %v3092_v62, %s7022_s20  ;;  %944 = vst.msk [vmem:[#allocation2 + $0x110] sm:$0xf] %vm692_vm0, %v6291_v37  ;;  %v2877_v19 = vshrl.u32 %v8098_v29, 16  ;;  %v1743_v40 = vshll.u32 %v8124_v8, 16  ;;  %v2463_v16 = vsel %vm7411_vm12, %v2455_v23, %v2462_v6  ;;  %v3102_v4 = vsel %vm7173_vm6, %v8122_v41, %v8116_v35  ;;  %v1643_v18 = vld [vmem:[#allocation2 + $0xe4] sm:$0xf] }
 0x1b3   : > { %v4084_v31 = vld [vmem:[#allocation2 + $0x120] sm:$0xf]  ;;  %2063 = vrot.lane.b32.xlu1 %v1780_v45, %s7023_s21  ;;  %v2871_v59 = vrot.slane %v2870_v51, 4  ;;  %v1736_v11 = vrot.slane %v1734_v60, 4  ;;  %v723_v36 = vld [vmem:[#allocation2 + $0x68] sm:$0x8] }
 0x1b4   : > { %v4385_v58 = vshrl.u32 %v4084_v31, 16  ;;  %v4388_v48 = vshll.u32 %v4084_v31, 16  ;;  %v8145_v33 = vpop.permute.xlu0 %3928  ;;  %2757 = vst.msk [vmem:[#allocation3 + $0x10c] sm:$0xf] %vm692_vm0, %v2725_v12  ;;  %v1739_v1 = vrot.slane %v1737_v20, 5  ;;  %v3065_v63 = vshll.u32 %v8134_v55, 16 }
 0x1b5   : > { %v8154_v5 = vpop.permute.xlu1 %3762  ;;  %v4081_v49 = vld [vmem:[#allocation2 + $0x10c] sm:$0xf]  ;;  %v3058_v7 = vrot.slane %v3056_v57, 4  ;;  %v3061_v46 = vrot.slane %v3059_v34, 5  ;;  %v960_v32 = vld [vmem:[#allocation2 + $0x40] sm:$0x8] }
 0x1b6   : > { %v4387_v29 = vrot.slane %v4385_v58, 4  ;;  %v4390_v53 = vrot.slane %v4388_v48, 5  ;;  %3932 = vrot.lane.b32.xlu0 %v3862_v52, %s7024_s15  ;;  %v4361_v17 = vshrl.u32 %v4081_v49, 16  ;;  %v4364_v42 = vshll.u32 %v4081_v49, 16  ;;  %v1427_v56 = vld [vmem:[#allocation2 + $0x6c] sm:$0xf] }
 0x1b7   : > { %3766 = vrot.lane.b32.xlu1 %v3595_v26, %s7023_s21  ;;  %v8159_v14 = vrot.slane %v1743_v40, 5  ;;  %v1747_v9 = vshrl.u32 %v8124_v8, 16  ;;  %v1926_v22 = vshrl.u32 %v1643_v18, 16  ;;  %v1929_v0 = vshll.u32 %v1643_v18, 16  ;;  %v8162_v27 = vld [vmem:[#allocation2 + $0x124] sm:$0xf] }
 0x1b8   : > { %v1498_v61 = vpop.permute.xlu0 %1497  ;;  %v4391_v43 = vor.u32 %v4390_v53, %v4387_v29  ;;  %v4363_v23 = vrot.slane %v4361_v17, 4  ;;  %v4366_v6 = vrot.slane %v4364_v42, 5  ;;  %v724_v13 = vsel %vm7185_vm9, 0, %v723_v36  ;;  %v961_v51 = vld [vmem:[#allocation2 + $0x44] sm:$0xf] }
 0x1b9   : > { %v8166_v60 = vpop.permute.xlu1 %2612  ;;  %1586 = vst.msk [vmem:[#allocation3 + $0x60] sm:$0xf] %vm1577_vm13, %v1498_v61  ;;  %v2876_v8 = vsel %vm7173_vm6, %v2871_v59, %v8139_v30  ;;  %v1740_v37 = vor.u32 %v1739_v1, %v1736_v11  ;;  %v8172_v45 = vrot.slane %v3065_v63, 5  ;;  %v2775_v62 = vld [vmem:[#allocation2 + $0x4c] sm:$0x1]  ;;  %v8174_v20 = vrot.slane %v2877_v19, 4 }
 0x1ba   : > { %v8176_v26 = vld [vmem:[#allocation2 + $0x110] sm:$0xf]  ;;  %725 = vst [vmem:[#allocation2 + $0x68] sm:$0x8] %v724_v13  ;;  %1501 = vrot.lane.b32.xlu0 %v1427_v56, %s7022_s20  ;;  %v3062_v57 = vor.u32 %v3061_v46, %v3058_v7  ;;  %v8179_v34 = vld [vmem:[#allocation2 + $0xe8] sm:$0xf]  ;;  %v4367_v31 = vor.u32 %v4366_v6, %v4363_v23 }
 0x1bb   : > { %v4394_v52 = vshll.u32 %v8162_v27, 16  ;;  %v4370_v40 = vshll.u32 %v8176_v26, 16  ;;  %2616 = vrot.lane.b32.xlu1 %v2463_v16, %s7024_s15  ;;  %v1928_v58 = vrot.slane %v1926_v22, 4  ;;  %v1931_v48 = vrot.slane %v1929_v0, 5  ;;  %v8189_v49 = vld [vmem:[#allocation2 + $0x80] sm:$0xf] }
 0x1bc   : > { %v1068_v12 = vshrl.u32 %v960_v32, 16  ;;  %v1073_v19 = vshrl.u32 %v961_v51, 16  ;;  %v8184_v59 = vpop.permute.xlu0 %3960  ;;  %v2883_v11 = vshll.u32 %v2775_v62, 16  ;;  %v4392_v18 = vrot.slane %v4391_v43, 4  ;;  %v2726_v56 = vld [vmem:[#allocation2 + $0xfc] sm:$0xf] }
 0x1bd   : > { %v4368_v36 = vrot.slane %v4367_v31, 4  ;;  %v1076_v1 = vshll.u32 %v961_v51, 16  ;;  %v8186_v63 = vpop.permute.xlu1 %3930  ;;  %v1741_v29 = vrot.slane %v1740_v37, 4  ;;  %v1935_v53 = vshll.u32 %v8179_v34, 16  ;;  %v1621_v61 = vld [vmem:[#allocation2 + $0x4c] sm:$0x1] }
 0x1be   : > { %v6081_v7 = vrot.slane %v1068_v12, 11  ;;  %v8191_v46 = vrot.slane %v1073_v19, 7  ;;  %3207 = vrot.lane.b32.xlu0 %v2876_v8, %s7022_s20  ;;  %v3063_v16 = vrot.slane %v3062_v57, 4  ;;  %v8194_v17 = vrot.slane %v1747_v9, 4  ;;  %2758 = vst.msk [vmem:[#allocation3 + $0x118] sm:$0xf] %vm692_vm0, %v2726_v56 }
 0x1bf   : > { %v8196_v42 = vrot.slane %v4394_v52, 5  ;;  %v8198_v32 = vrot.slane %v4370_v40, 5  ;;  %3245 = vrot.lane.b32.xlu1 %v3102_v4, %s7022_s20  ;;  %v3069_v22 = vshrl.u32 %v8134_v55, 16  ;;  %v1932_v0 = vor.u32 %v1931_v48, %v1928_v58  ;;  %v2707_v9 = vld [vmem:[#allocation2 + $0x44] sm:$0xf] }
 0x1c0   : > { %v1078_v43 = vor.u32 %v1076_v1, %v8191_v46  ;;  %v2575_v23 = vpop.permute.xlu0 %2574  ;;  %v2880_v6 = vor.u32 %v8174_v20, %v8139_v30  ;;  %v8211_v13 = vrot.slane %v2883_v11, 5  ;;  %v8213_v51 = vld [vmem:[#allocation2 + $0x80] sm:$0xf]  ;;  %v962_v8 = vld [vmem:[#allocation2 + $0x48] sm:$0xf]  ;;  %v1746_v30 = vsel %vm7173_vm6, %v1741_v29, %v8159_v14 }
 0x1c1   : > { %v4373_v35 = vsel %vm7173_vm6, %v4368_v36, %v8198_v32  ;;  %v4397_v41 = vsel %vm7173_vm6, %v4392_v18, %v8196_v42  ;;  %2739 = vst.msk [vmem:[#allocation3 + $0x34] sm:$0xf] %vm692_vm0, %v2707_v9  ;;  %v1500_v55 = vpop.permute.xlu1 %1499  ;;  %v1939_v4 = vshrl.u32 %v8179_v34, 16  ;;  %v3470_v37 = vshrl.u32 %v8189_v49, 16  ;;  %v984_v20 = vld [vmem:[#allocation2 + $0xe0] sm:$0x8] }
 0x1c2   : > { %2671 = vst.msk [vmem:[#allocation3] sm:$0xf] %vm2670_vm15, %v2575_v23  ;;  %v1079_v62 = vsel %vm7411_vm12, %v6081_v7, %v1078_v43  ;;  %v985_v57 = vld [vmem:[#allocation2 + $0xe4] sm:$0xf]  ;;  %v3863_v31 = vld [vmem:[#allocation2 + $0x70] sm:$0xf]  ;;  %2057 = vrot.lane.b32.xlu0 %v1746_v30, %s7023_s21  ;;  %v3068_v34 = vsel %vm7173_vm6, %v3063_v16, %v8172_v45  ;;  %v1750_v40 = vor.u32 %v8194_v17, %v8159_v14 }
 0x1c3   : > { %4534 = vst.msk [vmem:[#allocation3 + $0x110] sm:$0xf] %vm692_vm0, %v4373_v35  ;;  %4536 = vst.msk [vmem:[#allocation3 + $0x128] sm:$0xf] %vm692_vm0, %v4397_v41  ;;  %v8237_v52 = vrot.slane %v1935_v53, 5  ;;  %v1753_v58 = vshll.u32 %v1621_v61, 16  ;;  %3934 = vrot.lane.b32.xlu1 %v3863_v31, %s7024_s15 }
 0x1c4   : > { %1587 = vst.msk [vmem:[#allocation3 + $0x6c] sm:$0xf] %vm1577_vm13, %v1500_v55  ;;  %v3340_v48 = vld [vmem:[#allocation2 + $0x7c] sm:$0x8]  ;;  %v1933_v12 = vrot.slane %v1932_v0, 4  ;;  %v2338_v19 = vshrl.u32 %v8213_v51, 16  ;;  %v3204_v36 = vpop.permute.xlu0 %3203 }
 0x1c5   : > { %1391 = vst.msk [vmem:[#allocation3 + $0x48] sm:$0xf] %vm692_vm0, %v1079_v62  ;;  %v1082_v11 = vshrl.u32 %v962_v8, 16  ;;  %v1085_v18 = vshll.u32 %v962_v8, 16  ;;  %v1428_v1 = vld [vmem:[#allocation2 + $0x70] sm:$0xf]  ;;  %v8245_v56 = vpop.permute.xlu1 %3962 }
 0x1c6   : > { %v3473_v29 = vshll.u32 %v8189_v49, 16  ;;  %v1244_v53 = vshrl.u32 %v984_v20, 16  ;;  %v1249_v7 = vshrl.u32 %v985_v57, 16  ;;  %v1252_v16 = vshll.u32 %v985_v57, 16  ;;  %3297 = vst.msk [vmem:[#allocation3 + $0x1c] sm:$0xf] %vm1577_vm13, %v3204_v36  ;;  %3239 = vrot.lane.b32.xlu0 %v3068_v34, %s7022_s20 }
 0x1c7   : > { %v3465_v14 = vshrl.u32 %v3340_v48, 16  ;;  %v8248_v17 = vrot.slane %v3470_v37, 7  ;;  %v8250_v61 = vld [vmem:[#allocation2 + $0xec] sm:$0x1]  ;;  %v1080_v0 = vrot.slane %v8191_v46, 4  ;;  %v1084_v43 = vrot.slane %v1082_v11, 7  ;;  %1503 = vrot.lane.b32.xlu1 %v1428_v1, %s7022_s20 }
 0x1c8   : > { %v2881_v9 = vrot.slane %v2880_v6, 4  ;;  %v3071_v23 = vrot.slane %v3069_v22, 4  ;;  %v2189_v49 = vld [vmem:[#allocation2 + $0x7c] sm:$0x8]  ;;  %v1645_v8 = vld [vmem:[#allocation2 + $0xec] sm:$0x1]  ;;  %v2054_v31 = vpop.permute.xlu0 %2053  ;;  %v1938_v22 = vsel %vm7173_vm6, %v1933_v12, %v8237_v52 }
 0x1c9   : > { %v6089_v35 = vrot.slane %v1244_v53, 11  ;;  %v8254_v41 = vrot.slane %v1249_v7, 7  ;;  %v1751_v55 = vrot.slane %v1750_v40, 4  ;;  %v1755_v30 = vrot.slane %v1753_v58, 5  ;;  %v8259_v62 = vld [vmem:[#allocation2 + $0x84] sm:$0xf]  ;;  %v2577_v40 = vpop.permute.xlu1 %2576 }
 0x1ca   : > { %v8257_v37 = vrot.slane %v2338_v19, 7  ;;  %v8261_v20 = vld [vmem:[#allocation2 + $0x84] sm:$0xf]  ;;  %v1087_v46 = vor.u32 %v1085_v18, %v1084_v43  ;;  %v747_v57 = vld [vmem:[#allocation2 + $0x108] sm:$0x8]  ;;  %v2341_v6 = vshll.u32 %v8213_v51, 16  ;;  %v3475_v19 = vor.u32 %v3473_v29, %v8248_v17  ;;  %2089 = vrot.lane.b32.xlu0 %v1938_v22, %s7023_s21 }
 0x1cb   : > { %v1941_v34 = vrot.slane %v1939_v4, 4  ;;  %v1254_v48 = vor.u32 %v1252_v16, %v8254_v41  ;;  %2146 = vst.msk [vmem:[#allocation3 + $0x30] sm:$0xf] %vm2141_vm14, %v2054_v31  ;;  %v6114_v58 = vrot.slane %v3465_v14, 11  ;;  %v2333_v11 = vshrl.u32 %v2189_v49, 16 }
 0x1cc   : > { %v1088_v18 = vsel %vm7411_vm12, %v1080_v0, %v1087_v46  ;;  %v2723_v36 = vld [vmem:[#allocation2 + $0xe4] sm:$0xf]  ;;  %2672 = vst.msk [vmem:[#allocation3 + $0xc] sm:$0xf] %vm2670_vm15, %v2577_v40  ;;  %v2886_v51 = vsel %vm7173_vm6, %v2881_v9, %v8211_v13  ;;  %v3072_v4 = vor.u32 %v3071_v23, %v8172_v45  ;;  %v3075_v12 = vshll.u32 %v8250_v61, 16  ;;  %v8291_v61 = vpop.permute.xlu0 %3756 }
 0x1cd   : > { %1392 = vst.msk [vmem:[#allocation3 + $0x54] sm:$0xf] %vm692_vm0, %v1088_v18  ;;  %v1255_v1 = vsel %vm7411_vm12, %v6089_v35, %v1254_v48  ;;  %v986_v29 = vld [vmem:[#allocation2 + $0xe8] sm:$0xf]  ;;  %2755 = vst.msk [vmem:[#allocation3 + $0xf4] sm:$0xf] %vm692_vm0, %v2723_v36  ;;  %3209 = vrot.lane.b32.xlu1 %v2886_v51, %s7022_s20  ;;  %v1756_v13 = vsel %vm7173_vm6, %v1751_v55, %v1755_v30  ;;  %v2343_v0 = vor.u32 %v2341_v6, %v8257_v37 }
 0x1ce   : > { %v2708_v53 = vld [vmem:[#allocation2 + $0x48] sm:$0xf]  ;;  %v4374_v7 = vshrl.u32 %v8176_v26, 16  ;;  %v1945_v16 = vshll.u32 %v1645_v8, 16  ;;  %1407 = vst.msk [vmem:[#allocation3 + $0x108] sm:$0xf] %vm692_vm0, %v1255_v1  ;;  %v1942_v43 = vor.u32 %v1941_v34, %v8237_v52  ;;  %v3206_v26 = vpop.permute.xlu1 %3205  ;;  %v3476_v49 = vsel %vm7411_vm12, %v6114_v58, %v3475_v19 }
 0x1cf   : > { %v748_v45 = vsel %vm7185_vm9, 0, %v747_v57  ;;  %v795_v14 = vld [vmem:[#allocation2 + $0x114] sm:$0x1]  ;;  %2740 = vst.msk [vmem:[#allocation3 + $0x40] sm:$0xf] %vm692_vm0, %v2708_v53  ;;  %v3479_v9 = vshrl.u32 %v8259_v62, 16  ;;  %3744 = vrot.lane.b32.xlu0 %v3476_v49, %s7023_s21 }
 0x1d0   : > { %v2347_v23 = vshrl.u32 %v8261_v20, 16  ;;  %749 = vst [vmem:[#allocation2 + $0x108] sm:$0x8] %v748_v45  ;;  %v6099_v8 = vrot.slane %v2333_v11, 11  ;;  %v8299_v35 = vld [vmem:[#allocation2 + $0x6c] sm:$0xf]  ;;  %v8310_v19 = vpop.permute.xlu0 %2606 }
 0x1d1   : > { %v1258_v55 = vshrl.u32 %v986_v29, 16  ;;  %v1261_v30 = vshll.u32 %v986_v29, 16  ;;  %3298 = vst.msk [vmem:[#allocation3 + $0x28] sm:$0xf] %vm1577_vm13, %v3206_v26  ;;  %v3073_v46 = vrot.slane %v3072_v4, 4  ;;  %v3077_v52 = vrot.slane %v3075_v12, 5  ;;  %2059 = vrot.lane.b32.xlu1 %v1756_v13, %s7023_s21 }
 0x1d2   : > { %v3482_v57 = vshll.u32 %v8259_v62, 16  ;;  %v8304_v31 = vld [vmem:[#allocation2 + $0x6c] sm:$0xf]  ;;  %v796_v22 = vsel %vm7164_vm3, 0, %v795_v14  ;;  %v4376_v6 = vrot.slane %v4374_v7, 4  ;;  %v1947_v34 = vrot.slane %v1945_v16, 5  ;;  %v2056_v4 = vpop.permute.xlu1 %2055 }
 0x1d3   : > { %v1256_v48 = vrot.slane %v8254_v41, 4  ;;  %v1260_v40 = vrot.slane %v1258_v55, 7  ;;  %797 = vst [vmem:[#allocation2 + $0x114] sm:$0x1] %v796_v22  ;;  %v2724_v58 = vld [vmem:[#allocation2 + $0xe8] sm:$0xf]  ;;  %v2344_v12 = vsel %vm7411_vm12, %v6099_v8, %v2343_v0 }
 0x1d4   : > { %v4398_v11 = vshrl.u32 %v8162_v27, 16  ;;  %v1943_v18 = vrot.slane %v1942_v43, 4  ;;  %v3481_v62 = vrot.slane %v3479_v9, 7  ;;  %v3448_v36 = vshrl.u32 %v8299_v35, 16  ;;  %v2782_v51 = vld [vmem:[#allocation2 + $0x80] sm:$0xf]  ;;  %2594 = vrot.lane.b32.xlu0 %v2344_v12, %s7024_s15  ;;  %v3236_v26 = vpop.permute.xlu0 %3235 }
 0x1d5   : > { %2756 = vst.msk [vmem:[#allocation3 + $0x100] sm:$0xf] %vm692_vm0, %v2724_v58  ;;  %v2349_v1 = vrot.slane %v2347_v23, 7  ;;  %v2350_v41 = vshll.u32 %v8261_v20, 16  ;;  %v3337_v29 = vld [vmem:[#allocation2 + $0x68] sm:$0x8]  ;;  %v1263_v53 = vor.u32 %v1261_v30, %v1260_v40  ;;  %v3078_v27 = vsel %vm7173_vm6, %v3073_v46, %v3077_v52 }
 0x1d6   : > { %2147 = vst.msk [vmem:[#allocation3 + $0x3c] sm:$0xf] %vm2141_vm14, %v2056_v4  ;;  %v3868_v13 = vld [vmem:[#allocation2 + $0xa8] sm:$0xf]  ;;  %v3477_v7 = vrot.slane %v8248_v17, 4  ;;  %v2316_v16 = vshrl.u32 %v8304_v31, 16  ;;  %3241 = vrot.lane.b32.xlu1 %v3078_v27, %s7022_s20  ;;  %v4377_v45 = vor.u32 %v4376_v6, %v8198_v32  ;;  %v8332_v55 = vpop.permute.xlu1 %3758  ;;  %v1948_v32 = vsel %vm7173_vm6, %v1943_v18, %v1947_v34 }
 0x1d7   : > { %v2186_v14 = vld [vmem:[#allocation2 + $0x68] sm:$0x8]  ;;  %v2936_v20 = vshrl.u32 %v2782_v51, 16  ;;  %v2939_v0 = vshll.u32 %v2782_v51, 16  ;;  %v1264_v43 = vsel %vm7411_vm12, %v1256_v48, %v1263_v53  ;;  %v798_v9 = vld [vmem:[#allocation2 + $0x128] sm:$0x1]  ;;  %v3484_v30 = vor.u32 %v3482_v57, %v3481_v62 }
 0x1d8   : > { %v4400_v23 = vrot.slane %v4398_v11, 4  ;;  %v3443_v49 = vshrl.u32 %v3337_v29, 16  ;;  %v8328_v8 = vrot.slane %v3448_v36, 7  ;;  %v3451_v17 = vshll.u32 %v8299_v35, 16  ;;  %1408 = vst.msk [vmem:[#allocation3 + $0x114] sm:$0xf] %vm692_vm0, %v1264_v43  ;;  %3944 = vrot.lane.b32.xlu0 %v3868_v13, %s7024_s15  ;;  %v2086_v4 = vpop.permute.xlu0 %2085 }
 0x1d9   : > { %9683 = vst [vmem:[#allocation8_spill] sm:$0xff] %v8332_v55  ;;  %3313 = vst.msk [vmem:[#allocation3 + $0xdc] sm:$0xf] %vm1577_vm13, %v3236_v26  ;;  %v1433_v46 = vld [vmem:[#allocation2 + $0xa8] sm:$0xf]  ;;  %v2345_v52 = vrot.slane %v8257_v37, 4  ;;  %v2352_v22 = vor.u32 %v2350_v41, %v2349_v1  ;;  %v3485_v29 = vsel %vm7411_vm12, %v3477_v7, %v3484_v30 }
 0x1da   : > { %v8338_v6 = vld [vmem:[#allocation2 + $0x84] sm:$0xf]  ;;  %v1628_v48 = vld [vmem:[#allocation2 + $0x80] sm:$0xf]  ;;  %v2311_v35 = vshrl.u32 %v2186_v14, 16  ;;  %v8341_v40 = vrot.slane %v2316_v16, 7  ;;  %2091 = vrot.lane.b32.xlu1 %v1948_v32, %s7023_s21  ;;  %v4401_v51 = vor.u32 %v4400_v23, %v8196_v42  ;;  %v3453_v1 = vor.u32 %v3451_v17, %v8328_v8 }
 0x1db   : > { %v2319_v58 = vshll.u32 %v8304_v31, 16  ;;  %v4083_v11 = vld [vmem:[#allocation2 + $0x114] sm:$0x1]  ;;  %v799_v36 = vsel %vm7164_vm3, 0, %v798_v9  ;;  %v4378_v34 = vrot.slane %v4377_v45, 4  ;;  %v2938_v57 = vrot.slane %v2936_v20, 4  ;;  %v8351_v31 = vpop.permute.xlu1 %2608 }
 0x1dc   : > { %v2941_v37 = vrot.slane %v2939_v0, 5  ;;  %v4380_v18 = vshll.u32 %v4083_v11, 16  ;;  %800 = vst [vmem:[#allocation2 + $0x128] sm:$0x1] %v799_v36  ;;  %v732_v62 = vld [vmem:[#allocation2 + $0xa4] sm:$0x8]  ;;  %1513 = vrot.lane.b32.xlu0 %v1433_v46, %s7022_s20  ;;  %v2353_v7 = vsel %vm7411_vm12, %v2345_v52, %v2352_v22  ;;  %v8372_v32 = vpop.permute.xlu0 %3924 }
 0x1dd   : > { %v6113_v12 = vrot.slane %v3443_v49, 11  ;;  %v8349_v41 = vld [vmem:[#allocation2 + $0x70] sm:$0xf]  ;;  %9684 = vst [vmem:[#allocation9_spill] sm:$0xff] %v8351_v31  ;;  %2162 = vst.msk [vmem:[#allocation3 + $0xf0] sm:$0xf] %vm2141_vm14, %v2086_v4  ;;  %v2321_v45 = vor.u32 %v2319_v58, %v8341_v40 }
 0x1de   : > { %v1806_v53 = vshrl.u32 %v1628_v48, 16  ;;  %v1809_v27 = vshll.u32 %v1628_v48, 16  ;;  %v4382_v13 = vrot.slane %v4380_v18, 5  ;;  %v970_v16 = vld [vmem:[#allocation2 + $0x80] sm:$0xf]  ;;  %v6098_v42 = vrot.slane %v2311_v35, 11  ;;  %3746 = vrot.lane.b32.xlu1 %v3485_v29, %s7023_s21 }
 0x1df   : > { %v2945_v14 = vshll.u32 %v8338_v6, 16  ;;  %v733_v20 = vsel %vm7185_vm9, 0, %v732_v62  ;;  %v969_v0 = vld [vmem:[#allocation2 + $0x7c] sm:$0x8]  ;;  %v2942_v43 = vor.u32 %v2941_v37, %v2938_v57  ;;  %v8364_v9 = vld [vmem:[#allocation2 + $0x84] sm:$0xf]  ;;  %v3454_v30 = vsel %vm7411_vm12, %v6113_v12, %v3453_v1  ;;  %v3238_v48 = vpop.permute.xlu1 %3237 }
 0x1e0   : > { %v8366_v23 = vld [vmem:[#allocation2 + $0x70] sm:$0xf]  ;;  %v8368_v26 = vld [vmem:[#allocation2 + $0x10c] sm:$0xf]  ;;  %v4383_v49 = vsel %vm7173_vm6, %v4378_v34, %v4382_v13  ;;  %734 = vst [vmem:[#allocation2 + $0xa4] sm:$0x8] %v733_v20  ;;  %3740 = vrot.lane.b32.xlu0 %v3454_v30, %s7023_s21  ;;  %v1494_v29 = vpop.permute.xlu0 %1493 }
 0x1e1   : > { %v4402_v17 = vrot.slane %v4401_v51, 4  ;;  %v2949_v46 = vshrl.u32 %v8338_v6, 16  ;;  %v3457_v52 = vshrl.u32 %v8349_v41, 16  ;;  %4535 = vst.msk [vmem:[#allocation3 + $0x11c] sm:$0xf] %vm692_vm0, %v4383_v49  ;;  %v1808_v35 = vrot.slane %v1806_v53, 4 }
 0x1e2   : > { %v2713_v22 = vld [vmem:[#allocation2 + $0x80] sm:$0xf]  ;;  %v1811_v58 = vrot.slane %v1809_v27, 5  ;;  %v1134_v11 = vshrl.u32 %v969_v0, 16  ;;  %v1139_v36 = vshrl.u32 %v970_v16, 16  ;;  %v2322_v6 = vsel %vm7411_vm12, %v6098_v42, %v2321_v45  ;;  %2596 = vrot.lane.b32.xlu1 %v2353_v7, %s7024_s15 }
 0x1e3   : > { %v729_v34 = vld [vmem:[#allocation2 + $0x90] sm:$0x8]  ;;  %2745 = vst.msk [vmem:[#allocation3 + $0x7c] sm:$0xf] %vm692_vm0, %v2713_v22  ;;  %v8384_v57 = vrot.slane %v2945_v14, 5  ;;  %v2325_v37 = vshrl.u32 %v8366_v23, 16  ;;  %v2088_v20 = vpop.permute.xlu1 %2087 }
 0x1e4   : > { %3314 = vst.msk [vmem:[#allocation3 + $0xe8] sm:$0xf] %vm1577_vm13, %v3238_v48  ;;  %v4086_v18 = vld [vmem:[#allocation2 + $0x128] sm:$0x1]  ;;  %v1142_v62 = vshll.u32 %v970_v16, 16  ;;  %v2943_v51 = vrot.slane %v2942_v43, 4  ;;  %v1812_v16 = vor.u32 %v1811_v58, %v1808_v35  ;;  %2590 = vrot.lane.b32.xlu0 %v2322_v6, %s7024_s15 }
 0x1e5   : > { %v3460_v4 = vshll.u32 %v8349_v41, 16  ;;  %v3624_v12 = vshrl.u32 %v8368_v26, 16  ;;  %v4404_v1 = vshll.u32 %v4086_v18, 16  ;;  %v3869_v53 = vld [vmem:[#allocation2 + $0xac] sm:$0xf]  ;;  %v3459_v27 = vrot.slane %v3457_v52, 7 }
 0x1e6   : > { %v1815_v13 = vshll.u32 %v8364_v9, 16  ;;  %v3361_v42 = vld [vmem:[#allocation2 + $0x108] sm:$0x8]  ;;  %v6084_v45 = vrot.slane %v1134_v11, 11  ;;  %v8391_v14 = vrot.slane %v1139_v36, 7  ;;  %v1819_v0 = vshrl.u32 %v8364_v9, 16  ;;  %3946 = vrot.lane.b32.xlu1 %v3869_v53, %s7024_s15  ;;  %v8407_v36 = vpop.permute.xlu0 %3956 }
 0x1e7   : > { %1584 = vst.msk [vmem:[#allocation3 + $0x48] sm:$0xf] %vm1577_vm13, %v1494_v29  ;;  %v2784_v7 = vld [vmem:[#allocation2 + $0x88] sm:$0x1]  ;;  %v4406_v41 = vrot.slane %v4404_v1, 5  ;;  %v730_v43 = vsel %vm7185_vm9, 0, %v729_v34  ;;  %v8413_v6 = vpop.permute.xlu1 %3926  ;;  %v2948_v18 = vsel %vm7173_vm6, %v2943_v51, %v8384_v57 }
 0x1e8   : > { %2163 = vst.msk [vmem:[#allocation3 + $0xfc] sm:$0xf] %vm2141_vm14, %v2088_v20  ;;  %v2327_v49 = vrot.slane %v2325_v37, 7  ;;  %v2328_v30 = vshll.u32 %v8366_v23, 16  ;;  %v3627_v52 = vshll.u32 %v8368_v26, 16  ;;  %v1144_v48 = vor.u32 %v1142_v62, %v8391_v14  ;;  %3219 = vrot.lane.b32.xlu0 %v2948_v18, %s7022_s20 }
 0x1e9   : > { %v2779_v22 = vld [vmem:[#allocation2 + $0x6c] sm:$0xf]  ;;  %731 = vst [vmem:[#allocation2 + $0x90] sm:$0x8] %v730_v43  ;;  %v3619_v9 = vshrl.u32 %v3361_v42, 16  ;;  %v8403_v35 = vrot.slane %v3624_v12, 7  ;;  %v4407_v11 = vsel %vm7173_vm6, %v4402_v17, %v4406_v41  ;;  %v3462_v62 = vor.u32 %v3460_v4, %v3459_v27 }
 0x1ea   : > { %v6905_v58 = vld [vmem:[#allocation3 + $0x110] ss:$12 sps:$4 sm:$0xff]   ;;  %v3455_v34 = vrot.slane %v8328_v8, 4  ;;  %v2951_v23 = vrot.slane %v2949_v46, 4  ;;  %4537 = vst.msk [vmem:[#allocation3 + $0x134] sm:$0xf] %vm692_vm0, %v4407_v11  ;;  %v1145_v26 = vsel %vm7411_vm12, %v6084_v45, %v1144_v48  ;;  %v2330_v51 = vor.u32 %v2328_v30, %v2327_v49  ;;  %v1526_v20 = vpop.permute.xlu0 %1525 }
 0x1eb   : > { %v1434_v37 = vld [vmem:[#allocation2 + $0xac] sm:$0xf]  ;;  %v1813_v12 = vrot.slane %v1812_v16, 4  ;;  %v8418_v17 = vrot.slane %v1815_v13, 5  ;;  %6750 = vmatmul.mubr.msk.bf16.gmra.mxu0 %vm4999_vm11, %v6905_v58  ;;  %1397 = vst.msk [vmem:[#allocation3 + $0x90] sm:$0xf] %vm692_vm0, %v1145_v26  ;;  %v3629_v27 = vor.u32 %v3627_v52, %v8403_v35 }
 0x1ec   : > { %v1625_v8 = vld [vmem:[#allocation2 + $0x6c] sm:$0xf]  ;;  %v2323_v46 = vrot.slane %v8341_v40, 4  ;;  %v2955_v1 = vshll.u32 %v2784_v7, 16  ;;  %v2912_v29 = vshrl.u32 %v2779_v22, 16  ;;  %v2915_v53 = vshll.u32 %v2779_v22, 16  ;;  %1515 = vrot.lane.b32.xlu1 %v1434_v37, %s7022_s20  ;;  %v1496_v22 = vpop.permute.xlu1 %1495 }
 0x1ed   : > { %v2714_v42 = vld [vmem:[#allocation2 + $0x84] sm:$0xf]  ;;  %v6121_v4 = vrot.slane %v3619_v9, 11  ;;  %v1821_v13 = vrot.slane %v1819_v0, 4  ;;  %v8426_v45 = vld [vmem:[#allocation2 + $0x110] sm:$0xf]  ;;  %v2952_v16 = vor.u32 %v2951_v23, %v8384_v57  ;;  %v3463_v49 = vsel %vm7411_vm12, %v3455_v34, %v3462_v62 }
 0x1ee   : > { %2746 = vst.msk [vmem:[#allocation3 + $0x88] sm:$0xf] %vm692_vm0, %v2714_v42  ;;  %v1630_v41 = vld [vmem:[#allocation2 + $0x88] sm:$0x1]  ;;  %v1782_v40 = vshrl.u32 %v1625_v8, 16  ;;  %v1785_v7 = vshll.u32 %v1625_v8, 16  ;;  %v1818_v0 = vsel %vm7173_vm6, %v1813_v12, %v8418_v17  ;;  %v2331_v34 = vsel %vm7411_vm12, %v2323_v46, %v2330_v51  ;;  %v2050_v62 = vpop.permute.xlu0 %2049 }
 0x1ef   : > { %v2711_v43 = vld [vmem:[#allocation2 + $0x6c] sm:$0xf]  ;;  %1600 = vst.msk [vmem:[#allocation3 + $0x108] sm:$0xf] %vm1577_vm13, %v1526_v20  ;;  %v2780_v30 = vld [vmem:[#allocation2 + $0x70] sm:$0xf]  ;;  %2069 = vrot.lane.b32.xlu0 %v1818_v0, %s7023_s21  ;;  %v3630_v23 = vsel %vm7411_vm12, %v6121_v4, %v3629_v27  ;;  %v1822_v26 = vor.u32 %v1821_v13, %v8418_v17 }
 0x1f0   : > { %v8436_v52 = vld [vmem:[#allocation2 + $0x70] sm:$0xf]  ;;  %2743 = vst.msk [vmem:[#allocation3 + $0x64] sm:$0xf] %vm692_vm0, %v2711_v43  ;;  %v2957_v57 = vrot.slane %v2955_v1, 5  ;;  %v3633_v48 = vshrl.u32 %v8426_v45, 16  ;;  %3742 = vrot.lane.b32.xlu1 %v3463_v49, %s7023_s21  ;;  %v8451_v42 = vpop.permute.xlu1 %3958 }
 0x1f1   : > { %1585 = vst.msk [vmem:[#allocation3 + $0x54] sm:$0xf] %vm1577_vm13, %v1496_v22  ;;  %v2914_v9 = vrot.slane %v2912_v29, 4  ;;  %v2917_v58 = vrot.slane %v2915_v53, 5  ;;  %v971_v11 = vld [vmem:[#allocation2 + $0x84] sm:$0xf] }
 0x1f2   : > { %v1825_v37 = vshll.u32 %v1630_v41, 16  ;;  %v6909_v18 = vld [vmem:[#allocation3 + $0x128] ss:$12 sps:$4 sm:$0xff]   ;;  %v2953_v12 = vrot.slane %v2952_v16, 4  ;;  %v3631_v8 = vrot.slane %v8403_v35, 4  ;;  %v1784_v1 = vrot.slane %v1782_v40, 4  ;;  %v3232_v22 = vpop.permute.xlu0 %3231 }
 0x1f3   : > { %v1787_v29 = vrot.slane %v1785_v7, 5  ;;  %v8449_v53 = vld [vmem:[#allocation2 + $0xa8] sm:$0xf]  ;;  %2144 = vst.msk [vmem:[#allocation3 + $0x18] sm:$0xf] %vm2141_vm14, %v2050_v62  ;;  %v3636_v46 = vshll.u32 %v8426_v45, 16  ;;  %6753 = vmatprep.mubr.msk.bf16.mxu0 %vm4999_vm11, %v6909_v18  ;;  %3772 = vrot.lane.b32.xlu0 %v3630_v23, %s7023_s21  ;;  %v2918_v20 = vor.u32 %v2917_v58, %v2914_v9 }
 0x1f4   : > { %v2921_v51 = vshll.u32 %v2780_v30, 16  ;;  %v2925_v4 = vshrl.u32 %v2780_v30, 16  ;;  %v1148_v17 = vshrl.u32 %v971_v11, 16  ;;  %v2712_v27 = vld [vmem:[#allocation2 + $0x70] sm:$0xf]  ;;  %v3635_v13 = vrot.slane %v3633_v48, 7  ;;  %2592 = vrot.lane.b32.xlu1 %v2331_v34, %s7024_s15  ;;  %v1528_v58 = vpop.permute.xlu1 %1527 }
 0x1f5   : > { %2673 = vst.msk [vmem:[#allocation3 + $0x18] sm:$0xf] %vm2670_vm15, %v8083_v2  ;;  %v1791_v16 = vshll.u32 %v8436_v52, 16  ;;  %v1795_v41 = vshrl.u32 %v8436_v52, 16  ;;  %v8461_v40 = vld [vmem:[#allocation2 + $0xa8] sm:$0xf]  ;;  %v2958_v49 = vsel %vm7173_vm6, %v2953_v12, %v2957_v57  ;;  %v1788_v52 = vor.u32 %v1787_v29, %v1784_v1 }
 0x1f6   : > { %2744 = vst.msk [vmem:[#allocation3 + $0x70] sm:$0xf] %vm692_vm0, %v2712_v27  ;;  %v3514_v45 = vshrl.u32 %v8449_v53, 16  ;;  %v1146_v7 = vrot.slane %v8391_v14, 4  ;;  %v1150_v43 = vrot.slane %v1148_v17, 7  ;;  %v1151_v2 = vshll.u32 %v971_v11, 16  ;;  %v2082_v17 = vpop.permute.xlu0 %2081 }
 0x1f7   : > { %v3866_v0 = vld [vmem:[#allocation2 + $0x94] sm:$0xf]  ;;  %v1823_v30 = vrot.slane %v1822_v26, 4  ;;  %v1827_v48 = vrot.slane %v1825_v37, 5  ;;  %3311 = vst.msk [vmem:[#allocation3 + $0xc4] sm:$0xf] %vm1577_vm13, %v3232_v22  ;;  %v3638_v57 = vor.u32 %v3636_v46, %v3635_v13 }
 0x1f8   : > { %v2781_v9 = vld [vmem:[#allocation2 + $0x74] sm:$0x1]  ;;  %v8470_v23 = vrot.slane %v2921_v51, 5  ;;  %v2927_v34 = vrot.slane %v2925_v4, 4  ;;  %v2382_v18 = vshrl.u32 %v8461_v40, 16  ;;  %v1153_v11 = vor.u32 %v1151_v2, %v1150_v43  ;;  %3940 = vrot.lane.b32.xlu0 %v3866_v0, %s7024_s15  ;;  %3221 = vrot.lane.b32.xlu1 %v2958_v49, %s7022_s20 }
 0x1f9   : > { %v8473_v14 = vld [vmem:[#allocation2 + $0xac] sm:$0xf]  ;;  %1601 = vst.msk [vmem:[#allocation3 + $0x114] sm:$0xf] %vm1577_vm13, %v1528_v58  ;;  %v2919_v26 = vrot.slane %v2918_v20, 4  ;;  %v8479_v37 = vrot.slane %v1791_v16, 5  ;;  %v1828_v27 = vsel %vm7173_vm6, %v1823_v30, %v1827_v48  ;;  %v3639_v22 = vsel %vm7411_vm12, %v3631_v8, %v3638_v57 }
 0x1fa   : > { %3840 = vst.msk [vmem:[#allocation3 + $0xc4] sm:$0xf] %vm2141_vm14, %v8103_v47  ;;  %v1627_v62 = vld [vmem:[#allocation2 + $0x74] sm:$0x1]  ;;  %v1797_v12 = vrot.slane %v1795_v41, 4  ;;  %v8484_v29 = vrot.slane %v3514_v45, 7  ;;  %v1154_v46 = vsel %vm7411_vm12, %v1146_v7, %v1153_v11  ;;  %v3202_v41 = vpop.permute.xlu1 %3201  ;;  %v6723_v11 = vpop.f32.mrf.mxu1 }
 0x1fb   : > { %4032 = vst.msk [vmem:[#allocation3 + $0xc4] sm:$0xf] %vm2670_vm15, %v7868_v21  ;;  %v1431_v1 = vld [vmem:[#allocation2 + $0x94] sm:$0xf]  ;;  %v3517_v51 = vshll.u32 %v8449_v53, 16  ;;  %v2931_v4 = vshll.u32 %v2781_v9, 16  ;;  %v2928_v53 = vor.u32 %v2927_v34, %v8470_v23  ;;  %v2924_v49 = vsel %vm7173_vm6, %v2919_v26, %v8470_v23  ;;  %v8531_v9 = vpop.permute.xlu0 %3736 }
 0x1fc   : > { %v8487_v47 = vld [vmem:[#allocation2 + $0x94] sm:$0xf]  ;;  %v8493_v13 = vrot.slane %v1788_v52, 4  ;;  %v3346_v21 = vld [vmem:[#allocation2 + $0xa4] sm:$0x8]  ;;  %v3523_v16 = vshrl.u32 %v8473_v14, 16  ;;  %1509 = vrot.lane.b32.xlu0 %v1431_v1, %s7022_s20  ;;  %2071 = vrot.lane.b32.xlu1 %v1828_v27, %s7023_s21 }
 0x1fd   : > { %v2195_v20 = vld [vmem:[#allocation2 + $0xa4] sm:$0x8]  ;;  %1398 = vst.msk [vmem:[#allocation3 + $0x9c] sm:$0xf] %vm692_vm0, %v1154_v46  ;;  %v8499_v45 = vrot.slane %v2382_v18, 7  ;;  %v2385_v7 = vshll.u32 %v8461_v40, 16  ;;  %v1798_v40 = vor.u32 %v1797_v12, %v8479_v37  ;;  %v8523_v35 = vor.u32 %v3517_v51, %v8484_v29 }
 0x1fe   : > { %2160 = vst.msk [vmem:[#allocation3 + $0xd8] sm:$0xf] %vm2141_vm14, %v2082_v17  ;;  %v1801_v43 = vshll.u32 %v1627_v62, 16  ;;  %v8502_v2 = vld [vmem:[#allocation2 + $0x94] sm:$0xf]  ;;  %v3492_v0 = vshrl.u32 %v8487_v47, 16  ;;  %v2052_v57 = vpop.permute.xlu1 %2051 }
 0x1ff   : > { %3296 = vst.msk [vmem:[#allocation3 + $0x10] sm:$0xf] %vm1577_vm13, %v3202_v41  ;;  %v8517_v30 = vld [vmem:[#allocation2 + $0xf8] sm:$0xf]  ;;  %v8525_v8 = vrot.slane %v2931_v4, 5  ;;  %v2377_v48 = vshrl.u32 %v2195_v20, 16 }
 0x200   : > { %2689 = vst.msk [vmem:[#allocation3 + $0xd8] sm:$0xf] %vm2670_vm15, %v8120_v24  ;;  %v3509_v24 = vshrl.u32 %v3346_v21, 16  ;;  %v8527_v52 = vld [vmem:[#allocation2 + $0xfc] sm:$0xf]  ;;  %v3525_v58 = vrot.slane %v3523_v16, 7  ;;  %3215 = vrot.lane.b32.xlu0 %v2924_v49, %s7022_s20  ;;  %3774 = vrot.lane.b32.xlu1 %v3639_v22, %s7023_s21  ;;  %v8564_v21 = vpop.permute.xlu0 %2586 }
 0x201   : > { %3825 = vst.msk [vmem:[#allocation3 + $0x10] sm:$0xf] %vm2141_vm14, %v8106_v3  ;;  %v1794_v3 = vsel %vm7173_vm6, %v8493_v13, %v8479_v37  ;;  %v3526_v23 = vshll.u32 %v8473_v14, 16  ;;  %v2360_v34 = vshrl.u32 %v8502_v2, 16  ;;  %v8539_v18 = vld [vmem:[#allocation2 + $0xa8] sm:$0xf] }
 0x202   : > { %4017 = vst.msk [vmem:[#allocation3 + $0x10] sm:$0xf] %vm2670_vm15, %v7846_v15  ;;  %v8541_v26 = vrot.slane %v2928_v53, 4  ;;  %v8544_v15 = vor.u32 %v2385_v7, %v8499_v45  ;;  %v8546_v62 = vrot.slane %v1801_v43, 5  ;;  %v3343_v12 = vld [vmem:[#allocation2 + $0x90] sm:$0x8]  ;;  %v623_v7 = vpop.f32.mrf.mxu1 }
 0x203   : > { %v3495_v1 = vshll.u32 %v8487_v47, 16  ;;  %2145 = vst.msk [vmem:[#allocation3 + $0x24] sm:$0xf] %vm2141_vm14, %v2052_v57  ;;  %v8551_v14 = vrot.slane %v1798_v40, 4  ;;  %v8553_v37 = vrot.slane %v3492_v0, 7  ;;  %v3521_v51 = vrot.slane %v8484_v29, 4 }
 0x204   : > { %v2192_v4 = vld [vmem:[#allocation2 + $0x90] sm:$0x8]  ;;  %v2470_v46 = vshrl.u32 %v8517_v30, 16  ;;  %2674 = vst.msk [vmem:[#allocation3 + $0x24] sm:$0xf] %vm2670_vm15, %v8126_v10  ;;  %v6116_v17 = vrot.slane %v3509_v24, 11  ;;  %v3528_v29 = vor.u32 %v3526_v23, %v3525_v58  ;;  %v3234_v10 = vpop.permute.xlu1 %3233  ;;  %2065 = vrot.lane.b32.xlu0 %v1794_v3, %s7023_s21 }
 0x205   : > { %v8560_v47 = vrot.slane %v2377_v48, 11  ;;  %v2363_v27 = vshll.u32 %v8502_v2, 16  ;;  %v2479_v13 = vshrl.u32 %v8527_v52, 16  ;;  %v3867_v20 = vld [vmem:[#allocation2 + $0x98] sm:$0xf]  ;;  %v3487_v16 = vshrl.u32 %v3343_v12, 16 }
 0x206   : > { %v8566_v41 = vrot.slane %v2360_v34, 7  ;;  %v2984_v53 = vshrl.u32 %v8539_v18, 16  ;;  %v2355_v22 = vshrl.u32 %v2192_v4, 16  ;;  %v2987_v2 = vshll.u32 %v8539_v18, 16  ;;  %v8574_v49 = vld [vmem:[#allocation2 + $0xac] sm:$0xf]  ;;  %3942 = vrot.lane.b32.xlu1 %v3867_v20, %s7024_s15 }
 0x207   : > { %v8576_v40 = vld [vmem:[#allocation2 + $0xa8] sm:$0xf]  ;;  %v8581_v0 = vld [vmem:[%s9668_s4] ss:$0 sm:$0xff]  ;;  %3312 = vst.msk [vmem:[#allocation3 + $0xd0] sm:$0xf] %vm1577_vm13, %v3234_v10  ;;  %v8591_v58 = vor.u32 %v3495_v1, %v8553_v37  ;;  %v3520_v12 = vsel %vm7411_vm12, %v6116_v17, %v8523_v35  ;;  %v2388_v1 = vsel %vm7411_vm12, %v8560_v47, %v8544_v15  ;;  %v8617_v20 = vsel %vm7411_vm12, %v3521_v51, %v3528_v29  ;;  %v6724_v15 = vpop.f32.mrf.mxu1 }
 0x208   : > { %v632_v24 = vadd.f32 %v8581_v0, %v6723_v11  ;;  %v8593_v23 = vrot.slane %v2470_v46, 7  ;;  %v2482_v34 = vshll.u32 %v8527_v52, 16  ;;  %v966_v18 = vld [vmem:[#allocation2 + $0x68] sm:$0x8]  ;;  %v967_v57 = vld [vmem:[#allocation2 + $0x6c] sm:$0xf]  ;;  %v8607_v52 = vadd.f32 %v8581_v0, %v623_v7  ;;  %v2084_v47 = vpop.permute.xlu1 %2083  ;;  %3752 = vrot.lane.b32.xlu0 %v3520_v12, %s7023_s21 }
 0x209   : > { %3841 = vst.msk [vmem:[#allocation3 + $0xd0] sm:$0xf] %vm2141_vm14, %v8154_v5  ;;  %v6912_v3 = vld [vmem:[#allocation3] ss:$12 sps:$4 sm:$0xff]   ;;  %v6914_v11 = vld [vmem:[#allocation3 + $0x4] ss:$12 sps:$4 sm:$0xff]   ;;  %v8611_v5 = vpop.permute.xlu0 %3768  ;;  %v8620_v35 = vor.u32 %v2363_v27, %v8566_v41  ;;  %v635_v12 = vadd.f32 %v8581_v0, %v6724_v15  ;;  %v626_v31 = vpop.f32.mrf.mxu1 }
 0x20a   : > { %v2481_v4 = vrot.slane %v2479_v13, 7  ;;  %4033 = vst.msk [vmem:[#allocation3 + $0xd0] sm:$0xf] %vm2670_vm15, %v7904_v39  ;;  %v8613_v46 = vrot.slane %v3487_v16, 11  ;;  %v2986_v17 = vrot.slane %v2984_v53, 4  ;;  %5080 = vmatprep.mubr.bf16.mxu1 %v6914_v11  ;;  %v8622_v13 = vrot.slane %v2355_v22, 11 }
 0x20b   : > { %v8624_v7 = vld [vmem:[#allocation2 + $0xac] sm:$0xf]  ;;  %v2989_v39 = vrot.slane %v2987_v2, 5  ;;  %v2391_v10 = vshrl.u32 %v8574_v49, 16  ;;  %v1112_v16 = vshrl.u32 %v966_v18, 16  ;;  %5081 = vmatmul.mubr.bf16.vlgmr.msra.gmra.mxu1 %v6912_v3  ;;  %v1854_v51 = vshrl.u32 %v8576_v40, 16 }
 0x20c   : > { %2161 = vst.msk [vmem:[#allocation3 + $0xe4] sm:$0xf] %vm2141_vm14, %v2084_v47  ;;  %v1432_v48 = vld [vmem:[#allocation2 + $0x98] sm:$0xf]  ;;  %v1117_v27 = vshrl.u32 %v967_v57, 16  ;;  %v1120_v29 = vshll.u32 %v967_v57, 16  ;;  %v2484_v2 = vor.u32 %v2482_v34, %v2481_v4  ;;  %v2366_v34 = vsel %vm7411_vm12, %v8622_v13, %v8620_v35  ;;  %2602 = vrot.lane.b32.xlu0 %v2388_v1, %s7024_s15 }
 0x20d   : > { %v668_v53 = vmax.f32 %v632_v24, 0.0  ;;  %2690 = vst.msk [vmem:[#allocation3 + $0xe4] sm:$0xf] %vm2670_vm15, %v8166_v60  ;;  %1511 = vrot.lane.b32.xlu1 %v1432_v48, %s7022_s20  ;;  %v2477_v22 = vrot.slane %v8593_v23, 4  ;;  %v1857_v18 = vshll.u32 %v8576_v40, 16  ;;  %v8638_v3 = vpop.permute.xlu0 %3936  ;;  %v2993_v47 = vshll.u32 %v8624_v7, 16  ;;  %v8643_v48 = vpop.permute.xlu1 %3738 }
 0x20e   : > { %v8635_v11 = vld [vmem:[#allocation2 + $0x98] sm:$0xf]  ;;  %v2785_v57 = vld [vmem:[#allocation2 + $0x94] sm:$0xf]  ;;  %v6083_v24 = vrot.slane %v1112_v16, 11  ;;  %v8641_v43 = vrot.slane %v1117_v27, 7  ;;  %v3498_v40 = vsel %vm7411_vm12, %v8613_v46, %v8591_v58  ;;  %v2990_v4 = vor.u32 %v2989_v39, %v2986_v17 }
 0x20f   : > { %v6296_v60 = vpack.c.bf16 %v668_v53, %v668_v53  ;;  %v2997_v15 = vshrl.u32 %v8624_v7, 16  ;;  %v2393_v16 = vrot.slane %v2391_v10, 7  ;;  %v2394_v27 = vshll.u32 %v8574_v49, 16  ;;  %v2717_v55 = vld [vmem:[#allocation2 + $0xa8] sm:$0xf] }
 0x210   : > { %v1856_v53 = vrot.slane %v1854_v51, 4  ;;  %v1122_v54 = vor.u32 %v1120_v29, %v8641_v43  ;;  %v9685_v58 = vsel %vm7173_vm6, %v8541_v26, %v8525_v8  ;;  %v8664_v46 = vld [vmem:[#allocation2 + $0xac] sm:$0xf]  ;;  %v1859_v35 = vrot.slane %v1857_v18, 5  ;;  %2749 = vst.msk [vmem:[#allocation3 + $0xac] sm:$0xf] %vm692_vm0, %v2717_v55  ;;  %3748 = vrot.lane.b32.xlu0 %v3498_v40, %s7023_s21 }
 0x211   : > { %949 = vst.msk [vmem:[#allocation2 + $0x148] sm:$0xf] %vm692_vm0, %v6296_v60  ;;  %3217 = vrot.lane.b32.xlu1 %v9685_v58, %s7022_s20  ;;  %v3501_v1 = vshrl.u32 %v8635_v11, 16  ;;  %v2960_v17 = vshrl.u32 %v2785_v57, 16  ;;  %v627_v49 = vadd.f32 %v8581_v0, %v626_v31  ;;  %v1506_v13 = vpop.permute.xlu0 %1505  ;;  %v2963_v39 = vshll.u32 %v2785_v57, 16  ;;  %v8672_v8 = vpop.permute.xlu1 %2588 }
 0x212   : > { %v1123_v10 = vsel %vm7411_vm12, %v6083_v24, %v1122_v54  ;;  %v666_v51 = vmax.f32 %v8607_v52, 0.0  ;;  %v669_v29 = vmax.f32 %v635_v12, 0.0  ;;  %1590 = vst.msk [vmem:[#allocation3 + $0x90] sm:$0xf] %vm1577_vm13, %v1506_v13  ;;  %v8677_v26 = vsel %vm7411_vm12, %v2477_v22, %v2484_v2  ;;  %v750_v0 = vld [vmem:[#allocation2 + $0x11c] sm:$0x8] }
 0x213   : > { %v2991_v18 = vrot.slane %v2990_v4, 4  ;;  %v8679_v31 = vrot.slane %v2993_v47, 5  ;;  %v2389_v55 = vrot.slane %v8499_v45, 4  ;;  %1395 = vst.msk [vmem:[#allocation3 + $0x78] sm:$0xf] %vm692_vm0, %v1123_v10  ;;  %v1863_v54 = vshll.u32 %v8664_v46, 16 }
 0x214   : > { %v1867_v52 = vshrl.u32 %v8664_v46, 16  ;;  %v1631_v12 = vld [vmem:[#allocation2 + $0x94] sm:$0xf]  ;;  %v6294_v57 = vpack.c.bf16 %v666_v51, %v666_v51  ;;  %v6297_v24 = vpack.c.bf16 %v669_v29, %v669_v29  ;;  %v968_v60 = vld [vmem:[#allocation2 + $0x70] sm:$0xf]  ;;  %v9686_v22 = vsel %vm7173_vm6, %v8551_v14, %v8546_v62  ;;  %2598 = vrot.lane.b32.xlu0 %v2366_v34, %s7024_s15 }
 0x215   : > { %2067 = vrot.lane.b32.xlu1 %v9686_v22, %s7023_s21  ;;  %v2396_v45 = vor.u32 %v2394_v27, %v2393_v16  ;;  %v1860_v2 = vor.u32 %v1859_v35, %v1856_v53  ;;  %v3504_v47 = vshll.u32 %v8635_v11, 16  ;;  %v8693_v40 = vld [vmem:[#allocation2 + $0x98] sm:$0xf]  ;;  %v667_v4 = vmax.f32 %v627_v49, 0.0  ;;  %v3733_v58 = vpop.permute.xlu0 %3732  ;;  %v8701_v14 = vpop.permute.xlu1 %3770 }
 0x216   : > { %v3503_v13 = vrot.slane %v3501_v1, 7  ;;  %v2962_v10 = vrot.slane %v2960_v17, 4  ;;  %v2965_v51 = vrot.slane %v2963_v39, 5  ;;  %v8695_v29 = vld [vmem:[#allocation2 + $0x98] sm:$0xf]  ;;  %v751_v62 = vsel %vm7185_vm9, 0, %v750_v0 }
 0x217   : > { %947 = vst.msk [vmem:[#allocation2 + $0x134] sm:$0xf] %vm692_vm0, %v6294_v57  ;;  %950 = vst.msk [vmem:[#allocation2 + $0x14c] sm:$0xf] %vm692_vm0, %v6297_v24  ;;  %v1830_v11 = vshrl.u32 %v1631_v12, 16  ;;  %v1833_v16 = vshll.u32 %v1631_v12, 16  ;;  %v6295_v27 = vpack.c.bf16 %v667_v4, %v667_v4  ;;  %v2996_v35 = vsel %vm7173_vm6, %v2991_v18, %v8679_v31 }
 0x218   : > { %3826 = vst.msk [vmem:[#allocation3 + $0x1c] sm:$0xf] %vm2141_vm14, %v3733_v58  ;;  %752 = vst [vmem:[#allocation2 + $0x11c] sm:$0x8] %v751_v62  ;;  %v1126_v53 = vshrl.u32 %v968_v60, 16  ;;  %v8710_v1 = vrot.slane %v1863_v54, 5  ;;  %v2397_v18 = vsel %vm7411_vm12, %v2389_v55, %v2396_v45  ;;  %v3506_v24 = vor.u32 %v3504_v47, %v3503_v13  ;;  %3227 = vrot.lane.b32.xlu0 %v2996_v35, %s7022_s20 }
 0x219   : > { %4018 = vst.msk [vmem:[#allocation3 + $0x1c] sm:$0xf] %vm2670_vm15, %v8372_v32  ;;  %v2969_v17 = vshll.u32 %v8693_v40, 16  ;;  %v1129_v49 = vshll.u32 %v968_v60, 16  ;;  %3754 = vrot.lane.b32.xlu1 %v8617_v20, %s7023_s21  ;;  %v1861_v39 = vrot.slane %v1860_v2, 4  ;;  %v2369_v0 = vshrl.u32 %v8695_v29, 16  ;;  %v2583_v57 = vpop.permute.xlu0 %2582  ;;  %v8724_v20 = vpop.permute.xlu1 %3938 }
 0x21a   : > { %v4090_v12 = vld [vmem:[#allocation2 + $0x148] sm:$0xf]  ;;  %948 = vst.msk [vmem:[#allocation2 + $0x138] sm:$0xf] %vm692_vm0, %v6295_v27  ;;  %v1124_v32 = vrot.slane %v8641_v43, 4  ;;  %v1128_v34 = vrot.slane %v1126_v53, 7  ;;  %v2966_v2 = vor.u32 %v2965_v51, %v2962_v10 }
 0x21b   : > { %v3499_v54 = vrot.slane %v8553_v37, 4  ;;  %v2973_v60 = vshrl.u32 %v8693_v40, 16  ;;  %v8722_v22 = vld [vmem:[#allocation2 + $0x98] sm:$0xf]  ;;  %2675 = vst.msk [vmem:[#allocation3 + $0x30] sm:$0xf] %vm2670_vm15, %v2583_v57  ;;  %v1866_v13 = vsel %vm7173_vm6, %v1861_v39, %v8710_v1 }
 0x21c   : > { %v1832_v4 = vrot.slane %v1830_v11, 4  ;;  %v1835_v58 = vrot.slane %v1833_v16, 5  ;;  %v2790_v43 = vld [vmem:[#allocation2 + $0xb0] sm:$0x1]  ;;  %v1131_v62 = vor.u32 %v1129_v49, %v1128_v34  ;;  %v2715_v27 = vld [vmem:[#allocation2 + $0x94] sm:$0xf]  ;;  %2077 = vrot.lane.b32.xlu0 %v1866_v13, %s7023_s21 }
 0x21d   : > { %v8728_v55 = vrot.slane %v2969_v17, 5  ;;  %v2372_v37 = vshll.u32 %v8695_v29, 16  ;;  %v2207_v45 = vld [vmem:[#allocation2 + $0xf4] sm:$0x8]  ;;  %v4433_v47 = vshrl.u32 %v4090_v12, 16  ;;  %v4436_v40 = vshll.u32 %v4090_v12, 16  ;;  %2620 = vrot.lane.b32.xlu1 %v8677_v26, %s7024_s15  ;;  %v3212_v16 = vpop.permute.xlu0 %3211  ;;  %v1508_v26 = vpop.permute.xlu1 %1507 }
 0x21e   : > { %2747 = vst.msk [vmem:[#allocation3 + $0x94] sm:$0xf] %vm692_vm0, %v2715_v27  ;;  %v2371_v10 = vrot.slane %v2369_v0, 7  ;;  %v2999_v51 = vrot.slane %v2997_v15, 4  ;;  %v4087_v11 = vld [vmem:[#allocation2 + $0x134] sm:$0xf]  ;;  %v1132_v29 = vsel %vm7411_vm12, %v1124_v32, %v1131_v62  ;;  %v1836_v0 = vor.u32 %v1835_v58, %v1832_v4 }
 0x21f   : > { %v1839_v53 = vshll.u32 %v8722_v22, 16  ;;  %v3003_v35 = vshll.u32 %v2790_v43, 16  ;;  %v4409_v17 = vshrl.u32 %v4087_v11, 16  ;;  %v4412_v49 = vshll.u32 %v4087_v11, 16  ;;  %1396 = vst.msk [vmem:[#allocation3 + $0x84] sm:$0xf] %vm692_vm0, %v1132_v29 }
 0x220   : > { %3301 = vst.msk [vmem:[#allocation3 + $0x4c] sm:$0xf] %vm1577_vm13, %v3212_v16  ;;  %v2967_v39 = vrot.slane %v2966_v2, 4  ;;  %v2465_v12 = vshrl.u32 %v2207_v45, 16  ;;  %v2473_v7 = vshll.u32 %v8517_v30, 16  ;;  %v4435_v15 = vrot.slane %v4433_v47, 4 }
 0x221   : > { %1591 = vst.msk [vmem:[#allocation3 + $0x9c] sm:$0xf] %vm1577_vm13, %v1508_v26  ;;  %v4438_v32 = vrot.slane %v4436_v40, 5  ;;  %v4411_v34 = vrot.slane %v4409_v17, 4  ;;  %v4414_v57 = vrot.slane %v4412_v49, 5  ;;  %2604 = vrot.lane.b32.xlu1 %v2397_v18, %s7024_s15  ;;  %v2367_v43 = vrot.slane %v8566_v41, 4  ;;  %v2062_v58 = vpop.permute.xlu0 %2061  ;;  %v3735_v13 = vpop.permute.xlu1 %3734 }
 0x222   : > { %v1843_v62 = vshrl.u32 %v8722_v22, 16  ;;  %v3000_v2 = vor.u32 %v2999_v51, %v8679_v31  ;;  %v1636_v4 = vld [vmem:[#allocation2 + $0xb0] sm:$0x1]  ;;  %v2374_v27 = vor.u32 %v2372_v37, %v2371_v10  ;;  %v8751_v30 = vrot.slane %v1839_v53, 5  ;;  %v2803_v40 = vld [vmem:[#allocation2 + $0x10c] sm:$0xf] }
 0x223   : > { %v8753_v45 = vrot.slane %v3003_v35, 5  ;;  %v1869_v47 = vrot.slane %v1867_v52, 4  ;;  %2150 = vst.msk [vmem:[#allocation3 + $0x60] sm:$0xf] %vm2141_vm14, %v2062_v58  ;;  %v3507_v41 = vsel %vm7411_vm12, %v3499_v54, %v3506_v24  ;;  %v2972_v31 = vsel %vm7173_vm6, %v2967_v39, %v8728_v55  ;;  %v8763_v37 = vld [vmem:[#allocation2 + $0x14c] sm:$0xf] }
 0x224   : > { %v1837_v18 = vrot.slane %v1836_v0, 4  ;;  %v2975_v22 = vrot.slane %v2973_v60, 4  ;;  %v8765_v10 = vld [vmem:[#allocation2 + $0x138] sm:$0xf]  ;;  %3827 = vst.msk [vmem:[#allocation3 + $0x28] sm:$0xf] %vm2141_vm14, %v3735_v13  ;;  %3223 = vrot.lane.b32.xlu0 %v2972_v31, %s7022_s20  ;;  %v2475_v52 = vor.u32 %v2473_v7, %v8593_v23  ;;  %v4439_v11 = vor.u32 %v4438_v32, %v4435_v15 }
 0x225   : > { %v6105_v46 = vrot.slane %v2465_v12, 11  ;;  %v2787_v51 = vld [vmem:[#allocation2 + $0x9c] sm:$0x1]  ;;  %v4415_v54 = vor.u32 %v4414_v57, %v4411_v34  ;;  %4019 = vst.msk [vmem:[#allocation3 + $0x28] sm:$0xf] %vm2670_vm15, %v8413_v6  ;;  %3750 = vrot.lane.b32.xlu1 %v3507_v41, %s7023_s21  ;;  %v3001_v24 = vrot.slane %v3000_v2, 4  ;;  %v3765_v53 = vpop.permute.xlu0 %3764  ;;  %v2375_v35 = vsel %vm7411_vm12, %v2367_v43, %v2374_v27  ;;  %v2585_v26 = vpop.permute.xlu1 %2584 }
 0x226   : > { %v1873_v60 = vshll.u32 %v1636_v4, 16  ;;  %v3104_v29 = vshrl.u32 %v2803_v40, 16  ;;  %v3107_v16 = vshll.u32 %v2803_v40, 16  ;;  %v8775_v17 = vld [vmem:[#allocation2 + $0x9c] sm:$0x1]  ;;  %v4442_v23 = vshll.u32 %v8763_v37, 16 }
 0x227   : > { %v4418_v49 = vshll.u32 %v8765_v10, 16  ;;  %3842 = vst.msk [vmem:[#allocation3 + $0xdc] sm:$0xf] %vm2141_vm14, %v3765_v53  ;;  %v1842_v6 = vsel %vm7173_vm6, %v1837_v18, %v8751_v30  ;;  %v1870_v39 = vor.u32 %v1869_v47, %v8710_v1  ;;  %v2976_v0 = vor.u32 %v2975_v22, %v8728_v55  ;;  %v8785_v7 = vld [vmem:[#allocation2 + $0x110] sm:$0xf] }
 0x228   : > { %v2979_v12 = vshll.u32 %v2787_v51, 16  ;;  %v1646_v15 = vld [vmem:[#allocation2 + $0xf8] sm:$0xf]  ;;  %2676 = vst.msk [vmem:[#allocation3 + $0x3c] sm:$0xf] %vm2670_vm15, %v2585_v26  ;;  %2073 = vrot.lane.b32.xlu0 %v1842_v6, %s7023_s21  ;;  %v2476_v32 = vsel %vm7411_vm12, %v6105_v46, %v2475_v52  ;;  %v4440_v34 = vrot.slane %v4439_v11, 4  ;;  %v3006_v55 = vsel %vm7173_vm6, %v3001_v24, %v8753_v45 }
 0x229   : > { %4034 = vst.msk [vmem:[#allocation3 + $0xdc] sm:$0xf] %vm2670_vm15, %v8407_v36  ;;  %v8793_v57 = vrot.slane %v1843_v62, 4  ;;  %v4416_v1 = vrot.slane %v4415_v54, 4  ;;  %v8795_v43 = vld [vmem:[#allocation2 + $0xfc] sm:$0xf]  ;;  %2600 = vrot.lane.b32.xlu1 %v2375_v35, %s7024_s15  ;;  %v2615_v27 = vpop.permute.xlu0 %2614  ;;  %v3214_v31 = vpop.permute.xlu1 %3213 }
 0x22a   : > { %v1875_v2 = vrot.slane %v1873_v60, 5  ;;  %v3106_v4 = vrot.slane %v3104_v29, 4  ;;  %v3109_v36 = vrot.slane %v3107_v16, 5  ;;  %v976_v58 = vld [vmem:[#allocation2 + $0xa8] sm:$0xf]  ;;  %v8801_v47 = vrot.slane %v4442_v23, 5 }
 0x22b   : > { %v1950_v40 = vshrl.u32 %v1646_v15, 16  ;;  %v1953_v13 = vshll.u32 %v1646_v15, 16  ;;  %v8803_v62 = vrot.slane %v4418_v49, 5  ;;  %v975_v41 = vld [vmem:[#allocation2 + $0xa4] sm:$0x8]  ;;  %v1871_v18 = vrot.slane %v1870_v39, 4 }
 0x22c   : > { %2691 = vst.msk [vmem:[#allocation3 + $0xf0] sm:$0xf] %vm2670_vm15, %v2615_v27  ;;  %v8806_v22 = vrot.slane %v2976_v0, 4  ;;  %v8808_v46 = vrot.slane %v2979_v12, 5  ;;  %v1849_v45 = vshll.u32 %v8775_v17, 16  ;;  %2618 = vrot.lane.b32.xlu0 %v2476_v32, %s7024_s15  ;;  %v1846_v54 = vor.u32 %v8793_v57, %v8751_v30 }
 0x22d   : > { %v753_v52 = vld [vmem:[#allocation2 + $0x130] sm:$0x8]  ;;  %3302 = vst.msk [vmem:[#allocation3 + $0x58] sm:$0xf] %vm1577_vm13, %v3214_v31  ;;  %v6917_v11 = vld [vmem:[#allocation3 + $0x18] ss:$12 sps:$4 sm:$0xff]   ;;  %v4421_v60 = vsel %vm7173_vm6, %v4416_v1, %v8803_v62  ;;  %v4445_v29 = vsel %vm7173_vm6, %v4440_v34, %v8801_v47  ;;  %3229 = vrot.lane.b32.xlu1 %v3006_v55, %s7022_s20  ;;  %v3110_v53 = vor.u32 %v3109_v36, %v3106_v4  ;;  %v3244_v49 = vpop.permute.xlu0 %3243  ;;  %v2064_v32 = vpop.permute.xlu1 %2063 }
 0x22e   : > { %v6915_v51 = vld [vmem:[#allocation3 + $0x1c] ss:$12 sps:$4 sm:$0xff]   ;;  %v3113_v24 = vshll.u32 %v8785_v7, 16  ;;  %v3878_v16 = vld [vmem:[#allocation2 + $0x10c] sm:$0xf]  ;;  %v1959_v35 = vshll.u32 %v8795_v43, 16  ;;  %v1876_v34 = vsel %vm7173_vm6, %v1871_v18, %v1875_v2 }
 0x22f   : > { %v8824_v17 = vld [vmem:[#allocation2 + $0x120] sm:$0xf]  ;;  %v1178_v23 = vshrl.u32 %v975_v41, 16  ;;  %v1183_v30 = vshrl.u32 %v976_v58, 16  ;;  %4538 = vst.msk [vmem:[#allocation3 + $0x140] sm:$0xf] %vm692_vm0, %v4421_v60  ;;  %5088 = vmatprep.mubr.bf16.mxu1 %v6915_v51 }
 0x230   : > { %4540 = vst.msk [vmem:[#allocation3 + $0x158] sm:$0xf] %vm692_vm0, %v4445_v29  ;;  %v1952_v26 = vrot.slane %v1950_v40, 4  ;;  %v1955_v6 = vrot.slane %v1953_v13, 5  ;;  %v8828_v39 = vld [vmem:[#allocation2 + $0x10c] sm:$0xf]  ;;  %5089 = vmatmul.mubr.bf16.gmra.mxu1 %v6917_v11  ;;  %3964 = vrot.lane.b32.xlu0 %v3878_v16, %s7024_s15 }
 0x231   : > { %v1186_v0 = vshll.u32 %v976_v58, 16  ;;  %v754_v12 = vsel %vm7185_vm9, 0, %v753_v52  ;;  %v801_v15 = vld [vmem:[#allocation2 + $0x13c] sm:$0x1]  ;;  %3317 = vst.msk [vmem:[#allocation3 + $0x10c] sm:$0xf] %vm1577_vm13, %v3244_v49  ;;  %2079 = vrot.lane.b32.xlu1 %v1876_v34, %s7023_s21  ;;  %v8850_v52 = vpop.permute.xlu0 %3932  ;;  %v3767_v60 = vpop.permute.xlu1 %3766 }
 0x232   : > { %v6086_v57 = vrot.slane %v1178_v23, 11  ;;  %v8835_v1 = vrot.slane %v1183_v30, 7  ;;  %755 = vst [vmem:[#allocation2 + $0x130] sm:$0x8] %v754_v12  ;;  %v8837_v55 = vld [vmem:[#allocation2 + $0xac] sm:$0xf]  ;;  %v1956_v51 = vor.u32 %v1955_v6, %v1952_v26 }
 0x233   : > { %v2718_v4 = vld [vmem:[#allocation2 + $0xac] sm:$0xf]  ;;  %2151 = vst.msk [vmem:[#allocation3 + $0x6c] sm:$0xf] %vm2141_vm14, %v2064_v32  ;;  %v1851_v36 = vrot.slane %v1849_v45, 5  ;;  %v3117_v58 = vshrl.u32 %v8785_v7, 16 }
 0x234   : > { %v4422_v27 = vshrl.u32 %v8765_v10, 16  ;;  %v3646_v40 = vshrl.u32 %v8824_v17, 16  ;;  %2750 = vst.msk [vmem:[#allocation3 + $0xb8] sm:$0xf] %vm692_vm0, %v2718_v4  ;;  %v2716_v2 = vld [vmem:[#allocation2 + $0x98] sm:$0xf]  ;;  %v1188_v18 = vor.u32 %v1186_v0, %v8835_v1  ;;  %v2982_v10 = vsel %vm7173_vm6, %v8806_v22, %v8808_v46 }
 0x235   : > { %v1847_v13 = vrot.slane %v1846_v54, 4  ;;  %v3111_v41 = vrot.slane %v3110_v53, 4  ;;  %v8846_v31 = vrot.slane %v3113_v24, 5  ;;  %2748 = vst.msk [vmem:[#allocation3 + $0xa0] sm:$0xf] %vm692_vm0, %v2716_v2  ;;  %v8856_v11 = vrot.slane %v1959_v35, 5  ;;  %3225 = vrot.lane.b32.xlu1 %v2982_v10, %s7022_s20  ;;  %v1502_v12 = vpop.permute.xlu0 %1501  ;;  %v2617_v4 = vpop.permute.xlu1 %2616 }
 0x236   : > { %v2727_v45 = vld [vmem:[#allocation2 + $0x10c] sm:$0xf]  ;;  %v1441_v7 = vld [vmem:[#allocation2 + $0xf8] sm:$0xf]  ;;  %v1963_v54 = vshrl.u32 %v8795_v43, 16  ;;  %v3649_v16 = vshll.u32 %v8824_v17, 16  ;;  %v1189_v23 = vsel %vm7411_vm12, %v6086_v57, %v1188_v18 }
 0x237   : > { %v2210_v24 = vld [vmem:[#allocation2 + $0x108] sm:$0x8]  ;;  %2759 = vst.msk [vmem:[#allocation3 + $0x124] sm:$0xf] %vm692_vm0, %v2727_v45  ;;  %v3364_v29 = vld [vmem:[#allocation2 + $0x11c] sm:$0x8]  ;;  %1529 = vrot.lane.b32.xlu0 %v1441_v7, %s7022_s20  ;;  %v1852_v49 = vsel %vm7173_vm6, %v1847_v13, %v1851_v36 }
 0x238   : > { %v2492_v53 = vshrl.u32 %v8828_v39, 16  ;;  %v802_v22 = vsel %vm7164_vm3, 0, %v801_v15  ;;  %v804_v46 = vld [vmem:[#allocation2 + $0x150] sm:$0x1]  ;;  %3843 = vst.msk [vmem:[#allocation3 + $0xe8] sm:$0xf] %vm2141_vm14, %v3767_v60 }
 0x239   : > { %v4446_v43 = vshrl.u32 %v8763_v37, 16  ;;  %v4424_v35 = vrot.slane %v4422_v27, 4  ;;  %v8869_v30 = vrot.slane %v3646_v40, 7  ;;  %1401 = vst.msk [vmem:[#allocation3 + $0xc0] sm:$0xf] %vm692_vm0, %v1189_v23  ;;  %v1192_v17 = vshrl.u32 %v8837_v55, 16  ;;  %2075 = vrot.lane.b32.xlu1 %v1852_v49, %s7023_s21  ;;  %v3208_v45 = vpop.permute.xlu0 %3207 }
 0x23a   : > { %803 = vst [vmem:[#allocation2 + $0x13c] sm:$0x1] %v802_v22  ;;  %4035 = vst.msk [vmem:[#allocation3 + $0xe8] sm:$0xf] %vm2670_vm15, %v8451_v42  ;;  %v3116_v37 = vsel %vm7173_vm6, %v3111_v41, %v8846_v31  ;;  %v3119_v26 = vrot.slane %v3117_v58, 4  ;;  %v1195_v6 = vshll.u32 %v8837_v55, 16 }
 0x23b   : > { %v2728_v0 = vld [vmem:[#allocation2 + $0x110] sm:$0xf]  ;;  %v1957_v15 = vrot.slane %v1956_v51, 4  ;;  %v2805_v32 = vld [vmem:[#allocation2 + $0x114] sm:$0x1]  ;;  %v1965_v34 = vrot.slane %v1963_v54, 4  ;;  %3247 = vrot.lane.b32.xlu0 %v3116_v37, %s7022_s20  ;;  %v4425_v2 = vor.u32 %v4424_v35, %v8803_v62  ;;  %v3246_v54 = vpop.permute.xlu1 %3245  ;;  %v3651_v60 = vor.u32 %v3649_v16, %v8869_v30 }
 0x23c   : > { %v1190_v57 = vrot.slane %v8835_v1, 4  ;;  %v1194_v42 = vrot.slane %v1192_v17, 7  ;;  %2760 = vst.msk [vmem:[#allocation3 + $0x130] sm:$0xf] %vm692_vm0, %v2728_v0  ;;  %v3641_v36 = vshrl.u32 %v3364_v29, 16  ;;  %v2487_v27 = vshrl.u32 %v2210_v24, 16 }
 0x23d   : > { %1588 = vst.msk [vmem:[#allocation3 + $0x78] sm:$0xf] %vm1577_vm13, %v1502_v12  ;;  %v8885_v40 = vrot.slane %v2492_v53, 7  ;;  %v2495_v58 = vshll.u32 %v8828_v39, 16  ;;  %v4448_v55 = vrot.slane %v4446_v43, 4  ;;  %v805_v13 = vsel %vm7164_vm3, 0, %v804_v46 }
 0x23e   : > { %2692 = vst.msk [vmem:[#allocation3 + $0xfc] sm:$0xf] %vm2670_vm15, %v2617_v4  ;;  %v1197_v1 = vor.u32 %v1195_v6, %v1194_v42  ;;  %v3120_v41 = vor.u32 %v3119_v26, %v8846_v31  ;;  %v3123_v18 = vshll.u32 %v2805_v32, 16  ;;  %806 = vst [vmem:[#allocation2 + $0x150] sm:$0x1] %v805_v13  ;;  %v1966_v7 = vor.u32 %v1965_v34, %v8856_v11 }
 0x23f   : > { %v3879_v10 = vld [vmem:[#allocation2 + $0x110] sm:$0xf]  ;;  %v8895_v39 = vld [vmem:[#allocation2 + $0x100] sm:$0x1]  ;;  %3299 = vst.msk [vmem:[#allocation3 + $0x34] sm:$0xf] %vm1577_vm13, %v3208_v45  ;;  %v1962_v24 = vsel %vm7173_vm6, %v1957_v15, %v8856_v11  ;;  %v4449_v22 = vor.u32 %v4448_v55, %v8801_v47  ;;  %v2497_v46 = vor.u32 %v2495_v58, %v8885_v40  ;;  %v2058_v47 = vpop.permute.xlu0 %2057  ;;  %v8925_v34 = vpop.permute.xlu1 %3934 }
 0x240   : > { %v2806_v51 = vld [vmem:[#allocation2 + $0x120] sm:$0xf]  ;;  %v1198_v62 = vsel %vm7411_vm12, %v1190_v57, %v1197_v1  ;;  %v6122_v31 = vrot.slane %v3641_v36, 11  ;;  %v8905_v29 = vrot.slane %v2487_v27, 11  ;;  %v8907_v53 = vld [vmem:[#allocation2 + $0x124] sm:$0xf]  ;;  %2093 = vrot.lane.b32.xlu0 %v1962_v24, %s7023_s21  ;;  %3966 = vrot.lane.b32.xlu1 %v3879_v10, %s7024_s15 }
 0x241   : > { %v4089_v23 = vld [vmem:[#allocation2 + $0x13c] sm:$0x1]  ;;  %1402 = vst.msk [vmem:[#allocation3 + $0xcc] sm:$0xf] %vm692_vm0, %v1198_v62  ;;  %v4426_v11 = vrot.slane %v4425_v2, 4  ;;  %v3121_v17 = vrot.slane %v3120_v41, 4 }
 0x242   : > { %3318 = vst.msk [vmem:[#allocation3 + $0x118] sm:$0xf] %vm1577_vm13, %v3246_v54  ;;  %v1649_v16 = vld [vmem:[#allocation2 + $0x10c] sm:$0xf]  ;;  %v4428_v43 = vshll.u32 %v4089_v23, 16  ;;  %v3125_v49 = vrot.slane %v3123_v18, 5  ;;  %v2498_v55 = vsel %vm7411_vm12, %v8905_v29, %v2497_v46 }
 0x243   : > { %3828 = vst.msk [vmem:[#allocation3 + $0x34] sm:$0xf] %vm2141_vm14, %v8531_v9  ;;  %v756_v35 = vld [vmem:[#allocation2 + $0x144] sm:$0x8]  ;;  %v8919_v37 = vld [vmem:[#allocation2 + $0x110] sm:$0xf] }
 0x244   : > { %4020 = vst.msk [vmem:[#allocation3 + $0x34] sm:$0xf] %vm2670_vm15, %v8145_v33  ;;  %v3128_v9 = vshrl.u32 %v2806_v51, 16  ;;  %v3131_v26 = vshll.u32 %v2806_v51, 16  ;;  %v8921_v6 = vrot.slane %v1966_v7, 4  ;;  %v1969_v0 = vshll.u32 %v8895_v39, 16  ;;  %v3240_v39 = vpop.permute.xlu0 %3239 }
 0x245   : > { %v3655_v12 = vshrl.u32 %v8907_v53, 16  ;;  %v4430_v15 = vrot.slane %v4428_v43, 5  ;;  %v972_v32 = vld [vmem:[#allocation2 + $0x90] sm:$0x8]  ;;  %2148 = vst.msk [vmem:[#allocation3 + $0x48] sm:$0xf] %vm2141_vm14, %v2058_v47  ;;  %v3652_v33 = vsel %vm7411_vm12, %v6122_v31, %v3651_v60  ;;  %v1504_v31 = vpop.permute.xlu1 %1503 }
 0x246   : > { %v1974_v57 = vshrl.u32 %v1649_v16, 16  ;;  %v1977_v42 = vshll.u32 %v1649_v16, 16  ;;  %v757_v4 = vsel %vm7185_vm9, 0, %v756_v35  ;;  %v973_v36 = vld [vmem:[#allocation2 + $0x94] sm:$0xf]  ;;  %v4450_v27 = vrot.slane %v4449_v22, 4  ;;  %3776 = vrot.lane.b32.xlu0 %v3652_v33, %s7023_s21 }
 0x247   : > { %2677 = vst.msk [vmem:[#allocation3 + $0x48] sm:$0xf] %vm2670_vm15, %v8564_v21  ;;  %v1442_v58 = vld [vmem:[#allocation2 + $0xfc] sm:$0xf]  ;;  %v2501_v2 = vshrl.u32 %v8919_v37, 16  ;;  %v4431_v1 = vsel %vm7173_vm6, %v4426_v11, %v4430_v15  ;;  %v3130_v18 = vrot.slane %v3128_v9, 4 }
 0x248   : > { %v4092_v13 = vld [vmem:[#allocation2 + $0x150] sm:$0x1]  ;;  %758 = vst [vmem:[#allocation2 + $0x144] sm:$0x8] %v757_v4  ;;  %1531 = vrot.lane.b32.xlu1 %v1442_v58, %s7022_s20  ;;  %v8942_v41 = vld [vmem:[#allocation2 + $0x124] sm:$0xf] }
 0x249   : > { %v3133_v21 = vrot.slane %v3131_v26, 5  ;;  %4539 = vst.msk [vmem:[#allocation3 + $0x14c] sm:$0xf] %vm692_vm0, %v4431_v1  ;;  %v4452_v45 = vshll.u32 %v4092_v13, 16  ;;  %v1156_v10 = vshrl.u32 %v972_v32, 16  ;;  %v3657_v7 = vrot.slane %v3655_v12, 7  ;;  %v3210_v12 = vpop.permute.xlu1 %3209 }
 0x24a   : > { %v3658_v51 = vshll.u32 %v8907_v53, 16  ;;  %v8946_v62 = vld [vmem:[#allocation2 + $0x110] sm:$0xf]  ;;  %v1161_v54 = vshrl.u32 %v973_v36, 16  ;;  %v1164_v24 = vshll.u32 %v973_v36, 16  ;;  %v1971_v60 = vrot.slane %v1969_v0, 5  ;;  %2622 = vrot.lane.b32.xlu0 %v2498_v55, %s7024_s15 }
 0x24b   : > { %3315 = vst.msk [vmem:[#allocation3 + $0xf4] sm:$0xf] %vm1577_vm13, %v3240_v39  ;;  %v1976_v29 = vrot.slane %v1974_v57, 4  ;;  %v1979_v23 = vrot.slane %v1977_v42, 5  ;;  %v8949_v22 = vld [vmem:[#allocation2 + $0x134] sm:$0xf]  ;;  %v3126_v53 = vsel %vm7173_vm6, %v3121_v17, %v3125_v49  ;;  %v3134_v26 = vor.u32 %v3133_v21, %v3130_v18  ;;  %v2090_v49 = vpop.permute.xlu0 %2089 }
 0x24c   : > { %v4454_v11 = vrot.slane %v4452_v45, 5  ;;  %1589 = vst.msk [vmem:[#allocation3 + $0x84] sm:$0xf] %vm1577_vm13, %v1504_v31  ;;  %v2504_v46 = vshll.u32 %v8919_v37, 16  ;;  %v6085_v16 = vrot.slane %v1156_v10, 11  ;;  %v8958_v43 = vrot.slane %v1161_v54, 7  ;;  %3249 = vrot.lane.b32.xlu1 %v3126_v53, %s7022_s20 }
 0x24d   : > { %3844 = vst.msk [vmem:[#allocation3 + $0xf4] sm:$0xf] %vm2141_vm14, %v8611_v5  ;;  %v2729_v35 = vld [vmem:[#allocation2 + $0x120] sm:$0xf]  ;;  %v2503_v9 = vrot.slane %v2501_v2, 7  ;;  %v3137_v5 = vshll.u32 %v8942_v41, 16  ;;  %v3660_v47 = vor.u32 %v3658_v51, %v3657_v7  ;;  %v1980_v33 = vor.u32 %v1979_v23, %v1976_v29  ;;  %v2060_v39 = vpop.permute.xlu1 %2059 }
 0x24e   : > { %4036 = vst.msk [vmem:[#allocation3 + $0xf4] sm:$0xf] %vm2670_vm15, %v8184_v59  ;;  %v4455_v17 = vsel %vm7173_vm6, %v4450_v27, %v4454_v11  ;;  %v3653_v37 = vrot.slane %v8869_v30, 4  ;;  %v1983_v0 = vshll.u32 %v8946_v62, 16  ;;  %v1166_v59 = vor.u32 %v1164_v24, %v8958_v43  ;;  %v3880_v15 = vld [vmem:[#allocation2 + $0x120] sm:$0xf] }
 0x24f   : > { %2761 = vst.msk [vmem:[#allocation3 + $0x13c] sm:$0xf] %vm692_vm0, %v2729_v35  ;;  %4541 = vst.msk [vmem:[#allocation3 + $0x164] sm:$0xf] %vm692_vm0, %v4455_v17  ;;  %v3141_v32 = vshrl.u32 %v8942_v41, 16  ;;  %v3668_v57 = vshrl.u32 %v8949_v22, 16  ;;  %v1972_v30 = vsel %vm7173_vm6, %v8921_v6, %v1971_v60  ;;  %3968 = vrot.lane.b32.xlu0 %v3880_v15, %s7024_s15  ;;  %v2506_v2 = vor.u32 %v2504_v46, %v2503_v9  ;;  %v8992_v18 = vpop.permute.xlu0 %3744 }
 0x250   : > { %2164 = vst.msk [vmem:[#allocation3 + $0x108] sm:$0xf] %vm2141_vm14, %v2090_v49  ;;  %v974_v42 = vld [vmem:[#allocation2 + $0x98] sm:$0xf]  ;;  %v3367_v4 = vld [vmem:[#allocation2 + $0x130] sm:$0x8]  ;;  %v1167_v27 = vsel %vm7411_vm12, %v6085_v16, %v1166_v59  ;;  %2095 = vrot.lane.b32.xlu1 %v1972_v30, %s7023_s21 }
 0x251   : > { %3300 = vst.msk [vmem:[#allocation3 + $0x40] sm:$0xf] %vm1577_vm13, %v3210_v12  ;;  %v6921_v36 = vld [vmem:[#allocation3 + $0x140] ss:$12 sps:$4 sm:$0xff]   ;;  %v1443_v58 = vld [vmem:[#allocation2 + $0x10c] sm:$0xf] }
 0x252   : > { %3829 = vst.msk [vmem:[#allocation3 + $0x40] sm:$0xf] %vm2141_vm14, %v8643_v48  ;;  %v2499_v55 = vrot.slane %v8885_v40, 4  ;;  %v3135_v1 = vrot.slane %v3134_v26, 4  ;;  %v8985_v13 = vrot.slane %v3137_v5, 5  ;;  %v3661_v48 = vsel %vm7411_vm12, %v3653_v37, %v3660_v47  ;;  %6754 = vmatmul.mubr.msk.bf16.gmra.mxu0 %vm4999_vm11, %v6921_v36 }
 0x253   : > { %v8987_v6 = vld [vmem:[#allocation2 + $0x120] sm:$0xf]  ;;  %v2809_v41 = vld [vmem:[#allocation2 + $0x134] sm:$0xf]  ;;  %1399 = vst.msk [vmem:[#allocation3 + $0xa8] sm:$0xf] %vm692_vm0, %v1167_v27  ;;  %1533 = vrot.lane.b32.xlu0 %v1443_v58, %s7022_s20  ;;  %v9028_v5 = vpop.permute.xlu0 %2594 }
 0x254   : > { %4021 = vst.msk [vmem:[#allocation3 + $0x40] sm:$0xf] %vm2670_vm15, %v8186_v63  ;;  %v8996_v21 = vrot.slane %v1983_v0, 5  ;;  %v1987_v40 = vshrl.u32 %v8946_v62, 16  ;;  %v3671_v45 = vshll.u32 %v8949_v22, 16  ;;  %v9001_v7 = vrot.slane %v1980_v33, 4  ;;  %3778 = vrot.lane.b32.xlu1 %v3661_v48, %s7023_s21  ;;  %v3242_v0 = vpop.permute.xlu1 %3241 }
 0x255   : > { %v2808_v10 = vld [vmem:[#allocation2 + $0x128] sm:$0x1]  ;;  %v3663_v51 = vshrl.u32 %v3367_v4, 16  ;;  %v9003_v54 = vld [vmem:[#allocation2 + $0x11c] sm:$0x8]  ;;  %v1170_v31 = vshrl.u32 %v974_v42, 16  ;;  %v2507_v53 = vsel %vm7411_vm12, %v2499_v55, %v2506_v2  ;;  %v3140_v46 = vsel %vm7173_vm6, %v3135_v1, %v8985_v13 }
 0x256   : > { %v9005_v63 = vld [vmem:[#allocation2 + $0x124] sm:$0xf]  ;;  %v9007_v24 = vld [vmem:[#allocation2 + $0x120] sm:$0xf]  ;;  %v1173_v60 = vshll.u32 %v974_v42, 16  ;;  %v9011_v62 = vrot.slane %v3668_v57, 7  ;;  %v1986_v27 = vsel %vm7173_vm6, %v9001_v7, %v8996_v21 }
 0x257   : > { %2149 = vst.msk [vmem:[#allocation3 + $0x54] sm:$0xf] %vm2141_vm14, %v2060_v39  ;;  %v9013_v29 = vrot.slane %v3141_v32, 4  ;;  %v9015_v23 = vld [vmem:[#allocation2 + $0x138] sm:$0xf]  ;;  %v3152_v22 = vshrl.u32 %v2809_v41, 16  ;;  %3251 = vrot.lane.b32.xlu0 %v3140_v46, %s7022_s20 }
 0x258   : > { %v3155_v11 = vshll.u32 %v2809_v41, 16  ;;  %2678 = vst.msk [vmem:[#allocation3 + $0x54] sm:$0xf] %vm2670_vm15, %v8672_v8  ;;  %v9025_v16 = vld [vmem:[#allocation2 + $0x114] sm:$0x1]  ;;  %v1168_v9 = vrot.slane %v8958_v43, 4  ;;  %2624 = vrot.lane.b32.xlu1 %v2507_v53, %s7024_s15  ;;  %v3673_v55 = vor.u32 %v3671_v45, %v9011_v62  ;;  %v2092_v45 = vpop.permute.xlu1 %2091 }
 0x259   : > { %v6922_v35 = vld [vmem:[#allocation3 + $0x158] ss:$12 sps:$4 sm:$0xff]   ;;  %v1172_v26 = vrot.slane %v1170_v31, 7  ;;  %v3147_v17 = vshll.u32 %v2808_v10, 16  ;;  %v2509_v8 = vshrl.u32 %v9003_v54, 16  ;;  %v2514_v49 = vshrl.u32 %v8987_v6, 16 }
 0x25a   : > { %v2517_v37 = vshll.u32 %v8987_v6, 16  ;;  %v2730_v47 = vld [vmem:[#allocation2 + $0x124] sm:$0xf]  ;;  %v9033_v59 = vrot.slane %v3663_v51, 11  ;;  %v1989_v12 = vrot.slane %v1987_v40, 4  ;;  %v3677_v15 = vshrl.u32 %v9015_v23, 16  ;;  %6757 = vmatprep.mubr.msk.bf16.mxu0 %vm4999_vm11, %v6922_v35  ;;  %v9057_v6 = vpop.permute.xlu0 %3944 }
 0x25b   : > { %v1175_v43 = vor.u32 %v1173_v60, %v1172_v26  ;;  %v702_v32 = vld [vmem:[#allocation2 + $0x158] sm:$0x8]  ;;  %2762 = vst.msk [vmem:[#allocation3 + $0x148] sm:$0xf] %vm692_vm0, %v2730_v47  ;;  %v2523_v33 = vshrl.u32 %v9005_v63, 16  ;;  %v3154_v57 = vrot.slane %v3152_v22, 4  ;;  %2097 = vrot.lane.b32.xlu0 %v1986_v27, %s7023_s21 }
 0x25c   : > { %3316 = vst.msk [vmem:[#allocation3 + $0x100] sm:$0xf] %vm1577_vm13, %v3242_v0  ;;  %v1998_v42 = vshrl.u32 %v9007_v24, 16  ;;  %v2001_v30 = vshll.u32 %v9007_v24, 16  ;;  %v9043_v4 = vld [vmem:[#allocation2 + $0x148] sm:$0xf]  ;;  %v1990_v39 = vor.u32 %v1989_v12, %v8996_v21  ;;  %v3674_v21 = vsel %vm7411_vm12, %v9033_v59, %v3673_v55  ;;  %v9086_v35 = vpop.permute.xlu1 %3746 }
 0x25d   : > { %3845 = vst.msk [vmem:[#allocation3 + $0x100] sm:$0xf] %vm2141_vm14, %v8701_v14  ;;  %v6918_v36 = vld [vmem:[#allocation3 + $0x34] ss:$12 sps:$4 sm:$0xff]   ;;  %v6920_v58 = vld [vmem:[#allocation3 + $0x30] ss:$12 sps:$4 sm:$0xff]   ;;  %v1176_v1 = vsel %vm7411_vm12, %v1168_v9, %v1175_v43  ;;  %v3144_v14 = vor.u32 %v9013_v29, %v8985_v13 }
 0x25e   : > { %v3157_v2 = vrot.slane %v3155_v11, 5  ;;  %4037 = vst.msk [vmem:[#allocation3 + $0x100] sm:$0xf] %vm2670_vm15, %v8245_v56  ;;  %v9061_v41 = vrot.slane %v3147_v17, 5  ;;  %v9063_v48 = vrot.slane %v2514_v49, 7  ;;  %v1993_v40 = vshll.u32 %v9025_v16, 16  ;;  %5096 = vmatprep.mubr.bf16.mxu1 %v6918_v36  ;;  %v1514_v11 = vpop.permute.xlu0 %1513 }
 0x25f   : > { %v9066_v10 = vld [vmem:[#allocation2 + $0x138] sm:$0xf]  ;;  %1400 = vst.msk [vmem:[#allocation3 + $0xb4] sm:$0xf] %vm692_vm0, %v1176_v1  ;;  %v3679_v56 = vrot.slane %v3677_v15, 7  ;;  %v3680_v7 = vshll.u32 %v9015_v23, 16  ;;  %5097 = vmatmul.mubr.bf16.gmra.mxu1 %v6920_v58  ;;  %3780 = vrot.lane.b32.xlu0 %v3674_v21, %s7023_s21 }
 0x260   : > { %v703_v13 = vsel %vm7185_vm9, 0, %v702_v32  ;;  %2165 = vst.msk [vmem:[#allocation3 + $0x114] sm:$0xf] %vm2141_vm14, %v2092_v45  ;;  %v3881_v51 = vld [vmem:[#allocation2 + $0x124] sm:$0xf]  ;;  %v2525_v54 = vrot.slane %v2523_v33, 7  ;;  %v3158_v50 = vor.u32 %v3157_v2, %v3154_v57  ;;  %v9112_v55 = vpop.permute.xlu1 %2596 }
 0x261   : > { %v2526_v24 = vshll.u32 %v9005_v63, 16  ;;  %v2000_v31 = vrot.slane %v1998_v42, 4  ;;  %v2003_v60 = vrot.slane %v2001_v30, 5  ;;  %704 = vst [vmem:[#allocation2 + $0x158] sm:$0x8] %v703_v13  ;;  %3970 = vrot.lane.b32.xlu1 %v3881_v51, %s7024_s15  ;;  %v3161_v29 = vshll.u32 %v9066_v10, 16 }
 0x262   : > { %v9081_v23 = vld [vmem:[#allocation2 + $0x124] sm:$0xf]  ;;  %v3690_v22 = vshrl.u32 %v9043_v4, 16  ;;  %v3145_v53 = vrot.slane %v3144_v14, 4  ;;  %v6107_v46 = vrot.slane %v2509_v8, 11  ;;  %v2519_v63 = vor.u32 %v2517_v37, %v9063_v48  ;;  %v3741_v57 = vpop.permute.xlu0 %3740 }
 0x263   : > { %v3675_v16 = vrot.slane %v9011_v62, 4  ;;  %1594 = vst.msk [vmem:[#allocation3 + $0xc0] sm:$0xf] %vm1577_vm13, %v1514_v11  ;;  %v9089_v9 = vrot.slane %v1990_v39, 4  ;;  %v9091_v26 = vrot.slane %v1993_v40, 5  ;;  %v3682_v17 = vor.u32 %v3680_v7, %v3679_v56 }
 0x264   : > { %v2521_v49 = vrot.slane %v9063_v48, 4  ;;  %v2811_v47 = vld [vmem:[#allocation2 + $0x13c] sm:$0x1]  ;;  %v1444_v0 = vld [vmem:[#allocation2 + $0x110] sm:$0xf]  ;;  %v2528_v8 = vor.u32 %v2526_v24, %v2525_v54  ;;  %v3165_v37 = vshrl.u32 %v9066_v10, 16  ;;  %v2004_v59 = vor.u32 %v2003_v60, %v2000_v31 }
 0x265   : > { %v2007_v62 = vshll.u32 %v9081_v23, 16  ;;  %v9097_v12 = vld [vmem:[#allocation2 + $0x134] sm:$0xf]  ;;  %1535 = vrot.lane.b32.xlu1 %v1444_v0, %s7022_s20  ;;  %v9100_v15 = vrot.slane %v3158_v50, 4  ;;  %v9102_v43 = vrot.slane %v3161_v29, 5  ;;  %v9104_v32 = vrot.slane %v3690_v22, 7 }
 0x266   : > { %v3693_v33 = vshll.u32 %v9043_v4, 16  ;;  %v3150_v42 = vsel %vm7173_vm6, %v3145_v53, %v9061_v41  ;;  %v2520_v30 = vsel %vm7411_vm12, %v6107_v46, %v2519_v63  ;;  %v3171_v36 = vshll.u32 %v2811_v47, 16  ;;  %v987_v27 = vld [vmem:[#allocation2 + $0xf4] sm:$0x8]  ;;  %v988_v58 = vld [vmem:[#allocation2 + $0xf8] sm:$0xf]  ;;  %v2591_v60 = vpop.permute.xlu0 %2590  ;;  %v9153_v53 = vpop.permute.xlu1 %3946 }
 0x267   : > { %3830 = vst.msk [vmem:[#allocation3 + $0x4c] sm:$0xf] %vm2141_vm14, %v3741_v57  ;;  %v1996_v4 = vsel %vm7173_vm6, %v9089_v9, %v9091_v26  ;;  %v9121_v2 = vsel %vm7411_vm12, %v3675_v16, %v3682_v17  ;;  %v2011_v1 = vshrl.u32 %v9081_v23, 16  ;;  %v9124_v14 = vld [vmem:[#allocation2 + $0x130] sm:$0x8]  ;;  %v2536_v41 = vshrl.u32 %v9097_v12, 16  ;;  %2626 = vrot.lane.b32.xlu0 %v2520_v30, %s7024_s15 }
 0x268   : > { %v989_v48 = vld [vmem:[#allocation2 + $0xfc] sm:$0xf]  ;;  %4022 = vst.msk [vmem:[#allocation3 + $0x4c] sm:$0xf] %vm2670_vm15, %v8850_v52  ;;  %v9132_v40 = vsel %vm7411_vm12, %v2521_v49, %v2528_v8  ;;  %v9134_v10 = vrot.slane %v2004_v59, 4  ;;  %v9136_v45 = vrot.slane %v2007_v62, 5  ;;  %v3164_v52 = vsel %vm7173_vm6, %v9100_v15, %v9102_v43 }
 0x269   : > { %v9138_v39 = vrot.slane %v3165_v37, 4  ;;  %v990_v56 = vld [vmem:[#allocation2 + $0x108] sm:$0x8]  ;;  %3253 = vrot.lane.b32.xlu1 %v3150_v42, %s7022_s20  ;;  %v3882_v7 = vld [vmem:[#allocation2 + $0x134] sm:$0xf]  ;;  %v9148_v51 = vor.u32 %v3693_v33, %v9104_v32  ;;  %v1266_v54 = vshrl.u32 %v987_v27, 16 }
 0x26a   : > { %v9145_v13 = vld [vmem:[#allocation2 + $0x144] sm:$0x8]  ;;  %v1271_v24 = vshrl.u32 %v988_v58, 16  ;;  %v991_v31 = vld [vmem:[#allocation2 + $0x10c] sm:$0xf]  ;;  %v9150_v21 = vrot.slane %v3171_v36, 5  ;;  %v2010_v37 = vsel %vm7173_vm6, %v9134_v10, %v9136_v45  ;;  %v3220_v30 = vpop.permute.xlu0 %3219 }
 0x26b   : > { %v2531_v50 = vshrl.u32 %v9124_v14, 16  ;;  %v1274_v29 = vshll.u32 %v988_v58, 16  ;;  %v1280_v22 = vshrl.u32 %v989_v48, 16  ;;  %v2731_v11 = vld [vmem:[#allocation2 + $0x134] sm:$0xf]  ;;  %v9156_v46 = vrot.slane %v2536_v41, 7  ;;  %3972 = vrot.lane.b32.xlu0 %v3882_v7, %s7024_s15 }
 0x26c   : > { %2679 = vst.msk [vmem:[#allocation3 + $0x60] sm:$0xf] %vm2670_vm15, %v2591_v60  ;;  %v2539_v63 = vshll.u32 %v9097_v12, 16  ;;  %v6090_v16 = vrot.slane %v1266_v54, 11  ;;  %v1273_v9 = vrot.slane %v1271_v24, 7  ;;  %v3685_v17 = vshrl.u32 %v9145_v13, 16 }
 0x26d   : > { %v992_v26 = vld [vmem:[#allocation2 + $0x110] sm:$0xf]  ;;  %2763 = vst.msk [vmem:[#allocation3 + $0x154] sm:$0xf] %vm692_vm0, %v2731_v11  ;;  %v1282_v49 = vrot.slane %v1280_v22, 7  ;;  %v1283_v47 = vshll.u32 %v989_v48, 16  ;;  %2099 = vrot.lane.b32.xlu1 %v1996_v4, %s7023_s21  ;;  %v3168_v36 = vor.u32 %v9138_v39, %v9102_v43 }
 0x26e   : > { %v1288_v0 = vshrl.u32 %v990_v56, 16  ;;  %v1445_v8 = vld [vmem:[#allocation2 + $0x120] sm:$0xf]  ;;  %v1276_v59 = vor.u32 %v1274_v29, %v1273_v9  ;;  %v1278_v62 = vrot.slane %v1273_v9, 4  ;;  %v1293_v33 = vshrl.u32 %v991_v31, 16  ;;  %v1516_v56 = vpop.permute.xlu1 %1515 }
 0x26f   : > { %v993_v57 = vld [vmem:[#allocation2 + $0x11c] sm:$0x8]  ;;  %v994_v42 = vld [vmem:[#allocation2 + $0x120] sm:$0xf]  ;;  %v1285_v27 = vor.u32 %v1283_v47, %v1282_v49  ;;  %v1296_v58 = vshll.u32 %v991_v31, 16  ;;  %v1302_v41 = vshrl.u32 %v992_v26, 16  ;;  %1537 = vrot.lane.b32.xlu0 %v1445_v8, %s7022_s20  ;;  %v2070_v8 = vpop.permute.xlu0 %2069 }
 0x270   : > { %v707_v48 = vld [vmem:[#allocation2 + $0x164] sm:$0x1]  ;;  %v4093_v4 = vld [vmem:[#allocation2 + $0x15c] sm:$0xf]  ;;  %3305 = vst.msk [vmem:[#allocation3 + $0x7c] sm:$0xf] %vm1577_vm13, %v3220_v30  ;;  %v1277_v7 = vsel %vm7411_vm12, %v6090_v16, %v1276_v59 }
 0x271   : > { %v6091_v54 = vrot.slane %v1288_v0, 11  ;;  %v1295_v24 = vrot.slane %v1293_v33, 7  ;;  %v1305_v60 = vshll.u32 %v992_v26, 16  ;;  %v4094_v29 = vld [vmem:[#allocation2 + $0x160] sm:$0xf]  ;;  %v1286_v31 = vsel %vm7411_vm12, %v1278_v62, %v1285_v27  ;;  %3782 = vrot.lane.b32.xlu1 %v9121_v2, %s7023_s21 }
 0x272   : > { %1595 = vst.msk [vmem:[#allocation3 + $0xcc] sm:$0xf] %vm1577_vm13, %v1516_v56  ;;  %v1304_v22 = vrot.slane %v1302_v41, 7  ;;  %v1310_v11 = vshrl.u32 %v993_v57, 16  ;;  %v1315_v9 = vshrl.u32 %v994_v42, 16  ;;  %v1318_v47 = vshll.u32 %v994_v42, 16  ;;  %v3743_v27 = vpop.permute.xlu1 %3742 }
 0x273   : > { %1409 = vst.msk [vmem:[#allocation3 + $0x120] sm:$0xf] %vm692_vm0, %v1277_v7  ;;  %v2732_v49 = vld [vmem:[#allocation2 + $0x138] sm:$0xf]  ;;  %1410 = vst.msk [vmem:[#allocation3 + $0x12c] sm:$0xf] %vm692_vm0, %v1286_v31  ;;  %v1298_v16 = vor.u32 %v1296_v58, %v1295_v24  ;;  %3255 = vrot.lane.b32.xlu0 %v3164_v52, %s7022_s20 }
 0x274   : > { %v1300_v26 = vrot.slane %v1295_v24, 4  ;;  %v708_v0 = vsel %vm7164_vm3, 0, %v707_v48  ;;  %2764 = vst.msk [vmem:[#allocation3 + $0x160] sm:$0xf] %vm692_vm0, %v2732_v49  ;;  %v1307_v59 = vor.u32 %v1305_v60, %v1304_v22  ;;  %v6092_v62 = vrot.slane %v1310_v11, 11 }
 0x275   : > { %v9183_v33 = vrot.slane %v1315_v9, 7  ;;  %709 = vst [vmem:[#allocation2 + $0x164] sm:$0x1] %v708_v0  ;;  %v4457_v57 = vshrl.u32 %v4093_v4, 16  ;;  %v995_v30 = vld [vmem:[#allocation2 + $0x124] sm:$0xf]  ;;  %v1299_v42 = vsel %vm7411_vm12, %v6091_v54, %v1298_v16  ;;  %2628 = vrot.lane.b32.xlu1 %v9132_v40, %s7024_s15  ;;  %v3773_v54 = vpop.permute.xlu0 %3772 }
 0x276   : > { %2154 = vst.msk [vmem:[#allocation3 + $0x90] sm:$0xf] %vm2141_vm14, %v2070_v8  ;;  %v1654_v2 = vld [vmem:[#allocation2 + $0x128] sm:$0x1]  ;;  %v4460_v58 = vshll.u32 %v4093_v4, 16  ;;  %v4466_v25 = vshll.u32 %v4094_v29, 16  ;;  %v1308_v4 = vsel %vm7411_vm12, %v1300_v26, %v1307_v59 }
 0x277   : > { %v4470_v41 = vshrl.u32 %v4094_v29, 16  ;;  %3831 = vst.msk [vmem:[#allocation3 + $0x58] sm:$0xf] %vm2141_vm14, %v3743_v27  ;;  %v9197_v48 = vrot.slane %v2011_v1, 4  ;;  %v1320_v56 = vor.u32 %v1318_v47, %v9183_v33  ;;  %v4459_v7 = vrot.slane %v4457_v57, 4  ;;  %2101 = vrot.lane.b32.xlu0 %v2010_v37, %s7023_s21 }
 0x278   : > { %1411 = vst.msk [vmem:[#allocation3 + $0x138] sm:$0xf] %vm692_vm0, %v1299_v42  ;;  %1412 = vst.msk [vmem:[#allocation3 + $0x144] sm:$0xf] %vm692_vm0, %v1308_v4  ;;  %v4462_v15 = vrot.slane %v4460_v58, 5  ;;  %v4468_v23 = vrot.slane %v4466_v25, 5  ;;  %v2541_v47 = vor.u32 %v2539_v63, %v9156_v46 }
 0x279   : > { %4023 = vst.msk [vmem:[#allocation3 + $0x58] sm:$0xf] %vm2670_vm15, %v8925_v34  ;;  %v4472_v1 = vrot.slane %v4470_v41, 4  ;;  %v1324_v52 = vshrl.u32 %v995_v30, 16  ;;  %v6124_v24 = vrot.slane %v3685_v17, 11  ;;  %v2017_v60 = vshll.u32 %v1654_v2, 16  ;;  %v2593_v34 = vpop.permute.xlu1 %2592 }
 0x27a   : > { %v2812_v29 = vld [vmem:[#allocation2 + $0x148] sm:$0xf]  ;;  %v1321_v31 = vsel %vm7411_vm12, %v6092_v62, %v1320_v56  ;;  %v1327_v22 = vshll.u32 %v995_v30, 16  ;;  %3846 = vst.msk [vmem:[#allocation3 + $0x10c] sm:$0xf] %vm2141_vm14, %v3773_v54  ;;  %v4463_v11 = vor.u32 %v4462_v15, %v4459_v7  ;;  %v1322_v49 = vrot.slane %v9183_v33, 4  ;;  %v9235_v33 = vpop.permute.xlu0 %3940 }
 0x27b   : > { %v9213_v40 = vld [vmem:[#allocation2 + $0x14c] sm:$0xf]  ;;  %1413 = vst.msk [vmem:[#allocation3 + $0x150] sm:$0xf] %vm692_vm0, %v1321_v31  ;;  %v4473_v9 = vor.u32 %v4472_v1, %v4468_v23  ;;  %v1326_v16 = vrot.slane %v1324_v52, 7  ;;  %v3169_v17 = vrot.slane %v3168_v36, 4  ;;  %v2014_v0 = vor.u32 %v9197_v48, %v9136_v45 }
 0x27c   : > { %2680 = vst.msk [vmem:[#allocation3 + $0x6c] sm:$0xf] %vm2670_vm15, %v2593_v34  ;;  %v3883_v13 = vld [vmem:[#allocation2 + $0x138] sm:$0xf]  ;;  %v6108_v26 = vrot.slane %v2531_v50, 11  ;;  %v3176_v8 = vshrl.u32 %v2812_v29, 16  ;;  %v3696_v45 = vsel %vm7411_vm12, %v6124_v24, %v9148_v51 }
 0x27d   : > { %3974 = vrot.lane.b32.xlu1 %v3883_v13, %s7024_s15  ;;  %v3179_v59 = vshll.u32 %v2812_v29, 16  ;;  %v4095_v10 = vld [vmem:[#allocation2 + $0x164] sm:$0x1]  ;;  %v4464_v37 = vrot.slane %v4463_v11, 4  ;;  %v1329_v62 = vor.u32 %v1327_v22, %v1326_v16  ;;  %v9237_v39 = vrot.slane %v2017_v60, 5  ;;  %v3222_v63 = vpop.permute.xlu1 %3221  ;;  %3784 = vrot.lane.b32.xlu0 %v3696_v45, %s7023_s21 }
 0x27e   : > { %v1446_v43 = vld [vmem:[#allocation2 + $0x124] sm:$0xf]  ;;  %v3699_v14 = vshrl.u32 %v9213_v40, 16  ;;  %v4474_v50 = vrot.slane %v4473_v9, 4  ;;  %v4476_v12 = vshll.u32 %v4095_v10, 16  ;;  %v3702_v36 = vshll.u32 %v9213_v40, 16  ;;  %v1510_v7 = vpop.permute.xlu0 %1509 }
 0x27f   : > { %v9244_v57 = vld [vmem:[#allocation2 + $0x138] sm:$0xf]  ;;  %v1655_v30 = vld [vmem:[#allocation2 + $0x134] sm:$0xf]  ;;  %v4469_v27 = vsel %vm7173_vm6, %v4464_v37, %v4468_v23  ;;  %v1330_v2 = vsel %vm7411_vm12, %v1322_v49, %v1329_v62  ;;  %3306 = vst.msk [vmem:[#allocation3 + $0x88] sm:$0xf] %vm1577_vm13, %v3222_v63  ;;  %v3174_v51 = vsel %vm7173_vm6, %v3169_v17, %v9150_v21  ;;  %v2542_v21 = vsel %vm7411_vm12, %v6108_v26, %v2541_v47 }
 0x280   : > { %v6923_v42 = vld [vmem:[#allocation3 + $0x4c] ss:$12 sps:$4 sm:$0xff]   ;;  %v6925_v58 = vld [vmem:[#allocation3 + $0x48] ss:$12 sps:$4 sm:$0xff]   ;;  %v4478_v25 = vrot.slane %v4476_v12, 5  ;;  %v3178_v41 = vrot.slane %v3176_v8, 4 }
 0x281   : > { %4542 = vst.msk [vmem:[#allocation3 + $0x170] sm:$0xf] %vm692_vm0, %v4469_v27  ;;  %1414 = vst.msk [vmem:[#allocation3 + $0x15c] sm:$0xf] %vm692_vm0, %v1330_v2  ;;  %1539 = vrot.lane.b32.xlu1 %v1446_v43, %s7022_s20  ;;  %v3181_v48 = vrot.slane %v3179_v59, 5  ;;  %5104 = vmatprep.mubr.bf16.mxu1 %v6923_v42  ;;  %v2072_v24 = vpop.permute.xlu1 %2071  ;;  %v2015_v60 = vrot.slane %v2014_v0, 4 }
 0x282   : > { %v996_v4 = vld [vmem:[#allocation2 + $0x130] sm:$0x8]  ;;  %v997_v56 = vld [vmem:[#allocation2 + $0x134] sm:$0xf]  ;;  %v9258_v15 = vld [vmem:[#allocation2 + $0x14c] sm:$0xf]  ;;  %v4479_v23 = vsel %vm7173_vm6, %v4474_v50, %v4478_v25  ;;  %5105 = vmatmul.mubr.bf16.gmra.mxu1 %v6925_v58  ;;  %2630 = vrot.lane.b32.xlu0 %v2542_v21, %s7024_s15  ;;  %v3216_v16 = vpop.permute.xlu0 %3215 }
 0x283   : > { %v1332_v1 = vshrl.u32 %v996_v4, 16  ;;  %v1337_v52 = vshrl.u32 %v997_v56, 16  ;;  %v1340_v54 = vshll.u32 %v997_v56, 16  ;;  %1592 = vst.msk [vmem:[#allocation3 + $0xa8] sm:$0xf] %vm1577_vm13, %v1510_v7  ;;  %v2022_v29 = vshrl.u32 %v1655_v30, 16 }
 0x284   : > { %v2025_v31 = vshll.u32 %v1655_v30, 16  ;;  %4543 = vst.msk [vmem:[#allocation3 + $0x17c] sm:$0xf] %vm692_vm0, %v4479_v23  ;;  %v3701_v22 = vrot.slane %v3699_v14, 7  ;;  %v2545_v34 = vshrl.u32 %v9244_v57, 16  ;;  %v3182_v9 = vor.u32 %v3181_v48, %v3178_v41 }
 0x285   : > { %2155 = vst.msk [vmem:[#allocation3 + $0x9c] sm:$0xf] %vm2141_vm14, %v2072_v24  ;;  %v6093_v40 = vrot.slane %v1332_v1, 11  ;;  %v9269_v11 = vrot.slane %v1337_v52, 7  ;;  %3257 = vrot.lane.b32.xlu1 %v3174_v51, %s7022_s20  ;;  %v3185_v49 = vshll.u32 %v9258_v15, 16  ;;  %v3775_v0 = vpop.permute.xlu1 %3774  ;;  %v2020_v8 = vsel %vm7173_vm6, %v2015_v60, %v9237_v39  ;;  %v6951_v1 = vld [vmem:[%s9667_s3] sm:$0xff]  }
 0x286   : > { %v3884_v13 = vld [vmem:[#allocation2 + $0x148] sm:$0xf]  ;;  %v9273_v17 = vld [vmem:[#allocation2 + $0x138] sm:$0xf]  ;;  %v9275_v26 = vld [vmem:[#allocation2 + $0x15c] sm:$0xf]  ;;  %v3704_v62 = vor.u32 %v3702_v36, %v3701_v22  ;;  %v2066_v45 = vpop.permute.xlu0 %2065 }
 0x287   : > { %v1342_v47 = vor.u32 %v1340_v54, %v9269_v11  ;;  %3303 = vst.msk [vmem:[#allocation3 + $0x64] sm:$0xf] %vm1577_vm13, %v3216_v16  ;;  %v3697_v59 = vrot.slane %v9104_v32, 4  ;;  %v2024_v10 = vrot.slane %v2022_v29, 4  ;;  %v2027_v37 = vrot.slane %v2025_v31, 5  ;;  %3976 = vrot.lane.b32.xlu0 %v3884_v13, %s7024_s15 }
 0x288   : > { %3847 = vst.msk [vmem:[#allocation3 + $0x118] sm:$0xf] %vm2141_vm14, %v3775_v0  ;;  %3832 = vst.msk [vmem:[#allocation3 + $0x64] sm:$0xf] %vm2141_vm14, %v8992_v18  ;;  %v2547_v43 = vrot.slane %v2545_v34, 7  ;;  %v2548_v14 = vshll.u32 %v9244_v57, 16 }
 0x289   : > { %v1343_v50 = vsel %vm7411_vm12, %v6093_v40, %v1342_v47  ;;  %v2733_v12 = vld [vmem:[#allocation2 + $0x148] sm:$0xf]  ;;  %4024 = vst.msk [vmem:[#allocation3 + $0x64] sm:$0xf] %vm2670_vm15, %v8638_v3  ;;  %2103 = vrot.lane.b32.xlu1 %v2020_v8, %s7023_s21  ;;  %v3183_v32 = vrot.slane %v3182_v9, 4  ;;  %v9293_v39 = vrot.slane %v3185_v49, 5  ;;  %v9299_v30 = vpop.permute.xlu1 %3942  ;;  %v2028_v27 = vor.u32 %v2027_v37, %v2024_v10 }
 0x28a   : > { %v2031_v18 = vshll.u32 %v9273_v17, 16  ;;  %v3712_v63 = vshrl.u32 %v9275_v26, 16  ;;  %1415 = vst.msk [vmem:[#allocation3 + $0x168] sm:$0xf] %vm692_vm0, %v1343_v50  ;;  %2765 = vst.msk [vmem:[#allocation3 + $0x16c] sm:$0xf] %vm692_vm0, %v2733_v12  ;;  %v3705_v2 = vsel %vm7411_vm12, %v3697_v59, %v3704_v62  ;;  %v2550_v58 = vor.u32 %v2548_v14, %v2547_v43  ;;  %v9314_v56 = vpop.permute.xlu0 %3752 }
 0x28b   : > { %v3373_v36 = vld [vmem:[#allocation2 + $0x158] sm:$0x8]  ;;  %2152 = vst.msk [vmem:[#allocation3 + $0x78] sm:$0xf] %vm2141_vm14, %v2066_v45  ;;  %v1447_v3 = vld [vmem:[#allocation2 + $0x134] sm:$0xf] }
 0x28c   : > { %v6945_v57 = vld [vmem:[#allocation3 + $0x170] ss:$12 sps:$4 sm:$0xff]   ;;  %2681 = vst.msk [vmem:[#allocation3 + $0x78] sm:$0xf] %vm2670_vm15, %v9028_v5  ;;  %1541 = vrot.lane.b32.xlu0 %v1447_v3, %s7022_s20  ;;  %v2543_v42 = vrot.slane %v9156_v46, 4  ;;  %v3189_v25 = vshrl.u32 %v9258_v15, 16  ;;  %v3188_v46 = vsel %vm7173_vm6, %v3183_v32, %v9293_v39 }
 0x28d   : > { %v2220_v51 = vld [vmem:[#allocation2 + $0x148] sm:$0xf]  ;;  %6758 = vmatmul.mubr.msk.bf16.gmra.mxu0 %vm4999_vm11, %v6945_v57  ;;  %3786 = vrot.lane.b32.xlu1 %v3705_v2, %s7023_s21  ;;  %v3707_v41 = vshrl.u32 %v3373_v36, 16  ;;  %v9311_v48 = vrot.slane %v3712_v63, 7  ;;  %v3715_v5 = vshll.u32 %v9275_v26, 16  ;;  %v9319_v7 = vrot.slane %v2031_v18, 5  ;;  %v1512_v52 = vpop.permute.xlu1 %1511 }
 0x28e   : > { %v2219_v4 = vld [vmem:[#allocation2 + $0x144] sm:$0x8]  ;;  %v6950_v15 = vld [vmem:[%s9667_s3 + $0x8] sm:$0xff]   ;;  %v998_v23 = vld [vmem:[#allocation2 + $0x138] sm:$0xf]  ;;  %v2029_v54 = vrot.slane %v2028_v27, 4  ;;  %v2551_v31 = vsel %vm7411_vm12, %v2543_v42, %v2550_v58  ;;  %v9336_v26 = vpop.permute.xlu0 %2602 }
 0x28f   : > { %v2558_v24 = vshrl.u32 %v2220_v51, 16  ;;  %v1346_v21 = vshrl.u32 %v998_v23, 16  ;;  %v1349_v60 = vshll.u32 %v998_v23, 16  ;;  %v2734_v29 = vld [vmem:[#allocation2 + $0x14c] sm:$0xf]  ;;  %v2035_v22 = vshrl.u32 %v9273_v17, 16  ;;  %6761 = vmatprep.subr.bf16.mxu0 %v6950_v15 }
 0x290   : > { %1593 = vst.msk [vmem:[#allocation3 + $0xb4] sm:$0xf] %vm1577_vm13, %v1512_v52  ;;  %3259 = vrot.lane.b32.xlu0 %v3188_v46, %s7022_s20  ;;  %v3191_v34 = vrot.slane %v3189_v25, 4  ;;  %v6125_v40 = vrot.slane %v3707_v41, 11  ;;  %v3717_v9 = vor.u32 %v3715_v5, %v9311_v48  ;;  %v2814_v49 = vld [vmem:[#allocation2 + $0x150] sm:$0x1]  ;;  %6762 = vmatpush3.bf16.msra.mxu0 %v6950_v15  ;;  %v2034_v17 = vsel %vm7173_vm6, %v2029_v54, %v9319_v7 }
 0x291   : > { %2766 = vst.msk [vmem:[#allocation3 + $0x178] sm:$0xf] %vm692_vm0, %v2734_v29  ;;  %2632 = vrot.lane.b32.xlu1 %v2551_v31, %s7024_s15  ;;  %v1344_v16 = vrot.slane %v9269_v11, 4  ;;  %v1348_v13 = vrot.slane %v1346_v21, 7  ;;  %v2553_v47 = vshrl.u32 %v2219_v4, 16  ;;  %6763 = vmatprep.subr.bf16.mxu0 %v6951_v1  ;;  %v3218_v0 = vpop.permute.xlu1 %3217  ;;  %v9341_v8 = vrot.slane %v2558_v24, 7 }
 0x292   : > { %v2561_v59 = vshll.u32 %v2220_v51, 16  ;;  %v3375_v10 = vld [vmem:[#allocation2 + $0x160] sm:$0xf]  ;;  %3304 = vst.msk [vmem:[#allocation3 + $0x70] sm:$0xf] %vm1577_vm13, %v3218_v0  ;;  %v3192_v11 = vor.u32 %v3191_v34, %v9293_v39  ;;  %v3195_v43 = vshll.u32 %v2814_v49, 16  ;;  %v3718_v50 = vsel %vm7411_vm12, %v6125_v40, %v3717_v9  ;;  %v3749_v18 = vpop.permute.xlu0 %3748 }
 0x293   : > { %v1351_v37 = vor.u32 %v1349_v60, %v1348_v13  ;;  %v3885_v62 = vld [vmem:[#allocation2 + $0x14c] sm:$0xf]  ;;  %v2037_v14 = vrot.slane %v2035_v22, 4  ;;  %3833 = vst.msk [vmem:[#allocation3 + $0x70] sm:$0xf] %vm2141_vm14, %v9086_v35  ;;  %v3721_v39 = vshrl.u32 %v3375_v10, 16 }
 0x294   : > { %2105 = vrot.lane.b32.xlu0 %v2034_v17, %s7023_s21  ;;  %v1657_v12 = vld [vmem:[#allocation2 + $0x13c] sm:$0x1]  ;;  %6764 = vmatpush3.bf16.msra.mxu0 %v6951_v1  ;;  %4025 = vst.msk [vmem:[#allocation3 + $0x70] sm:$0xf] %vm2670_vm15, %v8724_v20  ;;  %v6109_v35 = vrot.slane %v2553_v47, 11  ;;  %v2563_v45 = vor.u32 %v2561_v59, %v9341_v8  ;;  %v3193_v57 = vrot.slane %v3192_v11, 4 }
 0x295   : > { %3978 = vrot.lane.b32.xlu1 %v3885_v62, %s7024_s15  ;;  %v1352_v32 = vsel %vm7411_vm12, %v1344_v16, %v1351_v37  ;;  %v2068_v63 = vpop.permute.xlu1 %2067  ;;  %3834 = vst.msk [vmem:[#allocation3 + $0x7c] sm:$0xf] %vm2141_vm14, %v3749_v18  ;;  %v1448_v36 = vld [vmem:[#allocation2 + $0x138] sm:$0xf]  ;;  %v3197_v20 = vrot.slane %v3195_v43, 5  ;;  %v2038_v3 = vor.u32 %v2037_v14, %v9319_v7  ;;  %v2041_v27 = vshll.u32 %v1657_v12, 16 }
 0x296   : > { %1416 = vst.msk [vmem:[#allocation3 + $0x174] sm:$0xf] %vm692_vm0, %v1352_v32  ;;  %v2221_v2 = vld [vmem:[#allocation2 + $0x14c] sm:$0xf]  ;;  %v2599_v42 = vpop.permute.xlu0 %2598  ;;  %v3723_v58 = vrot.slane %v3721_v39, 7  ;;  %v3724_v25 = vshll.u32 %v3375_v10, 16 }
 0x297   : > { %2153 = vst.msk [vmem:[#allocation3 + $0x84] sm:$0xf] %vm2141_vm14, %v2068_v63  ;;  %v3198_v41 = vsel %vm7173_vm6, %v3193_v57, %v3197_v20  ;;  %v2039_v5 = vrot.slane %v2038_v3, 4  ;;  %v3886_v4 = vld [vmem:[#allocation2 + $0x15c] sm:$0xf]  ;;  %v2567_v46 = vshrl.u32 %v2221_v2, 16 }
 0x298   : > { %4026 = vst.msk [vmem:[#allocation3 + $0x7c] sm:$0xf] %vm2670_vm15, %v9235_v33  ;;  %3788 = vrot.lane.b32.xlu0 %v3718_v50, %s7023_s21  ;;  %2682 = vst.msk [vmem:[#allocation3 + $0x84] sm:$0xf] %vm2670_vm15, %v9112_v55  ;;  %v2564_v33 = vsel %vm7411_vm12, %v6109_v35, %v2563_v45  ;;  %v2043_v55 = vrot.slane %v2041_v27, 5  ;;  %v3719_v1 = vrot.slane %v9311_v48, 4  ;;  %v3726_v52 = vor.u32 %v3724_v25, %v3723_v58 }
 0x299   : > { %1543 = vrot.lane.b32.xlu1 %v1448_v36, %s7022_s20  ;;  %v9366_v51 = vpop.permute.xlu1 %3754  ;;  %2683 = vst.msk [vmem:[#allocation3 + $0x90] sm:$0xf] %vm2670_vm15, %v2599_v42  ;;  %v6928_v15 = vld [vmem:[#allocation3 + $0x60] ss:$12 sps:$4 sm:$0xff]   ;;  %v2569_v21 = vrot.slane %v2567_v46, 7  ;;  %v2570_v60 = vshll.u32 %v2221_v2, 16 }
 0x29a   : > { %v3228_v23 = vpop.permute.xlu0 %3227  ;;  %v2044_v24 = vsel %vm7173_vm6, %v2039_v5, %v2043_v55  ;;  %v3727_v29 = vsel %vm7411_vm12, %v3719_v1, %v3726_v52  ;;  %v2565_v38 = vrot.slane %v9341_v8, 4  ;;  %v3887_v40 = vld [vmem:[#allocation2 + $0x160] sm:$0xf]  ;;  %v9687_v49 = vld [vmem:[#allocation8_spill] sm:$0xff]  ;;  %v9688_v16 = vld [vmem:[#allocation7_spill] sm:$0xff] }
 0x29b   : > { %v6926_v7 = vld [vmem:[#allocation3 + $0x64] ss:$12 sps:$4 sm:$0xff]   ;;  %3309 = vst.msk [vmem:[#allocation3 + $0xac] sm:$0xf] %vm1577_vm13, %v3228_v23  ;;  %v6939_v58 = vld [vmem:[#allocation3 + $0xdc] ss:$12 sps:$4 sm:$0xff]  }
 0x29c   : > { %2634 = vrot.lane.b32.xlu0 %v2564_v33, %s7024_s15  ;;  %5112 = vmatprep.mubr.bf16.mxu1 %v6926_v7  ;;  %3838 = vst.msk [vmem:[#allocation3 + $0xac] sm:$0xf] %vm2141_vm14, %v8291_v61  ;;  %v2572_v61 = vor.u32 %v2570_v60, %v2569_v21  ;;  %v6937_v45 = vld [vmem:[#allocation3 + $0xc4] ss:$12 sps:$4 sm:$0xff]   ;;  %v4580_v5 = vld [vmem:[#allocation3 + $0xd8] sm:$0xff] }
 0x29d   : > { %3261 = vrot.lane.b32.xlu1 %v3198_v41, %s7022_s20  ;;  %v2621_v54 = vpop.permute.xlu1 %2620  ;;  %5113 = vmatmul.mubr.bf16.gmra.mxu1 %v6928_v15  ;;  %4030 = vst.msk [vmem:[#allocation3 + $0xac] sm:$0xf] %vm2670_vm15, %v7944_v44  ;;  %v9442_v41 = vpop.f32.mrf.mxu0  ;;  %v6941_v7 = vld [vmem:[#allocation3 + $0xf4] ss:$12 sps:$4 sm:$0xff]   ;;  %v9449_v1 = vld [vmem:[%s9669_s5] ss:$0 sm:$0xff] }
 0x29e   : > { %2694 = vst.msk [vmem:[#allocation3 + $0x114] sm:$0xf] %vm2670_vm15, %v2621_v54  ;;  %v2078_v48 = vpop.permute.xlu0 %2077  ;;  %v2573_v44 = vsel %vm7411_vm12, %v2565_v38, %v2572_v61  ;;  %s7025_s20 = smov [#allocation4]  }
 0x29f   : > { %2158 = vst.msk [vmem:[#allocation3 + $0xc0] sm:$0xf] %vm2141_vm14, %v2078_v48  ;;  %v5243_v23 = vpop.f32.mrf.mxu0 }
 0x2a0   : > { %3980 = vrot.lane.b32.xlu0 %v3886_v4, %s7024_s15  ;;  %2687 = vst.msk [vmem:[#allocation3 + $0xc0] sm:$0xf] %vm2670_vm15, %v8310_v19 }
 0x2a1   : > { %2107 = vrot.lane.b32.xlu1 %v2044_v24, %s7023_s21  ;;  %v2605_v31 = vpop.permute.xlu1 %2604  ;;  %v4586_v24 = vld [vmem:[#allocation3 + $0xfc] sm:$0xff] }
 0x2a2   : > { %v3224_v22 = vpop.permute.xlu0 %3223 }
 0x2a3   : > { %3307 = vst.msk [vmem:[#allocation3 + $0x94] sm:$0xf] %vm1577_vm13, %v3224_v22 }
 0x2a4   : > { %3836 = vst.msk [vmem:[#allocation3 + $0x94] sm:$0xf] %vm2141_vm14, %v9314_v56 }
 0x2a5   : > { %3790 = vrot.lane.b32.xlu1 %v3727_v29, %s7023_s21  ;;  %v3751_v34 = vpop.permute.xlu1 %3750  ;;  %4028 = vst.msk [vmem:[#allocation3 + $0x94] sm:$0xf] %vm2670_vm15, %v9057_v6  ;;  %v9453_v29 = vpop.f32.mrf.mxu0 }
 0x2a6   : > { %3835 = vst.msk [vmem:[#allocation3 + $0x88] sm:$0xf] %vm2141_vm14, %v3751_v34  ;;  %v2074_v19 = vpop.permute.xlu0 %2073 }
 0x2a7   : > { %4027 = vst.msk [vmem:[#allocation3 + $0x88] sm:$0xf] %vm2670_vm15, %v9299_v30  ;;  %v6931_v30 = vld [vmem:[#allocation3 + $0x78] ss:$12 sps:$4 sm:$0xff]  }
 0x2a8   : > { %2156 = vst.msk [vmem:[#allocation3 + $0xa8] sm:$0xf] %vm2141_vm14, %v2074_v19  ;;  %v4576_v3 = vld [vmem:[#allocation3 + $0xc0] sm:$0xff] }
 0x2a9   : > { %2636 = vrot.lane.b32.xlu1 %v2573_v44, %s7024_s15  ;;  %v2601_v9 = vpop.permute.xlu1 %2600  ;;  %2685 = vst.msk [vmem:[#allocation3 + $0xa8] sm:$0xf] %vm2670_vm15, %v9336_v26  ;;  %v9689_v26 = vld [vmem:[#allocation9_spill] sm:$0xff] }
 0x2aa   : > { %2684 = vst.msk [vmem:[#allocation3 + $0x9c] sm:$0xf] %vm2670_vm15, %v2601_v9  ;;  %v2619_v28 = vpop.permute.xlu0 %2618 }
 0x2ab   : > { %2693 = vst.msk [vmem:[#allocation3 + $0x108] sm:$0xf] %vm2670_vm15, %v2619_v28 }
 0x2ad   : > { %3982 = vrot.lane.b32.xlu1 %v3887_v40, %s7024_s15  ;;  %v3230_v56 = vpop.permute.xlu1 %3229  ;;  %s6963_s15 = sshll.u32 %s7025_s20, 4  ;;  %s6964_s15 = int_to_ptr.vmem [resolvable:$false] %s6963_s15 }
 0x2ae   : > { %3310 = vst.msk [vmem:[#allocation3 + $0xb8] sm:$0xf] %vm1577_vm13, %v3230_v56  ;;  %v6929_v6 = vld [vmem:[#allocation3 + $0x7c] ss:$12 sps:$4 sm:$0xff]   ;;  %v3965_v13 = vpop.permute.xlu0 %3964  ;;  %v5246_v56 = vpop.f32.mrf.mxu0  ;;  %s6965_s16 = scalar_lea.vmem %s6964_s15, 4096  ;;  %p6966_p0 = scmp.lt.s32.totalorder %s9617_s29, %s6964_s15 }
 0x2af   : > { %3839 = vst.msk [vmem:[#allocation3 + $0xb8] sm:$0xf] %vm2141_vm14, %v9687_v49  ;;  %5120 = vmatprep.mubr.bf16.mxu1 %v6929_v6 }
 0x2b0   : > { %4031 = vst.msk [vmem:[#allocation3 + $0xb8] sm:$0xf] %vm2670_vm15, %v9688_v16  ;;  %4038 = vst.msk [vmem:[#allocation3 + $0x10c] sm:$0xf] %vm2670_vm15, %v3965_v13  ;;  %5121 = vmatmul.mubr.bf16.gmra.mxu1 %v6931_v30  ;;  %v4572_v18 = vld [vmem:[#allocation3 + $0xa8] sm:$0xff] }
 0x2b1   : > { %v2080_v47 = vpop.permute.xlu1 %2079  ;;  %v6934_v11 = vld [vmem:[#allocation3 + $0x90] ss:$12 sps:$4 sm:$0xff]  }
 0x2b2   : > { %2159 = vst.msk [vmem:[#allocation3 + $0xcc] sm:$0xf] %vm2141_vm14, %v2080_v47  ;;  %v1530_v0 = vpop.permute.xlu0 %1529 }
 0x2b3   : > { %2688 = vst.msk [vmem:[#allocation3 + $0xcc] sm:$0xf] %vm2670_vm15, %v9689_v26 }
 0x2b4   : > { %1602 = vst.msk [vmem:[#allocation3 + $0x120] sm:$0xf] %vm1577_vm13, %v1530_v0 }
 0x2b5   : > { %v3226_v17 = vpop.permute.xlu1 %3225 }
 0x2b6   : > { %3308 = vst.msk [vmem:[#allocation3 + $0xa0] sm:$0xf] %vm1577_vm13, %v3226_v17  ;;  %v3248_v8 = vpop.permute.xlu0 %3247 }
 0x2b7   : > { %3837 = vst.msk [vmem:[#allocation3 + $0xa0] sm:$0xf] %vm2141_vm14, %v9366_v51  ;;  %v4582_v51 = vld [vmem:[#allocation3 + $0xe4] sm:$0xff] }
 0x2b8   : > { %4029 = vst.msk [vmem:[#allocation3 + $0xa0] sm:$0xf] %vm2670_vm15, %v9153_v53  ;;  %v6935_v53 = vld [vmem:[#allocation3 + $0xac] ss:$12 sps:$4 sm:$0xff]   ;;  %v6154_v4 = vcombine.low %v4580_v5, %v4582_v51 }
 0x2b9   : > { %v2076_v59 = vpop.permute.xlu1 %2075  ;;  %3319 = vst.msk [vmem:[#allocation3 + $0x124] sm:$0xf] %vm1577_vm13, %v3248_v8  ;;  %v4588_v26 = vld [vmem:[#allocation3 + $0x108] sm:$0xff] }
 0x2ba   : > { %2157 = vst.msk [vmem:[#allocation3 + $0xb4] sm:$0xf] %vm2141_vm14, %v2076_v59  ;;  %v2094_v10 = vpop.permute.xlu0 %2093  ;;  %v4578_v57 = vld [vmem:[#allocation3 + $0xcc] sm:$0xff] }
 0x2bb   : > { %2686 = vst.msk [vmem:[#allocation3 + $0xb4] sm:$0xf] %vm2670_vm15, %v2605_v31  ;;  %v6151_v2 = vcombine.low %v4576_v3, %v4578_v57  ;;  %v4584_v31 = vld [vmem:[#allocation3 + $0xf0] sm:$0xff] }
 0x2bc   : > { %2166 = vst.msk [vmem:[#allocation3 + $0x120] sm:$0xf] %vm2141_vm14, %v2094_v10  ;;  %v6157_v34 = vcombine.low %v4584_v31, %v4586_v24 }
 0x2bd   : > { %v3967_v37 = vpop.permute.xlu1 %3966 }
 0x2be   : > { %4039 = vst.msk [vmem:[#allocation3 + $0x118] sm:$0xf] %vm2670_vm15, %v3967_v37  ;;  %v3777_v43 = vpop.permute.xlu0 %3776 }
 0x2bf   : > { %v6932_v62 = vld [vmem:[#allocation3 + $0x94] ss:$12 sps:$4 sm:$0xff]   ;;  %3848 = vst.msk [vmem:[#allocation3 + $0x124] sm:$0xf] %vm2141_vm14, %v3777_v43 }
 0x2c0   : > { %5128 = vmatprep.mubr.bf16.mxu1 %v6932_v62 }
 0x2c1   : > { %v1532_v14 = vpop.permute.xlu1 %1531  ;;  %5129 = vmatmul.mubr.bf16.gmra.mxu1 %v6934_v11 }
 0x2c2   : > { %1603 = vst.msk [vmem:[#allocation3 + $0x12c] sm:$0xf] %vm1577_vm13, %v1532_v14  ;;  %v2623_v50 = vpop.permute.xlu0 %2622  ;;  %5136 = vmatprep.mubr.bf16.mxu1 %v6935_v53  ;;  %v4574_v32 = vld [vmem:[#allocation3 + $0xb4] sm:$0xff] }
 0x2c3   : > { %2695 = vst.msk [vmem:[#allocation3 + $0x120] sm:$0xf] %vm2670_vm15, %v2623_v50  ;;  %v6148_v63 = vcombine.low %v4572_v18, %v4574_v32 }
 0x2c5   : > { %v3250_v12 = vpop.permute.xlu1 %3249  ;;  %v6943_v40 = vld [vmem:[#allocation3 + $0x10c] ss:$12 sps:$4 sm:$0xff]  }
 0x2c6   : > { %3320 = vst.msk [vmem:[#allocation3 + $0x130] sm:$0xf] %vm1577_vm13, %v3250_v12  ;;  %v3969_v39 = vpop.permute.xlu0 %3968  ;;  %v4590_v49 = vld [vmem:[#allocation3 + $0x114] sm:$0xff] }
 0x2c7   : > { %4040 = vst.msk [vmem:[#allocation3 + $0x124] sm:$0xf] %vm2670_vm15, %v3969_v39  ;;  %v6160_v17 = vcombine.low %v4588_v26, %v4590_v49 }
 0x2c9   : > { %v2096_v35 = vpop.permute.xlu1 %2095  ;;  %5137 = vmatmul.mubr.bf16.gmra.mxu1 %v6148_v63 }
 0x2ca   : > { %2167 = vst.msk [vmem:[#allocation3 + $0x12c] sm:$0xf] %vm2141_vm14, %v2096_v35  ;;  %5144 = vmatprep.mubr.bf16.mxu1 %v6937_v45  ;;  %v1534_v36 = vpop.permute.xlu0 %1533 }
 0x2cb   : > { %1604 = vst.msk [vmem:[#allocation3 + $0x138] sm:$0xf] %vm1577_vm13, %v1534_v36  ;;  %v6545_v15 = vpop.f32.mrf.mxu1 }
 0x2cd   : > { %v3779_v20 = vpop.permute.xlu1 %3778  ;;  %v6546_v52 = vpop.f32.mrf.mxu1 }
 0x2ce   : > { %3849 = vst.msk [vmem:[#allocation3 + $0x130] sm:$0xf] %vm2141_vm14, %v3779_v20  ;;  %v3252_v27 = vpop.permute.xlu0 %3251  ;;  %v6547_v60 = vadd.f32 %v6546_v52, %v6545_v15  ;;  %v4592_v43 = vld [vmem:[#allocation3 + $0x120] sm:$0xff] }
 0x2cf   : > { %3321 = vst.msk [vmem:[#allocation3 + $0x13c] sm:$0xf] %vm1577_vm13, %v3252_v27  ;;  %v6548_v48 = vpop.f32.mrf.mxu1 }
 0x2d0   : > { %v5083_v38 = vadd.f32 %v6547_v60, %v9449_v1 }
 0x2d1   : > { %v2625_v42 = vpop.permute.xlu1 %2624  ;;  %5145 = vmatmul.mubr.bf16.gmra.mxu1 %v6151_v2  ;;  %v6549_v61 = vpop.f32.mrf.mxu1 }
 0x2d2   : > { %2696 = vst.msk [vmem:[#allocation3 + $0x12c] sm:$0xf] %vm2670_vm15, %v2625_v42  ;;  %5152 = vmatprep.mubr.bf16.mxu1 %v6939_v58  ;;  %v2098_v25 = vpop.permute.xlu0 %2097  ;;  %v6550_v19 = vadd.f32 %v6549_v61, %v6548_v48  ;;  %v5244_v9 = vadd.f32 %v5243_v23, %v5083_v38 }
 0x2d3   : > { %2168 = vst.msk [vmem:[#allocation3 + $0x138] sm:$0xf] %vm2141_vm14, %v2098_v25 }
 0x2d4   : > { %v5086_v28 = vadd.f32 %v6550_v19, %v9449_v1  ;;  %v5370_v13 = vmax.f32 %v5244_v9, 0.0 }
 0x2d5   : > { %v3971_v33 = vpop.permute.xlu1 %3970 }
 0x2d6   : > { %4041 = vst.msk [vmem:[#allocation3 + $0x130] sm:$0xf] %vm2670_vm15, %v3971_v33  ;;  %v3781_v55 = vpop.permute.xlu0 %3780  ;;  %v5247_v30 = vadd.f32 %v5246_v56, %v5086_v28 }
 0x2d7   : > { %3850 = vst.msk [vmem:[#allocation3 + $0x13c] sm:$0xf] %vm2141_vm14, %v3781_v55 }
 0x2d8   : > { %v5371_v47 = vmax.f32 %v5247_v30, 0.0 }
 0x2d9   : > { %v1536_v46 = vpop.permute.xlu1 %1535  ;;  %5153 = vmatmul.mubr.bf16.gmra.mxu1 %v6154_v4 }
 0x2da   : > { %1605 = vst.msk [vmem:[#allocation3 + $0x144] sm:$0xf] %vm1577_vm13, %v1536_v46  ;;  %5160 = vmatprep.mubr.bf16.mxu1 %v6941_v7  ;;  %v2627_v54 = vpop.permute.xlu0 %2626  ;;  %v5402_v8 = vpack.c.bf16 %v5371_v47, %v5370_v13 }
 0x2db   : > { %2697 = vst.msk [vmem:[#allocation3 + $0x138] sm:$0xf] %vm2670_vm15, %v2627_v54 }
 0x2dc   : > { %6765 = vmatprep.mubr.msk.bf16.mxu0 %vm4999_vm11, %v5402_v8 }
 0x2dd   : > { %v3254_v21 = vpop.permute.xlu1 %3253  ;;  %v6946_v10 = vld [vmem:[#allocation3 + $0x124] ss:$12 sps:$4 sm:$0xff]  }
 0x2de   : > { %3322 = vst.msk [vmem:[#allocation3 + $0x148] sm:$0xf] %vm1577_vm13, %v3254_v21  ;;  %v3973_v22 = vpop.permute.xlu0 %3972  ;;  %v4594_v62 = vld [vmem:[#allocation3 + $0x12c] sm:$0xff] }
 0x2df   : > { %4042 = vst.msk [vmem:[#allocation3 + $0x13c] sm:$0xf] %vm2670_vm15, %v3973_v22  ;;  %v6163_v53 = vcombine.low %v4592_v43, %v4594_v62 }
 0x2e1   : > { %v2100_v44 = vpop.permute.xlu1 %2099  ;;  %5161 = vmatmul.mubr.bf16.gmra.mxu1 %v6157_v34 }
 0x2e2   : > { %2169 = vst.msk [vmem:[#allocation3 + $0x144] sm:$0xf] %vm2141_vm14, %v2100_v44  ;;  %5168 = vmatprep.mubr.bf16.mxu1 %v6943_v40  ;;  %v1538_v6 = vpop.permute.xlu0 %1537  ;;  %v6735_v40 = vpop.f32.mrf.mxu0 }
 0x2e3   : > { %1606 = vst.msk [vmem:[#allocation3 + $0x150] sm:$0xf] %vm1577_vm13, %v1538_v6 }
 0x2e4   : > { %v5259_v28 = vpop.f32.mrf.mxu0 }
 0x2e5   : > { %v3783_v16 = vpop.permute.xlu1 %3782 }
 0x2e6   : > { %3851 = vst.msk [vmem:[#allocation3 + $0x148] sm:$0xf] %vm2141_vm14, %v3783_v16  ;;  %v3256_v0 = vpop.permute.xlu0 %3255  ;;  %v4596_v63 = vld [vmem:[#allocation3 + $0x138] sm:$0xff]  ;;  %v6736_v47 = vpop.f32.mrf.mxu0 }
 0x2e7   : > { %3323 = vst.msk [vmem:[#allocation3 + $0x154] sm:$0xf] %vm1577_vm13, %v3256_v0 }
 0x2e9   : > { %v2629_v59 = vpop.permute.xlu1 %2628  ;;  %5169 = vmatmul.mubr.bf16.gmra.mxu1 %v6160_v17 }
 0x2ea   : > { %2698 = vst.msk [vmem:[#allocation3 + $0x144] sm:$0xf] %vm2670_vm15, %v2629_v59  ;;  %5176 = vmatprep.mubr.bf16.mxu1 %v6946_v10  ;;  %v2102_v37 = vpop.permute.xlu0 %2101  ;;  %v5262_v59 = vpop.f32.mrf.mxu0 }
 0x2eb   : > { %2170 = vst.msk [vmem:[#allocation3 + $0x150] sm:$0xf] %vm2141_vm14, %v2102_v37 }
 0x2ef   : > { %v3975_v11 = vpop.permute.xlu1 %3974  ;;  %v3785_v14 = vpop.permute.xlu0 %3784 }
 0x2f0   : > { %4043 = vst.msk [vmem:[#allocation3 + $0x148] sm:$0xf] %vm2670_vm15, %v3975_v11  ;;  %v6551_v3 = vpop.f32.mrf.mxu1 }
 0x2f1   : > { %3852 = vst.msk [vmem:[#allocation3 + $0x154] sm:$0xf] %vm2141_vm14, %v3785_v14  ;;  %5177 = vmatmul.mubr.bf16.gmra.mxu1 %v6163_v53 }
 0x2f2   : > { %v6552_v27 = vpop.f32.mrf.mxu1 }
 0x2f3   : > { %v1540_v50 = vpop.permute.xlu1 %1539  ;;  %v6553_v2 = vadd.f32 %v6552_v27, %v6551_v3 }
 0x2f4   : > { %1607 = vst.msk [vmem:[#allocation3 + $0x15c] sm:$0xf] %vm1577_vm13, %v1540_v50  ;;  %v2631_v12 = vpop.permute.xlu0 %2630  ;;  %v6554_v25 = vpop.f32.mrf.mxu1 }
 0x2f5   : > { %2699 = vst.msk [vmem:[#allocation3 + $0x150] sm:$0xf] %vm2670_vm15, %v2631_v12  ;;  %v5091_v51 = vadd.f32 %v6553_v2, %v9449_v1 }
 0x2f6   : > { %v6555_v33 = vpop.f32.mrf.mxu1 }
 0x2f7   : > { %v3258_v32 = vpop.permute.xlu1 %3257  ;;  %v4598_v18 = vld [vmem:[#allocation3 + $0x144] sm:$0xff]  ;;  %v6556_v5 = vadd.f32 %v6555_v33, %v6554_v25  ;;  %v5252_v46 = vadd.f32 %v9442_v41, %v5091_v51 }
 0x2f8   : > { %v6948_v39 = vld [vmem:[#allocation3 + $0x13c] ss:$12 sps:$4 sm:$0xff]   ;;  %3324 = vst.msk [vmem:[#allocation3 + $0x160] sm:$0xf] %vm1577_vm13, %v3258_v32  ;;  %v6166_v45 = vcombine.low %v4596_v63, %v4598_v18 }
 0x2f9   : > { %5184 = vmatprep.mubr.bf16.mxu1 %v6948_v39  ;;  %v3977_v35 = vpop.permute.xlu0 %3976  ;;  %v5094_v7 = vadd.f32 %v6556_v5, %v9449_v1  ;;  %v5372_v54 = vmax.f32 %v5252_v46, 0.0 }
 0x2fa   : > { %4044 = vst.msk [vmem:[#allocation3 + $0x154] sm:$0xf] %vm2670_vm15, %v3977_v35  ;;  %5185 = vmatmul.mubr.bf16.gmra.mxu1 %v6166_v45 }
 0x2fb   : > { %v2104_v36 = vpop.permute.xlu1 %2103  ;;  %v5255_v15 = vadd.f32 %v9453_v29, %v5094_v7 }
 0x2fc   : > { %2171 = vst.msk [vmem:[#allocation3 + $0x15c] sm:$0xf] %vm2141_vm14, %v2104_v36 }
 0x2fd   : > { %v5373_v24 = vmax.f32 %v5255_v15, 0.0 }
 0x2fe   : > { %v1542_v57 = vpop.permute.xlu0 %1541 }
 0x2ff   : > { %v3787_v20 = vpop.permute.xlu1 %3786  ;;  %1608 = vst.msk [vmem:[#allocation3 + $0x168] sm:$0xf] %vm1577_vm13, %v1542_v57  ;;  %v5403_v21 = vpack.c.bf16 %v5373_v24, %v5372_v54 }
 0x300   : > { %3853 = vst.msk [vmem:[#allocation3 + $0x160] sm:$0xf] %vm2141_vm14, %v3787_v20  ;;  %v6739_v20 = vpop.f32.mrf.mxu0 }
 0x301   : > { %v4600_v41 = vld [vmem:[#allocation3 + $0x150] sm:$0xff]  ;;  %6766 = vmatmul.mubr.msk.bf16.vlgmr.msra.gmra.mxu0 %vm4999_vm11, %v5403_v21 }
 0x302   : > { %v3260_v42 = vpop.permute.xlu0 %3259  ;;  %v5275_v27 = vpop.f32.mrf.mxu0 }
 0x303   : > { %v2633_v58 = vpop.permute.xlu1 %2632  ;;  %3325 = vst.msk [vmem:[#allocation3 + $0x16c] sm:$0xf] %vm1577_vm13, %v3260_v42 }
 0x304   : > { %2700 = vst.msk [vmem:[#allocation3 + $0x15c] sm:$0xf] %vm2670_vm15, %v2633_v58  ;;  %v6740_v51 = vpop.f32.mrf.mxu0 }
 0x306   : > { %v2106_v55 = vpop.permute.xlu0 %2105  ;;  %v5278_v46 = vpop.f32.mrf.mxu0 }
 0x307   : > { %v3979_v4 = vpop.permute.xlu1 %3978  ;;  %2172 = vst.msk [vmem:[#allocation3 + $0x168] sm:$0xf] %vm2141_vm14, %v2106_v55 }
 0x308   : > { %4045 = vst.msk [vmem:[#allocation3 + $0x160] sm:$0xf] %vm2670_vm15, %v3979_v4 }
 0x30a   : > { %v3789_v23 = vpop.permute.xlu0 %3788 }
 0x30b   : > { %v1544_v52 = vpop.permute.xlu1 %1543  ;;  %3854 = vst.msk [vmem:[#allocation3 + $0x16c] sm:$0xf] %vm2141_vm14, %v3789_v23 }
 0x30c   : > { %1609 = vst.msk [vmem:[#allocation3 + $0x174] sm:$0xf] %vm1577_vm13, %v1544_v52 }
 0x30e   : > { %v2635_v60 = vpop.permute.xlu0 %2634 }
 0x30f   : > { %v3262_v48 = vpop.permute.xlu1 %3261  ;;  %2701 = vst.msk [vmem:[#allocation3 + $0x168] sm:$0xf] %vm2670_vm15, %v2635_v60  ;;  %v4602_v31 = vld [vmem:[#allocation3 + $0x15c] sm:$0xff] }
 0x310   : > { %v6952_v38 = vld [vmem:[#allocation3 + $0x154] ss:$12 sps:$4 sm:$0xff]   ;;  %3326 = vst.msk [vmem:[#allocation3 + $0x178] sm:$0xf] %vm1577_vm13, %v3262_v48  ;;  %v6169_v29 = vcombine.low %v4600_v41, %v4602_v31 }
 0x311   : > { %5192 = vmatprep.mubr.bf16.mxu1 %v6952_v38 }
 0x312   : > { %v3981_v61 = vpop.permute.xlu0 %3980  ;;  %5193 = vmatmul.mubr.bf16.gmra.mxu1 %v6169_v29 }
 0x313   : > { %v2108_v22 = vpop.permute.xlu1 %2107  ;;  %4046 = vst.msk [vmem:[#allocation3 + $0x16c] sm:$0xf] %vm2670_vm15, %v3981_v61 }
 0x314   : > { %2173 = vst.msk [vmem:[#allocation3 + $0x174] sm:$0xf] %vm2141_vm14, %v2108_v22 }
 0x317   : > { %v3791_v34 = vpop.permute.xlu1 %3790 }
 0x318   : > { %3855 = vst.msk [vmem:[#allocation3 + $0x178] sm:$0xf] %vm2141_vm14, %v3791_v34 }
 0x31b   : > { %v2637_v44 = vpop.permute.xlu1 %2636 }
 0x31c   : > { %2702 = vst.msk [vmem:[#allocation3 + $0x174] sm:$0xf] %vm2670_vm15, %v2637_v44  ;;  %v6743_v44 = vpop.f32.mrf.mxu0 }
 0x31f   : > { %v3983_v19 = vpop.permute.xlu1 %3982  ;;  %v6557_v9 = vpop.f32.mrf.mxu1 }
 0x320   : > { %4047 = vst.msk [vmem:[#allocation3 + $0x178] sm:$0xf] %vm2670_vm15, %v3983_v19 }
 0x321   : > { %v6558_v56 = vpop.f32.mrf.mxu1 }
 0x322   : > { %v6559_v6 = vadd.f32 %v6558_v56, %v6557_v9  ;;  %v5291_v9 = vpop.f32.mrf.mxu0 }
 0x323   : > { %v6956_v49 = vld [vmem:[#allocation3 + $0x168] ss:$12 sps:$4 sm:$0xff]   ;;  %v6560_v16 = vpop.f32.mrf.mxu1 }
 0x324   : > { %v5099_v13 = vadd.f32 %v6559_v6, %v9449_v1 }
 0x325   : > { %v6561_v26 = vpop.f32.mrf.mxu1 }
 0x326   : > { %v6562_v0 = vadd.f32 %v6561_v26, %v6560_v16  ;;  %v5260_v17 = vadd.f32 %v5259_v28, %v5099_v13 }
 0x327   : > { %v6954_v30 = vld [vmem:[#allocation3 + $0x16c] ss:$12 sps:$4 sm:$0xff]  }
 0x328   : > { %5200 = vmatprep.mubr.bf16.mxu1 %v6954_v30  ;;  %v5102_v8 = vadd.f32 %v6562_v0, %v9449_v1  ;;  %v5374_v37 = vmax.f32 %v5260_v17, 0.0 }
 0x329   : > { %5201 = vmatmul.mubr.bf16.gmra.mxu1 %v6956_v49  ;;  %v6744_v49 = vpop.f32.mrf.mxu0 }
 0x32a   : > { %v5263_v10 = vadd.f32 %v5262_v59, %v5102_v8 }
 0x32b   : > { %v5294_v17 = vpop.f32.mrf.mxu0 }
 0x32c   : > { %v5375_v62 = vmax.f32 %v5263_v10, 0.0 }
 0x32e   : > { %v5404_v11 = vpack.c.bf16 %v5375_v62, %v5374_v37 }
 0x330   : > { %6769 = vmatprep.mubr.msk.bf16.mxu0 %vm4999_vm11, %v5404_v11 }
 0x342   : > { %v6563_v43 = vpop.f32.mrf.mxu1 }
 0x344   : > { %v6564_v14 = vpop.f32.mrf.mxu1 }
 0x345   : > { %v6565_v53 = vadd.f32 %v6564_v14, %v6563_v43  ;;  %v6747_v14 = vpop.f32.mrf.mxu0 }
 0x346   : > { %v6566_v50 = vpop.f32.mrf.mxu1 }
 0x347   : > { %v5107_v12 = vadd.f32 %v6565_v53, %v9449_v1 }
 0x348   : > { %v6567_v32 = vpop.f32.mrf.mxu1 }
 0x349   : > { %v6568_v18 = vadd.f32 %v6567_v32, %v6566_v50  ;;  %v5268_v39 = vadd.f32 %v6735_v40, %v5107_v12 }
 0x34b   : > { %v5110_v63 = vadd.f32 %v6568_v18, %v9449_v1  ;;  %v5376_v45 = vmax.f32 %v5268_v39, 0.0 }
 0x34d   : > { %v5271_v35 = vadd.f32 %v6736_v47, %v5110_v63  ;;  %v5307_v63 = vpop.f32.mrf.mxu0 }
 0x34f   : > { %v5377_v36 = vmax.f32 %v5271_v35, 0.0 }
 0x351   : > { %v5405_v57 = vpack.c.bf16 %v5377_v36, %v5376_v45 }
 0x353   : > { %6770 = vmatmul.mubr.msk.bf16.gmra.mxu0 %vm4999_vm11, %v5405_v57 }
 0x35d   : > { %v6569_v3 = vpop.f32.mrf.mxu1 }
 0x35f   : > { %v6570_v2 = vpop.f32.mrf.mxu1 }
 0x360   : > { %v6571_v42 = vadd.f32 %v6570_v2, %v6569_v3  ;;  %v6748_v2 = vpop.f32.mrf.mxu0 }
 0x361   : > { %v6572_v58 = vpop.f32.mrf.mxu1 }
 0x362   : > { %v5115_v25 = vadd.f32 %v6571_v42, %v9449_v1 }
 0x363   : > { %v6573_v33 = vpop.f32.mrf.mxu1 }
 0x364   : > { %v6574_v5 = vadd.f32 %v6573_v33, %v6572_v58  ;;  %v5276_v55 = vadd.f32 %v5275_v27, %v5115_v25 }
 0x366   : > { %v5118_v4 = vadd.f32 %v6574_v5, %v9449_v1  ;;  %v5378_v15 = vmax.f32 %v5276_v55, 0.0  ;;  %v5310_v55 = vpop.f32.mrf.mxu0 }
 0x368   : > { %v5279_v7 = vadd.f32 %v5278_v46, %v5118_v4 }
 0x36a   : > { %v5379_v23 = vmax.f32 %v5279_v7, 0.0 }
 0x36c   : > { %v5406_v52 = vpack.c.bf16 %v5379_v23, %v5378_v15 }
 0x36e   : > { %6773 = vmatprep.mubr.msk.bf16.mxu0 %vm4999_vm11, %v5406_v52 }
 0x370   : > { %v6575_v54 = vpop.f32.mrf.mxu1 }
 0x372   : > { %v6576_v24 = vpop.f32.mrf.mxu1 }
 0x373   : > { %v6577_v21 = vadd.f32 %v6576_v24, %v6575_v54  ;;  %v6751_v24 = vpop.f32.mrf.mxu0 }
 0x374   : > { %v6578_v60 = vpop.f32.mrf.mxu1 }
 0x375   : > { %v5123_v48 = vadd.f32 %v6577_v21, %v9449_v1 }
 0x376   : > { %v6579_v41 = vpop.f32.mrf.mxu1 }
 0x377   : > { %v6580_v31 = vadd.f32 %v6579_v41, %v6578_v60  ;;  %v5284_v38 = vadd.f32 %v6739_v20, %v5123_v48 }
 0x379   : > { %v5126_v29 = vadd.f32 %v6580_v31, %v9449_v1  ;;  %v5380_v22 = vmax.f32 %v5284_v38, 0.0 }
 0x37b   : > { %v5287_v61 = vadd.f32 %v6740_v51, %v5126_v29  ;;  %v5323_v29 = vpop.f32.mrf.mxu0 }
 0x37d   : > { %v5381_v34 = vmax.f32 %v5287_v61, 0.0 }
 0x37f   : > { %v5407_v19 = vpack.c.bf16 %v5381_v34, %v5380_v22 }
 0x381   : > { %v6581_v40 = vpop.f32.mrf.mxu1  ;;  %6774 = vmatmul.mubr.msk.bf16.gmra.mxu0 %vm4999_vm11, %v5407_v19 }
 0x383   : > { %v6582_v28 = vpop.f32.mrf.mxu1 }
 0x384   : > { %v6583_v56 = vadd.f32 %v6582_v28, %v6581_v40  ;;  %v6752_v28 = vpop.f32.mrf.mxu0 }
 0x385   : > { %v6584_v6 = vpop.f32.mrf.mxu1 }
 0x386   : > { %v5131_v30 = vadd.f32 %v6583_v56, %v9449_v1 }
 0x387   : > { %v6585_v16 = vpop.f32.mrf.mxu1 }
 0x388   : > { %v6586_v13 = vadd.f32 %v6585_v16, %v6584_v6  ;;  %v5292_v26 = vadd.f32 %v5291_v9, %v5131_v30 }
 0x389   : > { %v6587_v47 = vpop.f32.mrf.mxu1 }
 0x38a   : > { %v5134_v0 = vadd.f32 %v6586_v13, %v9449_v1  ;;  %v5382_v62 = vmax.f32 %v5292_v26, 0.0 }
 0x38b   : > { %v6588_v8 = vpop.f32.mrf.mxu1 }
 0x38c   : > { %v5295_v59 = vadd.f32 %v5294_v17, %v5134_v0  ;;  %v6589_v10 = vadd.f32 %v6588_v8, %v6587_v47  ;;  %v5326_v47 = vpop.f32.mrf.mxu0 }
 0x38d   : > { %v6590_v37 = vpop.f32.mrf.mxu1 }
 0x38e   : > { %v5383_v11 = vmax.f32 %v5295_v59, 0.0  ;;  %v5139_v43 = vadd.f32 %v6589_v10, %v9449_v1 }
 0x38f   : > { %v6591_v53 = vpop.f32.mrf.mxu1 }
 0x390   : > { %v5408_v50 = vpack.c.bf16 %v5383_v11, %v5382_v62  ;;  %v6592_v12 = vadd.f32 %v6591_v53, %v6590_v37  ;;  %v5300_v18 = vadd.f32 %v6743_v44, %v5139_v43  ;;  %v6755_v62 = vpop.f32.mrf.mxu0 }
 0x391   : > { %v6593_v32 = vpop.f32.mrf.mxu1 }
 0x392   : > { %v5142_v39 = vadd.f32 %v6592_v12, %v9449_v1  ;;  %6777 = vmatprep.mubr.msk.bf16.mxu0 %vm4999_vm11, %v5408_v50  ;;  %v5384_v20 = vmax.f32 %v5300_v18, 0.0 }
 0x393   : > { %v6594_v35 = vpop.f32.mrf.mxu1 }
 0x394   : > { %v5303_v45 = vadd.f32 %v6744_v49, %v5142_v39  ;;  %v6595_v36 = vadd.f32 %v6594_v35, %v6593_v32  ;;  %v5339_v32 = vpop.f32.mrf.mxu0 }
 0x395   : > { %v6596_v57 = vpop.f32.mrf.mxu1 }
 0x396   : > { %v5385_v3 = vmax.f32 %v5303_v45, 0.0  ;;  %v5147_v27 = vadd.f32 %v6595_v36, %v9449_v1 }
 0x397   : > { %v6597_v42 = vpop.f32.mrf.mxu1 }
 0x398   : > { %v5409_v58 = vpack.c.bf16 %v5385_v3, %v5384_v20  ;;  %v6598_v25 = vadd.f32 %v6597_v42, %v6596_v57  ;;  %v5308_v33 = vadd.f32 %v5307_v63, %v5147_v27  ;;  %v6756_v20 = vpop.f32.mrf.mxu0 }
 0x399   : > { %v6599_v51 = vpop.f32.mrf.mxu1 }
 0x39a   : > { %v5150_v5 = vadd.f32 %v6598_v25, %v9449_v1  ;;  %6778 = vmatmul.mubr.msk.bf16.gmra.mxu0 %vm4999_vm11, %v5409_v58  ;;  %v5386_v23 = vmax.f32 %v5308_v33, 0.0 }
 0x39b   : > { %v6600_v4 = vpop.f32.mrf.mxu1 }
 0x39c   : > { %v5311_v46 = vadd.f32 %v5310_v55, %v5150_v5  ;;  %v6601_v7 = vadd.f32 %v6600_v4, %v6599_v51  ;;  %v5342_v51 = vpop.f32.mrf.mxu0 }
 0x39d   : > { %v6602_v15 = vpop.f32.mrf.mxu1 }
 0x39e   : > { %v5387_v52 = vmax.f32 %v5311_v46, 0.0  ;;  %v5155_v54 = vadd.f32 %v6601_v7, %v9449_v1  ;;  %v9524_v46 = vpop.f32.mrf.mxu0 }
 0x39f   : > { %v6603_v21 = vpop.f32.mrf.mxu1 }
 0x3a0   : > { %v5410_v60 = vpack.c.bf16 %v5387_v52, %v5386_v23  ;;  %v6604_v48 = vadd.f32 %v6603_v21, %v6602_v15  ;;  %v5316_v31 = vadd.f32 %v6747_v14, %v5155_v54  ;;  %v5355_v21 = vpop.f32.mrf.mxu0 }
 0x3a1   : > { %v6605_v41 = vpop.f32.mrf.mxu1 }
 0x3a2   : > { %v5158_v38 = vadd.f32 %v6604_v48, %v9449_v1  ;;  %6781 = vmatprep.mubr.msk.bf16.mxu0 %vm4999_vm11, %v5410_v60  ;;  %v5388_v19 = vmax.f32 %v5316_v31, 0.0  ;;  %v6760_v31 = vpop.f32.mrf.mxu0 }
 0x3a3   : > { %v6606_v61 = vpop.f32.mrf.mxu1 }
 0x3a4   : > { %v5319_v22 = vadd.f32 %v6748_v2, %v5158_v38  ;;  %v6607_v34 = vadd.f32 %v6606_v61, %v6605_v41 }
 0x3a5   : > { %v6608_v44 = vpop.f32.mrf.mxu1 }
 0x3a6   : > { %v5389_v40 = vmax.f32 %v5319_v22, 0.0  ;;  %v5163_v9 = vadd.f32 %v6607_v34, %v9449_v1  ;;  %v5358_v22 = vpop.f32.mrf.mxu0  ;;  %v6475_v34 = vld [vmem:[%s7129_s23 + $0x8] sm:$0xff]  }
 0x3a7   : > { %v6609_v56 = vpop.f32.mrf.mxu1 }
 0x3a8   : > { %v5411_v6 = vpack.c.bf16 %v5389_v40, %v5388_v19  ;;  %v6610_v30 = vadd.f32 %v6609_v56, %v6608_v44  ;;  %v5324_v16 = vadd.f32 %v5323_v29, %v5163_v9  ;;  %v9534_v44 = vld [vmem:[%s9670_s6] ss:$0 sm:$0xff]  ;;  %v6337_v9 = vunpack.c.l.bf16 %v6475_v34 }
 0x3a9   : > { %v6611_v49 = vpop.f32.mrf.mxu1  ;;  %v6332_v19 = vld [vmem:[%s7129_s23] sm:$0xff]  }
 0x3aa   : > { %v5166_v13 = vadd.f32 %v6610_v30, %v9449_v1  ;;  %6782 = vmatmul.mubr.msk.bf16.gmra.mxu0 %vm4999_vm11, %v5411_v6  ;;  %v5390_v59 = vmax.f32 %v5324_v16, 0.0  ;;  %v6333_v6 = vunpack.c.l.bf16 %v6332_v19  ;;  %v6338_v16 = vunpack.c.h.bf16 %v6475_v34 }
 0x3ab   : > { %v6612_v26 = vpop.f32.mrf.mxu1 }
 0x3ac   : > { %v5327_v0 = vadd.f32 %v5326_v47, %v5166_v13  ;;  %v6613_v17 = vadd.f32 %v6612_v26, %v6611_v49 }
 0x3ad   : > { %v6614_v8 = vpop.f32.mrf.mxu1 }
 0x3ae   : > { %v5391_v10 = vmax.f32 %v5327_v0, 0.0  ;;  %v5171_v37 = vadd.f32 %v6613_v17, %v9449_v1 }
 0x3af   : > { %v6615_v11 = vpop.f32.mrf.mxu1 }
 0x3b0   : > { %v5412_v43 = vpack.c.bf16 %v5391_v10, %v5390_v59  ;;  %v6616_v14 = vadd.f32 %v6615_v11, %v6614_v8  ;;  %v5332_v50 = vadd.f32 %v6751_v24, %v5171_v37  ;;  %v6334_v8 = vunpack.c.h.bf16 %v6332_v19 }
 0x3b1   : > { %v6617_v53 = vpop.f32.mrf.mxu1 }
 0x3b2   : > { %v5174_v12 = vadd.f32 %v6616_v14, %v9449_v1  ;;  %6785 = vmatprep.mubr.msk.bf16.mxu0 %vm4999_vm11, %v5412_v43  ;;  %v5392_v45 = vmax.f32 %v5332_v50, 0.0 }
 0x3b3   : > { %v6618_v18 = vpop.f32.mrf.mxu1 }
 0x3b4   : > { %v5335_v39 = vadd.f32 %v6752_v28, %v5174_v12  ;;  %v6619_v63 = vadd.f32 %v6618_v18, %v6617_v53 }
 0x3b5   : > { %v6620_v35 = vpop.f32.mrf.mxu1 }
 0x3b6   : > { %v5393_v36 = vmax.f32 %v5335_v39, 0.0  ;;  %v5179_v57 = vadd.f32 %v6619_v63, %v9449_v1 }
 0x3b7   : > { %v6621_v3 = vpop.f32.mrf.mxu1 }
 0x3b8   : > { %v5413_v27 = vpack.c.bf16 %v5393_v36, %v5392_v45  ;;  %v6622_v2 = vadd.f32 %v6621_v3, %v6620_v35  ;;  %v5340_v58 = vadd.f32 %v5339_v32, %v5179_v57 }
 0x3ba   : > { %v6623_v42 = vpop.f32.mrf.mxu1  ;;  %v5182_v25 = vadd.f32 %v6622_v2, %v9449_v1  ;;  %6786 = vmatmul.mubr.msk.bf16.gmra.mxu0 %vm4999_vm11, %v5413_v27  ;;  %v5394_v7 = vmax.f32 %v5340_v58, 0.0 }
 0x3bc   : > { %v6624_v33 = vpop.f32.mrf.mxu1  ;;  %v5343_v5 = vadd.f32 %v5342_v51, %v5182_v25 }
 0x3bd   : > { %v6625_v55 = vadd.f32 %v6624_v33, %v6623_v42 }
 0x3be   : > { %v6626_v4 = vpop.f32.mrf.mxu1  ;;  %v5395_v15 = vmax.f32 %v5343_v5, 0.0 }
 0x3bf   : > { %v5187_v23 = vadd.f32 %v6625_v55, %v9449_v1 }
 0x3c0   : > { %v6627_v52 = vpop.f32.mrf.mxu1  ;;  %v5414_v54 = vpack.c.bf16 %v5395_v15, %v5394_v7 }
 0x3c1   : > { %v6628_v24 = vadd.f32 %v6627_v52, %v6626_v4  ;;  %v5348_v60 = vadd.f32 %v6755_v62, %v5187_v23  ;;  %v6767_v40 = vpop.f32.mrf.mxu0 }
 0x3c2   : > { %6789 = vmatprep.mubr.msk.bf16.mxu0 %vm4999_vm11, %v5414_v54  ;;  %v5564_v28 = vadd.f32 %v6767_v40, %v9534_v44  ;;  %v6477_v54 = vld [vmem:[%s7129_s23 + $0x18] sm:$0xff]  }
 0x3c3   : > { %v5190_v48 = vadd.f32 %v6628_v24, %v9449_v1  ;;  %v5396_v38 = vmax.f32 %v5348_v60, 0.0  ;;  %v5555_v30 = vpop.f32.mrf.mxu0  ;;  %v6345_v60 = vunpack.c.l.bf16 %v6477_v54 }
 0x3c4   : > { %v5556_v49 = vadd.f32 %v9534_v44, %v5555_v30  ;;  %v5716_v26 = vadd.f32 %v6337_v9, %v5564_v28 }
 0x3c5   : > { %v5351_v41 = vadd.f32 %v6756_v20, %v5190_v48  ;;  %v6768_v47 = vpop.f32.mrf.mxu0 }
 0x3c6   : > { %v5567_v17 = vadd.f32 %v6768_v47, %v9534_v44  ;;  %v5714_v59 = vadd.f32 %v6333_v6, %v5556_v49  ;;  %v5748_v53 = vmax.f32 %v5716_v26, 0.0  ;;  %v6479_v47 = vld [vmem:[%s7129_s23 + $0x28] sm:$0xff]  }
 0x3c7   : > { %v5397_v29 = vmax.f32 %v5351_v41, 0.0  ;;  %v5558_v37 = vpop.f32.mrf.mxu0 }
 0x3c8   : > { %v5717_v11 = vadd.f32 %v6338_v16, %v5567_v17  ;;  %v5559_v43 = vadd.f32 %v9534_v44, %v5558_v37  ;;  %v5746_v18 = vmax.f32 %v5714_v59, 0.0  ;;  %v6353_v17 = vunpack.c.l.bf16 %v6479_v47 }
 0x3c9   : > { %v5415_v61 = vpack.c.bf16 %v5397_v29, %v5396_v38 }
 0x3ca   : > { %v5749_v50 = vmax.f32 %v5717_v11, 0.0  ;;  %v5715_v12 = vadd.f32 %v6334_v8, %v5559_v43 }
 0x3cb   : > { %6790 = vmatmul.mubr.msk.bf16.gmra.mxu0 %vm4999_vm11, %v5415_v61 }
 0x3cc   : > { %v6403_v63 = vpack.c.bf16 %v5749_v50, %v5748_v53  ;;  %v5747_v35 = vmax.f32 %v5715_v12, 0.0 }
 0x3ce   : > { %6490 = vst [vmem:[%s9546_s22 + $0x8] sm:$0xff] %v6403_v63   ;;  %v6398_v36 = vpack.c.bf16 %v5747_v35, %v5746_v18 }
 0x3d0   : > { %6399 = vst [vmem:[%s9546_s22] sm:$0xff] %v6398_v36  }
 0x3d2   : > { %v6629_v56 = vpop.f32.mrf.mxu1 }
 0x3d4   : > { %v6630_v13 = vpop.f32.mrf.mxu1 }
 0x3d5   : > { %v6631_v0 = vadd.f32 %v6630_v13, %v6629_v56 }
 0x3d6   : > { %v6632_v10 = vpop.f32.mrf.mxu1 }
 0x3d7   : > { %v5195_v62 = vadd.f32 %v6631_v0, %v9449_v1  ;;  %v6478_v0 = vld [vmem:[%s7129_s23 + $0x20] sm:$0xff]  }
 0x3d8   : > { %v6633_v14 = vpop.f32.mrf.mxu1  ;;  %v6350_v53 = vunpack.c.h.bf16 %v6478_v0 }
 0x3d9   : > { %v6634_v32 = vadd.f32 %v6633_v14, %v6632_v10  ;;  %v5356_v39 = vadd.f32 %v5355_v21, %v5195_v62  ;;  %v6476_v21 = vld [vmem:[%s7129_s23 + $0x10] sm:$0xff]   ;;  %v6349_v10 = vunpack.c.l.bf16 %v6478_v0  ;;  %v6354_v62 = vunpack.c.h.bf16 %v6479_v47 }
 0x3da   : > { %v6341_v38 = vunpack.c.l.bf16 %v6476_v21 }
 0x3db   : > { %v5198_v45 = vadd.f32 %v6634_v32, %v9449_v1  ;;  %v5398_v20 = vmax.f32 %v5356_v39, 0.0 }
 0x3dd   : > { %v5359_v57 = vadd.f32 %v5358_v22, %v5198_v45  ;;  %v6342_v22 = vunpack.c.h.bf16 %v6476_v21 }
 0x3df   : > { %v5399_v3 = vmax.f32 %v5359_v57, 0.0 }
 0x3e1   : > { %v5416_v27 = vpack.c.bf16 %v5399_v3, %v5398_v20  ;;  %v6481_v3 = vld [vmem:[%s7129_s23 + $0x38] sm:$0xff]  }
 0x3e3   : > { %6793 = vmatprep.mubr.msk.bf16.mxu0 %vm4999_vm11, %v5416_v27 }
 0x3e9   : > { %v6635_v2 = vpop.f32.mrf.mxu1 }
 0x3eb   : > { %v6636_v42 = vpop.f32.mrf.mxu1 }
 0x3ec   : > { %v6637_v58 = vadd.f32 %v6636_v42, %v6635_v2  ;;  %v6480_v2 = vld [vmem:[%s7129_s23 + $0x30] sm:$0xff]   ;;  %v6361_v42 = vunpack.c.l.bf16 %v6481_v3 }
 0x3ed   : > { %v6638_v25 = vpop.f32.mrf.mxu1 }
 0x3ee   : > { %v5203_v51 = vadd.f32 %v6637_v58, %v9449_v1 }
 0x3ef   : > { %v6639_v33 = vpop.f32.mrf.mxu1 }
 0x3f0   : > { %v6640_v5 = vadd.f32 %v6639_v33, %v6638_v25  ;;  %v5364_v55 = vadd.f32 %v9524_v46, %v5203_v51  ;;  %v6346_v46 = vunpack.c.h.bf16 %v6477_v54  ;;  %v6357_v51 = vunpack.c.l.bf16 %v6480_v2 }
 0x3f2   : > { %v5206_v4 = vadd.f32 %v6640_v5, %v9449_v1  ;;  %v5400_v15 = vmax.f32 %v5364_v55, 0.0  ;;  %v6362_v5 = vunpack.c.h.bf16 %v6481_v3 }
 0x3f4   : > { %v5367_v7 = vadd.f32 %v6760_v31, %v5206_v4 }
 0x3f6   : > { %v5401_v23 = vmax.f32 %v5367_v7, 0.0 }
 0x3f8   : > { %v5417_v52 = vpack.c.bf16 %v5401_v23, %v5400_v15  ;;  %v6358_v15 = vunpack.c.h.bf16 %v6480_v2 }
 0x3fa   : > { %6794 = vmatmul.mubr.msk.bf16.gmra.mxu0 %vm4999_vm11, %v5417_v52 }
 0x413   : > { %v6771_v24 = vpop.f32.mrf.mxu0 }
 0x414   : > { %v5580_v48 = vadd.f32 %v6771_v24, %v9534_v44 }
 0x415   : > { %v5571_v41 = vpop.f32.mrf.mxu0 }
 0x416   : > { %v5572_v29 = vadd.f32 %v9534_v44, %v5571_v41  ;;  %v5720_v1 = vadd.f32 %v6345_v60, %v5580_v48 }
 0x417   : > { %v6772_v61 = vpop.f32.mrf.mxu0 }
 0x418   : > { %v5583_v31 = vadd.f32 %v6772_v61, %v9534_v44  ;;  %v5718_v19 = vadd.f32 %v6341_v38, %v5572_v29  ;;  %v5752_v28 = vmax.f32 %v5720_v1, 0.0  ;;  %v6483_v61 = vld [vmem:[%s7129_s23 + $0x48] sm:$0xff]  }
 0x419   : > { %v5574_v34 = vpop.f32.mrf.mxu0 }
 0x41a   : > { %v5721_v40 = vadd.f32 %v6346_v46, %v5583_v31  ;;  %v5575_v9 = vadd.f32 %v9534_v44, %v5574_v34  ;;  %v5750_v30 = vmax.f32 %v5718_v19, 0.0  ;;  %v6482_v31 = vld [vmem:[%s7129_s23 + $0x40] sm:$0xff]  }
 0x41c   : > { %v5753_v56 = vmax.f32 %v5721_v40, 0.0  ;;  %v5719_v6 = vadd.f32 %v6342_v22, %v5575_v9  ;;  %v6369_v22 = vunpack.c.l.bf16 %v6483_v61  ;;  %v6365_v40 = vunpack.c.l.bf16 %v6482_v31 }
 0x41e   : > { %v6413_v49 = vpack.c.bf16 %v5753_v56, %v5752_v28  ;;  %v5751_v16 = vmax.f32 %v5719_v6, 0.0  ;;  %v6370_v28 = vunpack.c.h.bf16 %v6483_v61 }
 0x420   : > { %6492 = vst [vmem:[%s9546_s22 + $0x18] sm:$0xff] %v6413_v49   ;;  %v6408_v13 = vpack.c.bf16 %v5751_v16, %v5750_v30  ;;  %v6366_v49 = vunpack.c.h.bf16 %v6482_v31 }
 0x422   : > { %6491 = vst [vmem:[%s9546_s22 + $0x10] sm:$0xff] %v6408_v13  }
 0x441   : > { %v6775_v26 = vpop.f32.mrf.mxu0 }
 0x442   : > { %v5596_v8 = vadd.f32 %v6775_v26, %v9534_v44 }
 0x443   : > { %v5587_v59 = vpop.f32.mrf.mxu0 }
 0x444   : > { %v5588_v37 = vadd.f32 %v9534_v44, %v5587_v59  ;;  %v5724_v43 = vadd.f32 %v6353_v17, %v5596_v8 }
 0x445   : > { %v6776_v11 = vpop.f32.mrf.mxu0 }
 0x446   : > { %v5599_v14 = vadd.f32 %v6776_v11, %v9534_v44  ;;  %v5722_v12 = vadd.f32 %v6349_v10, %v5588_v37  ;;  %v5756_v39 = vmax.f32 %v5724_v43, 0.0  ;;  %v6485_v11 = vld [vmem:[%s7129_s23 + $0x58] sm:$0xff]  }
 0x447   : > { %v5590_v50 = vpop.f32.mrf.mxu0 }
 0x448   : > { %v5725_v32 = vadd.f32 %v6354_v62, %v5599_v14  ;;  %v5591_v18 = vadd.f32 %v9534_v44, %v5590_v50  ;;  %v5754_v45 = vmax.f32 %v5722_v12, 0.0  ;;  %v6484_v14 = vld [vmem:[%s7129_s23 + $0x50] sm:$0xff]  }
 0x44a   : > { %v5757_v63 = vmax.f32 %v5725_v32, 0.0  ;;  %v5723_v35 = vadd.f32 %v6350_v53, %v5591_v18  ;;  %v6377_v53 = vunpack.c.l.bf16 %v6485_v11  ;;  %v6373_v32 = vunpack.c.l.bf16 %v6484_v14 }
 0x44c   : > { %v6423_v36 = vpack.c.bf16 %v5757_v63, %v5756_v39  ;;  %v5755_v57 = vmax.f32 %v5723_v35, 0.0  ;;  %v6378_v39 = vunpack.c.h.bf16 %v6485_v11 }
 0x44e   : > { %6494 = vst [vmem:[%s9546_s22 + $0x28] sm:$0xff] %v6423_v36   ;;  %v6418_v20 = vpack.c.bf16 %v5755_v57, %v5754_v45  ;;  %v6374_v36 = vunpack.c.h.bf16 %v6484_v14 }
 0x450   : > { %6493 = vst [vmem:[%s9546_s22 + $0x20] sm:$0xff] %v6418_v20  }
 0x45a   : > { %v6779_v27 = vpop.f32.mrf.mxu0 }
 0x45b   : > { %v5612_v58 = vadd.f32 %v6779_v27, %v9534_v44 }
 0x45c   : > { %v5603_v25 = vpop.f32.mrf.mxu0 }
 0x45d   : > { %v5604_v33 = vadd.f32 %v9534_v44, %v5603_v25  ;;  %v5728_v4 = vadd.f32 %v6361_v42, %v5612_v58 }
 0x45e   : > { %v6780_v55 = vpop.f32.mrf.mxu0 }
 0x45f   : > { %v5615_v7 = vadd.f32 %v6780_v55, %v9534_v44  ;;  %v5726_v52 = vadd.f32 %v6357_v51, %v5604_v33  ;;  %v5760_v21 = vmax.f32 %v5728_v4, 0.0  ;;  %v6487_v55 = vld [vmem:[%s7129_s23 + $0x68] sm:$0xff]  }
 0x460   : > { %v5606_v23 = vpop.f32.mrf.mxu0 }
 0x461   : > { %v5729_v54 = vadd.f32 %v6362_v5, %v5615_v7  ;;  %v5607_v24 = vadd.f32 %v9534_v44, %v5606_v23  ;;  %v5758_v41 = vmax.f32 %v5726_v52, 0.0  ;;  %v6486_v7 = vld [vmem:[%s7129_s23 + $0x60] sm:$0xff]  }
 0x463   : > { %v5761_v60 = vmax.f32 %v5729_v54, 0.0  ;;  %v5727_v48 = vadd.f32 %v6358_v15, %v5607_v24  ;;  %v6385_v15 = vunpack.c.l.bf16 %v6487_v55  ;;  %v6381_v54 = vunpack.c.l.bf16 %v6486_v7 }
 0x465   : > { %v6433_v38 = vpack.c.bf16 %v5761_v60, %v5760_v21  ;;  %v5759_v29 = vmax.f32 %v5727_v48, 0.0  ;;  %v6386_v21 = vunpack.c.h.bf16 %v6487_v55 }
 0x467   : > { %6496 = vst [vmem:[%s9546_s22 + $0x38] sm:$0xff] %v6433_v38   ;;  %v6428_v46 = vpack.c.bf16 %v5759_v29, %v5758_v41  ;;  %v6382_v38 = vunpack.c.h.bf16 %v6486_v7 }
 0x469   : > { %6495 = vst [vmem:[%s9546_s22 + $0x30] sm:$0xff] %v6428_v46  }
 0x46a   : > { %v6783_v1 = vpop.f32.mrf.mxu0 }
 0x46b   : > { %v5628_v34 = vadd.f32 %v6783_v1, %v9534_v44 }
 0x46c   : > { %v5619_v19 = vpop.f32.mrf.mxu0 }
 0x46d   : > { %v5620_v9 = vadd.f32 %v9534_v44, %v5619_v19  ;;  %v5732_v6 = vadd.f32 %v6369_v22, %v5628_v34 }
 0x46e   : > { %v6784_v56 = vpop.f32.mrf.mxu0 }
 0x46f   : > { %v5631_v30 = vadd.f32 %v6784_v56, %v9534_v44  ;;  %v5730_v13 = vadd.f32 %v6365_v40, %v5620_v9  ;;  %v5764_v0 = vmax.f32 %v5732_v6, 0.0  ;;  %v6489_v56 = vld [vmem:[%s7129_s23 + $0x78] sm:$0xff]  }
 0x470   : > { %v5622_v16 = vpop.f32.mrf.mxu0 }
 0x471   : > { %v5733_v47 = vadd.f32 %v6370_v28, %v5631_v30  ;;  %v5623_v26 = vadd.f32 %v9534_v44, %v5622_v16  ;;  %v5762_v59 = vmax.f32 %v5730_v13, 0.0  ;;  %v6488_v30 = vld [vmem:[%s7129_s23 + $0x70] sm:$0xff]   ;;  %s6330_s23 = sshll.u32 %s7088_s28, 11  ;;  %s6959_s28 = scalar_lea.vmem %s9617_s29, 2048 }
 0x472   : > { %s9614_s13 = scalar_lea.hbm %s9671_s7, %s6330_s23  ;;  %p6960_p11 = scmp.ne.s32.totalorder %s9617_s29, %s6959_s28 }
 0x473   : > { %v5765_v17 = vmax.f32 %v5733_v47, 0.0  ;;  %v5731_v8 = vadd.f32 %v6366_v49, %v5623_v26  ;;  %v6393_v49 = vunpack.c.l.bf16 %v6489_v56  ;;  %v6389_v47 = vunpack.c.l.bf16 %v6488_v30  ;;  %p6967_p1 = scmp.lt.s32.totalorder %s6965_s16, %s6959_s28 }
 0x474   : > { %p6961_p12 = pnand %p6960_p11, %p7105_p5 }
 0x475   : > { %v6443_v10 = vpack.c.bf16 %v5765_v17, %v5764_v0  ;;  %v5763_v37 = vmax.f32 %v5731_v8, 0.0  ;;  %v6394_v0 = vunpack.c.h.bf16 %v6489_v56  ;;  %p6968_p2 = por %p6967_p1, %p6966_p0 }
 0x476   : > { %p6962_p13 = pneg %p6961_p12 }
 0x477   : > { %6498 = vst [vmem:[%s9546_s22 + $0x48] sm:$0xff] %v6443_v10   ;;  %v6438_v62 = vpack.c.bf16 %v5763_v37, %v5762_v59  ;;  %v6390_v10 = vunpack.c.h.bf16 %v6488_v30 }
 0x478   : > { %p6969_p3 = pnand %p6968_p2, %p6962_p13 }
 0x479   : > { %6497 = vst [vmem:[%s9546_s22 + $0x40] sm:$0xff] %v6438_v62  }
 0x47a   : > { %v6787_v43 = vpop.f32.mrf.mxu0 }
 0x47b   : > { %v5644_v50 = vadd.f32 %v6787_v43, %v9534_v44 }
 0x47c   : > { %v5635_v12 = vpop.f32.mrf.mxu0 }
 0x47d   : > { %v5636_v18 = vadd.f32 %v9534_v44, %v5635_v12  ;;  %v5736_v35 = vadd.f32 %v6377_v53, %v5644_v50 }
 0x47e   : > { %v6788_v63 = vpop.f32.mrf.mxu0 }
 0x47f   : > { %v5647_v45 = vadd.f32 %v6788_v63, %v9534_v44  ;;  %v5734_v20 = vadd.f32 %v6373_v32, %v5636_v18  ;;  %v5768_v2 = vmax.f32 %v5736_v35, 0.0 }
 0x480   : > { %v5638_v57 = vpop.f32.mrf.mxu0 }
 0x481   : > { %v5737_v3 = vadd.f32 %v6378_v39, %v5647_v45  ;;  %v5639_v27 = vadd.f32 %v9534_v44, %v5638_v57  ;;  %v5766_v25 = vmax.f32 %v5734_v20, 0.0 }
 0x483   : > { %v5769_v42 = vmax.f32 %v5737_v3, 0.0  ;;  %v5735_v58 = vadd.f32 %v6374_v36, %v5639_v27 }
 0x485   : > { %v6453_v51 = vpack.c.bf16 %v5769_v42, %v5768_v2  ;;  %v5767_v33 = vmax.f32 %v5735_v58, 0.0 }
 0x487   : > { %6500 = vst [vmem:[%s9546_s22 + $0x58] sm:$0xff] %v6453_v51   ;;  %v6448_v5 = vpack.c.bf16 %v5767_v33, %v5766_v25 }
 0x489   : > { %6499 = vst [vmem:[%s9546_s22 + $0x50] sm:$0xff] %v6448_v5  }
 0x48b   : > { %v6791_v4 = vpop.f32.mrf.mxu0 }
 0x48c   : > { %v5660_v23 = vadd.f32 %v6791_v4, %v9534_v44 }
 0x48d   : > { %v5651_v52 = vpop.f32.mrf.mxu0 }
 0x48e   : > { %v5652_v24 = vadd.f32 %v9534_v44, %v5651_v52  ;;  %v5740_v48 = vadd.f32 %v6385_v15, %v5660_v23 }
 0x48f   : > { %v6792_v60 = vpop.f32.mrf.mxu0 }
 0x490   : > { %v5663_v41 = vadd.f32 %v6792_v60, %v9534_v44  ;;  %v5738_v46 = vadd.f32 %v6381_v54, %v5652_v24  ;;  %v5772_v31 = vmax.f32 %v5740_v48, 0.0 }
 0x491   : > { %v5654_v29 = vpop.f32.mrf.mxu0 }
 0x492   : > { %v5741_v61 = vadd.f32 %v6386_v21, %v5663_v41  ;;  %v5655_v1 = vadd.f32 %v9534_v44, %v5654_v29  ;;  %v5770_v19 = vmax.f32 %v5738_v46, 0.0 }
 0x494   : > { %v5773_v22 = vmax.f32 %v5741_v61, 0.0  ;;  %v5739_v34 = vadd.f32 %v6382_v38, %v5655_v1 }
 0x496   : > { %v6463_v40 = vpack.c.bf16 %v5773_v22, %v5772_v31  ;;  %v5771_v9 = vmax.f32 %v5739_v34, 0.0 }
 0x498   : > { %6502 = vst [vmem:[%s9546_s22 + $0x68] sm:$0xff] %v6463_v40   ;;  %v6458_v28 = vpack.c.bf16 %v5771_v9, %v5770_v19 }
 0x49a   : > { %6501 = vst [vmem:[%s9546_s22 + $0x60] sm:$0xff] %v6458_v28  }
 0x4ba   : > { %v6795_v6 = vpop.f32.mrf.mxu0 }
 0x4bb   : > { %v5676_v16 = vadd.f32 %v6795_v6, %v9534_v44 }
 0x4bc   : > { %v5667_v13 = vpop.f32.mrf.mxu0 }
 0x4bd   : > { %v5668_v26 = vadd.f32 %v9534_v44, %v5667_v13  ;;  %v5744_v8 = vadd.f32 %v6393_v49, %v5676_v16 }
 0x4be   : > { %v6796_v17 = vpop.f32.mrf.mxu0 }
 0x4bf   : > { %v5679_v59 = vadd.f32 %v6796_v17, %v9534_v44  ;;  %v5742_v62 = vadd.f32 %v6389_v47, %v5668_v26  ;;  %v5776_v14 = vmax.f32 %v5744_v8, 0.0 }
 0x4c0   : > { %v5670_v37 = vpop.f32.mrf.mxu0 }
 0x4c1   : > { %v5745_v11 = vadd.f32 %v6394_v0, %v5679_v59  ;;  %v5671_v43 = vadd.f32 %v9534_v44, %v5670_v37  ;;  %v5774_v12 = vmax.f32 %v5742_v62, 0.0 }
 0x4c3   : > { %v5777_v53 = vmax.f32 %v5745_v11, 0.0  ;;  %v5743_v50 = vadd.f32 %v6390_v10, %v5671_v43 }
 0x4c5   : > { %v6473_v32 = vpack.c.bf16 %v5777_v53, %v5776_v14  ;;  %v5775_v18 = vmax.f32 %v5743_v50, 0.0 }
 0x4c7   : > { %6504 = vst [vmem:[%s9546_s22 + $0x78] sm:$0xff] %v6473_v32   ;;  %v6468_v39 = vpack.c.bf16 %v5775_v18, %v5774_v12 }
 0x4c9   : > { %6503 = vst [vmem:[%s9546_s22 + $0x70] sm:$0xff] %v6468_v39  }
 0x4ca   : > { %6972 = shalt.err (!%p6969_p3)
}
 0x4cb   : > { %s6973_s17 = scalar_lea.hbm %s9614_s13, 2048  ;;  %s6977_s22 = scalar_lea.hbm %s9671_s7, 4096 }
 0x4cc   : > { %p6974_p4 = scmp.ne.s32.totalorder %s9614_s13, %s6973_s17  ;;  %p6978_p9 = scmp.lt.s32.totalorder %s9614_s13, %s9671_s7 }
 0x4cd   : > { %p6979_p10 = scmp.lt.s32.totalorder %s6977_s22, %s6973_s17 }
 0x4ce   : > { %p6975_p7 = pnand %p6974_p4, %p7105_p5 }
 0x4cf   : > { %p6980_p11 = por %p6979_p10, %p6978_p9 }
 0x4d0   : > { %p6976_p8 = pneg %p6975_p7 }
 0x4d2   : > { %p6981_p12 = pnand %p6980_p11, %p6976_p8 }
 0x4d4   : > { %6984 = shalt.err (!%p6981_p12)
}
 0x4d5   : > { %s7026_s9 = smov 4  }
 0x4d6   : > { %6813 = dma.vmem_to_hbm [thread:$0]  (%p7105_p5), %s9617_s29, 2048, %s9614_s13, %s9622_s14, %s7023_s21, %s7023_s21, %s7026_s9  }
 0x4d7 PF: > { %p6819_p13 = scmp.ge.s32.totalorder %s7019_s27, 2  ;;  %s5967_s28 = sand.u32 1, %s7007_s24  }
 0x4d8   : > { %s5968_s20 = scalar_lea.sflag [#allocation5], %s5967_s28 }
 0x4d9   : > { %p6816_p0 = pnand %p6819_p13, %p7109_p6 }
 0x4db   : > { %p6817_p1 = pneg %p6816_p0 }
 0x4dd   : > { %7002 = dma.done.wait (%p6817_p1), %s5968_s20, 2048  }
 0x4de   : > { %7004 = vsyncadd (%p6817_p1), %s5968_s20, 4294965248  ;;  %p17_p2 = scmp.ge.s32.totalorder %s7092_s30, 4   ;;  %s9690_s24 = smov %s7011_s25 }
 0x4df   : > { %s9691_s25 = smov %s7015_s26  ;;  %s9692_s26 = smov %s7103_s10 }
 0x4e0   : > { %s9693_s27 = smov %s7092_s30  ;;  %19 = sbr.rel (!%p17_p2) target bundleno = 3 (0x3), region = 86 }
 0x4e5   :  { %5973 = vsyncpa [#allocation5], 1 }
 0x4e6   :  { %5975 = vsyncpa [#allocation5 + $0x1], 1 }

</bundles_post_ra>
